<compile_context>
chip_gen: v7x
topology: tpu7x:2x2x1
jax: 0.10.0
libtpu: 0.0.40
codegen_flags: <defaults>
</compile_context>

<pallas_src>
import functools

import jax
import jax.numpy as jnp
from jax import lax
from jax.experimental import pallas as pl
from jax.experimental.pallas import tpu as pltpu


# ----------------------------------------------------------------------------
# helpers
# ----------------------------------------------------------------------------
def _round_up(a, b):
    return ((a + b - 1) // b) * b


def _const_spec(shape):
    # whole-array block, same block every grid step (loaded once, stays resident)
    return pl.BlockSpec(shape, lambda *_: (0,) * len(shape))


def _tpu_device_kind():
    try:
        return jax.devices()[0].device_kind.lower()
    except Exception:
        return ""


def _vmem_capacity_bytes(kind):
    try:
        return int(pltpu.get_tpu_info().vmem_capacity_bytes)
    except Exception:
        pass
    if "v2" in kind or "v3" in kind:
        return 16 * 1024 * 1024
    if "v7" in kind:
        return 64 * 1024 * 1024
    if "v4" in kind or "v5" in kind or "v6" in kind:
        return 128 * 1024 * 1024
    return 64 * 1024 * 1024   # unknown: be conservative


def _unpack_weights(weights, phi_layers, gamma_layers):
    idx = 0

    def take(n):
        nonlocal idx
        out = list(weights[idx:idx + n])
        idx += n
        return out

    phi_w0a, phi_w0b, phi_w0c, phi_b0 = take(4)
    phi_hidden = take(2 * (phi_layers - 1))
    phi_wout, phi_bout = take(2)
    g_w0x, g_w0m, g_b0 = take(3)
    g_hidden = take(2 * (gamma_layers - 1))
    g_wout, g_bout = take(2)
    assert idx == len(weights)
    return dict(phi_w0a=phi_w0a, phi_w0b=phi_w0b, phi_w0c=phi_w0c, phi_b0=phi_b0,
                phi_hidden=phi_hidden, phi_wout=phi_wout, phi_bout=phi_bout,
                g_w0x=g_w0x, g_w0m=g_w0m, g_b0=g_b0,
                g_hidden=g_hidden, g_wout=g_wout, g_bout=g_bout)


# ----------------------------------------------------------------------------
# kernel 1 (fallback path): node-level projections of the first phi layer
# ----------------------------------------------------------------------------
def _proj_kernel(xcat_ref, wa_ref, wb_ref, pdst_ref, psrc_ref):
    f32 = jnp.float32
    xcat = xcat_ref[...]
    pdst_ref[...] = jnp.dot(xcat, wa_ref[...], preferred_element_type=f32).astype(jnp.bfloat16)
    psrc_ref[...] = jnp.dot(xcat, wb_ref[...], preferred_element_type=f32).astype(jnp.bfloat16)


# ----------------------------------------------------------------------------
# kernel 2: per-edge messages + scatter-add (msg-sum and in-degree), tiled over edges
# ----------------------------------------------------------------------------
def _make_edge_kernel(n_hidden, fused, f32_onehot_hop):
    f32 = jnp.float32
    bf16 = jnp.bfloat16

    def _core(src_ref, dst_ref, p_dst, p_src, b0_ref, hidden_refs, wout_ref, bout_ref,
              acc_ref):
        tE = src_ref.shape[0]
        N_pad = p_dst.shape[0]

        @pl.when(pl.program_id(0) == 0)
        def _():
            acc_ref[...] = jnp.zeros_like(acc_ref)

        # One iota shared by both compares; single dtype hop where the VPU has bf16
        # support (f32 hop only on older generations).  0/1 values are exact in bf16.
        # Padded edges carry index -1 -> all-zero rows -> contribute nothing.
        node_iota = lax.broadcasted_iota(jnp.int32, (tE, N_pad), 1)
        eq_dst = dst_ref[...] == node_iota
        eq_src = src_ref[...] == node_iota
        if f32_onehot_hop:
            oh_dst = eq_dst.astype(f32).astype(bf16)
            oh_src = eq_src.astype(f32).astype(bf16)
        else:
            oh_dst = eq_dst.astype(bf16)
            oh_src = eq_src.astype(bf16)

        # First phi layer == gather of node-level projections (bf16 x bf16 -> f32 acc).
        h = jnp.dot(oh_dst, p_dst, preferred_element_type=f32)
        h = h + jnp.dot(oh_src, p_src, preferred_element_type=f32)
        h = jnp.tanh(h + b0_ref[...])
        for layer in range(n_hidden):
            w = hidden_refs[2 * layer][...]
            b = hidden_refs[2 * layer + 1][...]
            h = jnp.tanh(jnp.dot(h, w, preferred_element_type=f32) + b)

        # Augmented output layer: column 0 = message, column 1 == 1.0 (degree counter).
        msg = jnp.dot(h, wout_ref[...], preferred_element_type=f32) + bout_ref[...]   # [tE, 2]

        # Scatter-add both rows in one MXU pass: msg^T @ oh_dst -> [2, N_pad] (lane-dense).
        # TODO(synk): msg is quantized to bf16 for the MXU operand; the pure-JAX reference
        # mirrors this, but a full-f32 PyTorch forward differs at ~1e-3 per message.
        upd = lax.dot_general(msg.astype(bf16), oh_dst,
                              (((0,), (0,)), ((), ())), preferred_element_type=f32)
        acc_ref[...] += upd

    if fused:
        def kernel(src_ref, dst_ref, xcat_ref, wa_ref, wb_ref, b0_ref, *rest):
            hidden_refs = rest[:2 * n_hidden]
            wout_ref = rest[2 * n_hidden]
            bout_ref = rest[2 * n_hidden + 1]
            acc_ref = rest[2 * n_hidden + 2]
            pdst_s = rest[2 * n_hidden + 3]
            psrc_s = rest[2 * n_hidden + 4]

            # Fold the first phi layer to node level ONCE into single-buffered VMEM
            # scratch (no HBM round trip, no double-buffered resident copy of P).
            @pl.when(pl.program_id(0) == 0)
            def _():
                xcat = xcat_ref[...]
                pdst_s[...] = jnp.dot(xcat, wa_ref[...],
                                      preferred_element_type=f32).astype(bf16)
                psrc_s[...] = jnp.dot(xcat, wb_ref[...],
                                      preferred_element_type=f32).astype(bf16)

            _core(src_ref, dst_ref, pdst_s[...], psrc_s[...], b0_ref,
                  hidden_refs, wout_ref, bout_ref, acc_ref)
        return kernel

    def kernel(src_ref, dst_ref, pdst_ref, psrc_ref, b0_ref, *rest):
        hidden_refs = rest[:2 * n_hidden]
        wout_ref = rest[2 * n_hidden]
        bout_ref = rest[2 * n_hidden + 1]
        acc_ref = rest[2 * n_hidden + 2]
        _core(src_ref, dst_ref, pdst_ref[...], psrc_ref[...], b0_ref,
              hidden_refs, wout_ref, bout_ref, acc_ref)
    return kernel


# ----------------------------------------------------------------------------
# kernel 3: gamma MLP + residual, tiled over nodes (parallel)
# ----------------------------------------------------------------------------
def _make_gamma_kernel(n_hidden, input_size, F):
    def kernel(*refs):
        f32 = jnp.float32
        x_ref, agg_ref, w0x_ref, w0m_ref, b0_ref = refs[:5]
        hidden_refs = refs[5:5 + 2 * n_hidden]
        wout_ref = refs[5 + 2 * n_hidden]
        bout_ref = refs[6 + 2 * n_hidden]
        out_ref = refs[-1]

        x = x_ref[...]
        agg = agg_ref[...]                                   # [tN, 1] mean message
        g = jnp.dot(x, w0x_ref[...], preferred_element_type=f32)
        g = g + agg * w0m_ref[...]                           # rank-1 update on the VPU (no K=1 dot)
        g = jnp.tanh(g + b0_ref[...])
        for layer in range(n_hidden):
            w = hidden_refs[2 * layer][...]
            b = hidden_refs[2 * layer + 1][...]
            g = jnp.tanh(jnp.dot(g, w, preferred_element_type=f32) + b)
        dudt = jnp.dot(g, wout_ref[...], preferred_element_type=f32) + bout_ref[...]
        out_ref[...] = x[:, F - input_size:] + dudt

    return kernel


# ----------------------------------------------------------------------------
# wrapper
# ----------------------------------------------------------------------------
@functools.partial(jax.jit,
                   static_argnames=("input_size", "lookback", "phi_layers",
                                    "gamma_layers", "fuse_projection"))
def graphpde_forward(x, pos, edge_index, weights, *, input_size, lookback,
                     phi_layers, gamma_layers, fuse_projection=None):
    f32 = jnp.float32
    bf16 = jnp.bfloat16
    W = _unpack_weights(list(weights), phi_layers, gamma_layers)
    N, F = x.shape
    assert F == input_size * lookback
    D = pos.shape[1]
    E = edge_index.shape[1]
    H = W["phi_w0a"].shape[1]
    GH = W["g_w0x"].shape[1]

    # ---- generation-dependent VMEM sizing ----
    kind = _tpu_device_kind()
    vmem_cap = _vmem_capacity_bytes(kind)
    onehot_budget = max(4 * 1024 * 1024, vmem_cap // 4)            # 2 x [tE,N_pad] bf16
    vmem_limit = min(max(vmem_cap * 3 // 4, 16 * 1024 * 1024), 100 * 1024 * 1024)
    f32_onehot_hop = not ("v6" in kind or "v7" in kind)            # bf16 VPU -> direct cast

    # ---- node tiles for the parallel kernels ----
    if N <= 512:
        tN = _round_up(max(N, 8), 16)
        N_pad = tN
    else:
        tN = 512
        N_pad = _round_up(N, tN)
    nNt = N_pad // tN

    # ---- edge tiles: as large as the per-generation one-hot budget allows ----
    max_te = max(128, (onehot_budget // max(1, 4 * N_pad)) // 128 * 128)
    tE = min(512, max_te, _round_up(max(E, 1), 128))
    tE = max(8, tE)
    E_pad = _round_up(max(E, 1), tE)
    nEt = E_pad // tE

    # ---- padding; padded edges get index -1 (all-zero one-hot rows) ----
    xp = jnp.zeros((N_pad, F), f32).at[:N].set(x.astype(f32))
    posp = jnp.zeros((N_pad, D), f32).at[:N].set(pos.astype(f32))
    xcat = jnp.concatenate([xp, posp], axis=1)                      # [N_pad, F+D]
    src = edge_index[0].astype(jnp.int32)
    dst = edge_index[1].astype(jnp.int32)
    srcp = jnp.full((E_pad, 1), -1, jnp.int32).at[:E, 0].set(src)
    dstp = jnp.full((E_pad, 1), -1, jnp.int32).at[:E, 0].set(dst)

    # fold pos into x (kills the degenerate K=D matmul): p_dst = [x|pos]@[W0a;-W0c], etc.
    wa_cat = jnp.concatenate([W["phi_w0a"], -W["phi_w0c"]], axis=0)   # [F+D, H]
    wb_cat = jnp.concatenate([W["phi_w0b"], W["phi_w0c"]], axis=0)    # [F+D, H]
    # augment the phi output layer with a constant-1 column so the same scatter matmul
    # also produces the in-degree (no wrapper-side XLA scatter for deg).
    wout_aug = jnp.concatenate([W["phi_wout"], jnp.zeros((H, 1), f32)], axis=1)   # [H, 2]
    bout_aug = jnp.concatenate([W["phi_bout"], jnp.ones((1, 1), f32)], axis=1)    # [1, 2]

    if fuse_projection is None:
        # fuse when x|pos + P scratch fit comfortably next to the one-hot tiles
        fuse_projection = N_pad * ((F + D) * 4 * 2 + H * 2 * 2) <= 8 * 1024 * 1024

    n_phi_hidden = phi_layers - 1
    edge_out_shape = jax.ShapeDtypeStruct((2, N_pad), f32)
    edge_out_spec = pl.BlockSpec((2, N_pad), lambda k: (0, 0))
    edge_params = pltpu.CompilerParams(dimension_semantics=("arbitrary",),
                                       vmem_limit_bytes=int(vmem_limit))
    # TODO(synk): on v7x, split this reduction across the 2 TensorCores (partition edges
    # by destination half, leading "parallel" grid axis); for large graphs replace the
    # O(E*N) one-hot with a sort-by-dst + segment-sum restructure (scalar prefetch).

    if fuse_projection:
        # ---- fused: projection computed once into VMEM scratch inside the edge kernel ----
        edge_inputs = ([srcp, dstp, xcat, wa_cat, wb_cat, W["phi_b0"]]
                       + W["phi_hidden"] + [wout_aug, bout_aug])
        edge_specs = ([pl.BlockSpec((tE, 1), lambda k: (k, 0)),
                       pl.BlockSpec((tE, 1), lambda k: (k, 0)),
                       _const_spec((N_pad, F + D)),
                       _const_spec((F + D, H)), _const_spec((F + D, H)),
                       _const_spec((1, H))]
                      + [_const_spec(w.shape) for w in W["phi_hidden"]]
                      + [_const_spec((H, 2)), _const_spec((1, 2))])
        agg2 = pl.pallas_call(
            _make_edge_kernel(n_phi_hidden, True, f32_onehot_hop),
            grid=(nEt,),
            out_shape=edge_out_shape,
            in_specs=edge_specs,
            out_specs=edge_out_spec,
            scratch_shapes=[pltpu.VMEM((N_pad, H), bf16),
                            pltpu.VMEM((N_pad, H), bf16)],
            compiler_params=edge_params,
        )(*edge_inputs)
    else:
        # ---- fallback for large N: separate node-projection kernel ----
        p_dst, p_src = pl.pallas_call(
            _proj_kernel,
            grid=(nNt,),
            out_shape=(jax.ShapeDtypeStruct((N_pad, H), bf16),
                       jax.ShapeDtypeStruct((N_pad, H), bf16)),
            in_specs=[pl.BlockSpec((tN, F + D), lambda i: (i, 0)),
                      _const_spec((F + D, H)), _const_spec((F + D, H))],
            out_specs=(pl.BlockSpec((tN, H), lambda i: (i, 0)),
                       pl.BlockSpec((tN, H), lambda i: (i, 0))),
            compiler_params=pltpu.CompilerParams(dimension_semantics=("parallel",)),
        )(xcat, wa_cat, wb_cat)

        edge_inputs = ([srcp, dstp, p_dst, p_src, W["phi_b0"]]
                       + W["phi_hidden"] + [wout_aug, bout_aug])
        edge_specs = ([pl.BlockSpec((tE, 1), lambda k: (k, 0)),
                       pl.BlockSpec((tE, 1), lambda k: (k, 0)),
                       _const_spec((N_pad, H)), _const_spec((N_pad, H)),
                       _const_spec((1, H))]
                      + [_const_spec(w.shape) for w in W["phi_hidden"]]
                      + [_const_spec((H, 2)), _const_spec((1, 2))])
        agg2 = pl.pallas_call(
            _make_edge_kernel(n_phi_hidden, False, f32_onehot_hop),
            grid=(nEt,),
            out_shape=edge_out_shape,
            in_specs=edge_specs,
            out_specs=edge_out_spec,
            compiler_params=edge_params,
        )(*edge_inputs)

    # mean aggregation; max(deg,1) gives agg=0 for isolated nodes (PyG 'mean' semantics)
    agg_col = (agg2[0] / jnp.maximum(agg2[1], 1.0)).reshape(N_pad, 1)
    # TODO(synk): the [1,N]->[N,1] relayout is a tiny XLA transpose on the critical path;
    # could be folded into the gamma kernel via an in-kernel XLU transpose of [1,tN] slices.

    # ---- call 3: gamma MLP + residual ----
    n_g_hidden = gamma_layers - 1
    gamma_inputs = ([xp, agg_col, W["g_w0x"], W["g_w0m"], W["g_b0"]]
                    + W["g_hidden"] + [W["g_wout"], W["g_bout"]])
    gamma_specs = ([pl.BlockSpec((tN, F), lambda i: (i, 0)),
                    pl.BlockSpec((tN, 1), lambda i: (i, 0)),
                    _const_spec((F, GH)), _const_spec((1, GH)), _const_spec((1, GH))]
                   + [_const_spec(w.shape) for w in W["g_hidden"]]
                   + [_const_spec((GH, input_size)), _const_spec((1, input_size))])
    out_pad = pl.pallas_call(
        _make_gamma_kernel(n_g_hidden, input_size, F),
        grid=(nNt,),
        out_shape=jax.ShapeDtypeStruct((N_pad, input_size), f32),
        in_specs=gamma_specs,
        out_specs=pl.BlockSpec((tN, input_size), lambda i: (i, 0)),
        compiler_params=pltpu.CompilerParams(dimension_semantics=("parallel",)),
    )(*gamma_inputs)

    return out_pad[:N]


# ----------------------------------------------------------------------------
# pure-JAX reference (same math; mirrors the kernel's bf16 gather/scatter operands)
# ----------------------------------------------------------------------------
def graphpde_reference(x, pos, edge_index, weights, *, input_size, lookback,
                       phi_layers, gamma_layers):
    f32, bf16 = jnp.float32, jnp.bfloat16
    W = _unpack_weights(list(weights), phi_layers, gamma_layers)
    N, F = x.shape
    x = x.astype(f32)
    pos = pos.astype(f32)
    src = edge_index[0].astype(jnp.int32)
    dst = edge_index[1].astype(jnp.int32)
    mm = lambda a, b: jnp.dot(a, b, preferred_element_type=f32)

    xcat = jnp.concatenate([x, pos], axis=1)
    wa = jnp.concatenate([W["phi_w0a"], -W["phi_w0c"]], axis=0)
    wb = jnp.concatenate([W["phi_w0b"], W["phi_w0c"]], axis=0)
    p_dst = mm(xcat, wa).astype(bf16).astype(f32)
    p_src = mm(xcat, wb).astype(bf16).astype(f32)

    h = jnp.tanh(p_dst[dst] + p_src[src] + W["phi_b0"])
    for layer in range(phi_layers - 1):
        h = jnp.tanh(mm(h, W["phi_hidden"][2 * layer]) + W["phi_hidden"][2 * layer + 1])
    msg = (mm(h, W["phi_wout"]) + W["phi_bout"]).astype(bf16).astype(f32)   # [E, 1]

    agg_sum = jnp.zeros((N, 1), f32).at[dst].add(msg)
    deg = jnp.zeros((N,), f32).at[dst].add(1.0)
    agg = agg_sum / jnp.maximum(deg, 1.0).reshape(N, 1)

    g = jnp.tanh(mm(x, W["g_w0x"]) + agg * W["g_w0m"] + W["g_b0"])
    for layer in range(gamma_layers - 1):
        g = jnp.tanh(mm(g, W["g_hidden"][2 * layer]) + W["g_hidden"][2 * layer + 1])
    dudt = mm(g, W["g_wout"]) + W["g_bout"]
    return x[:, F - input_size:] + dudt


# ----------------------------------------------------------------------------
# deterministic parameter initialization (PyTorch Linear-style uniform)
# ----------------------------------------------------------------------------
def _linear_init(key, fan_in, shape):
    bound = 1.0 / jnp.sqrt(jnp.asarray(fan_in, jnp.float32))
    return jax.random.uniform(key, shape, jnp.float32, -bound, bound)


def init_weights(key, *, input_size, lookback, spatial_dims,
                 phi_hidden, phi_layers, gamma_hidden, gamma_layers):
    F = input_size * lookback
    msg_dim = 1
    ws = []
    keys = iter(jax.random.split(key, 64))

    phi_in = 2 * F + spatial_dims
    ws.append(_linear_init(next(keys), phi_in, (F, phi_hidden)))             # W0a (x_i rows)
    ws.append(_linear_init(next(keys), phi_in, (F, phi_hidden)))             # W0b (x_j rows)
    ws.append(_linear_init(next(keys), phi_in, (spatial_dims, phi_hidden)))  # W0c (dpos rows)
    ws.append(_linear_init(next(keys), phi_in, (1, phi_hidden)))             # b0
    for _ in range(phi_layers - 1):
        ws.append(_linear_init(next(keys), phi_hidden, (phi_hidden, phi_hidden)))
        ws.append(_linear_init(next(keys), phi_hidden, (1, phi_hidden)))
    ws.append(_linear_init(next(keys), phi_hidden, (phi_hidden, msg_dim)))
    ws.append(_linear_init(next(keys), phi_hidden, (1, msg_dim)))

    g_in = F + msg_dim
    ws.append(_linear_init(next(keys), g_in, (F, gamma_hidden)))             # W0x
    ws.append(_linear_init(next(keys), g_in, (msg_dim, gamma_hidden)))       # W0m
    ws.append(_linear_init(next(keys), g_in, (1, gamma_hidden)))             # b0
    for _ in range(gamma_layers - 1):
        ws.append(_linear_init(next(keys), gamma_hidden, (gamma_hidden, gamma_hidden)))
        ws.append(_linear_init(next(keys), gamma_hidden, (1, gamma_hidden)))
    ws.append(_linear_init(next(keys), gamma_hidden, (gamma_hidden, input_size)))
    ws.append(_linear_init(next(keys), gamma_hidden, (1, input_size)))
    return ws


# ----------------------------------------------------------------------------
if __name__ == "__main__":
    input_size = 4
    lookback = 2
    spatial_dims = 2
    phi_hidden, phi_layers = 32, 2
    gamma_hidden, gamma_layers = 32, 2
    N, E = 48, 600            # small, but exercises multiple edge tiles
    F = input_size * lookback

    key = jax.random.PRNGKey(0)
    kx, kp, ke, kw = jax.random.split(key, 4)

    x = jax.random.normal(kx, (N, F), jnp.float32)
    pos = jax.random.uniform(kp, (N, spatial_dims), jnp.float32)
    edge_index = jax.random.randint(ke, (2, E), 0, N, jnp.int32)

    weights = init_weights(kw, input_size=input_size, lookback=lookback,
                           spatial_dims=spatial_dims,
                           phi_hidden=phi_hidden, phi_layers=phi_layers,
                           gamma_hidden=gamma_hidden, gamma_layers=gamma_layers)

    ref = graphpde_reference(x, pos, edge_index, weights,
                             input_size=input_size, lookback=lookback,
                             phi_layers=phi_layers, gamma_layers=gamma_layers)
    ref = jax.block_until_ready(ref)

    for fuse in (True, False):        # exercise both the fused and the 3-call (large-N) paths
        out = graphpde_forward(x, pos, edge_index, weights,
                               input_size=input_size, lookback=lookback,
                               phi_layers=phi_layers, gamma_layers=gamma_layers,
                               fuse_projection=fuse)
        out = jax.block_until_ready(out)
        assert out.shape == (N, input_size)
        max_diff = float(jnp.max(jnp.abs(out - ref)))
        assert jnp.allclose(out, ref, atol=2e-3, rtol=2e-3), (
            f"Pallas kernel mismatch vs reference (fuse={fuse}, max abs diff {max_diff})")

    print("KERNEL_OK")
</pallas_src>

<mosaic_0001>
module attributes {stable_mosaic.version = 11 : i64} {
  func.func @kernel(%arg0: i32, %arg1: memref<512x1xi32, #tpu.memory_space<vmem>>, %arg2: memref<512x1xi32, #tpu.memory_space<vmem>>, %arg3: memref<48x10xf32, #tpu.memory_space<vmem>>, %arg4: memref<10x32xf32, #tpu.memory_space<vmem>>, %arg5: memref<10x32xf32, #tpu.memory_space<vmem>>, %arg6: memref<1x32xf32, #tpu.memory_space<vmem>>, %arg7: memref<32x32xf32, #tpu.memory_space<vmem>>, %arg8: memref<1x32xf32, #tpu.memory_space<vmem>>, %arg9: memref<32x2xf32, #tpu.memory_space<vmem>>, %arg10: memref<1x2xf32, #tpu.memory_space<vmem>>, %arg11: memref<2x48xf32, #tpu.memory_space<vmem>>, %arg12: memref<48x32xbf16, #tpu.memory_space<vmem>>, %arg13: memref<48x32xbf16, #tpu.memory_space<vmem>>) attributes {dimension_semantics = [#tpu.dimension_semantics<arbitrary>], iteration_bounds = array<i64: 2>, scalar_prefetch = 0 : i64, scratch_operands = 2 : i64, tpu.core_type = #tpu.core_type<tc>, window_params = [{transform_indices = @transform_0, window_bounds = array<i64: 512, 1>}, {transform_indices = @transform_1, window_bounds = array<i64: 512, 1>}, {pipeline_mode = #tpu.pipeline_mode<synchronous>, transform_indices = @transform_2, window_bounds = array<i64: 48, 10>}, {pipeline_mode = #tpu.pipeline_mode<synchronous>, transform_indices = @transform_3, window_bounds = array<i64: 10, 32>}, {pipeline_mode = #tpu.pipeline_mode<synchronous>, transform_indices = @transform_4, window_bounds = array<i64: 10, 32>}, {pipeline_mode = #tpu.pipeline_mode<synchronous>, transform_indices = @transform_5, window_bounds = array<i64: 1, 32>}, {pipeline_mode = #tpu.pipeline_mode<synchronous>, transform_indices = @transform_6, window_bounds = array<i64: 32, 32>}, {pipeline_mode = #tpu.pipeline_mode<synchronous>, transform_indices = @transform_7, window_bounds = array<i64: 1, 32>}, {pipeline_mode = #tpu.pipeline_mode<synchronous>, transform_indices = @transform_8, window_bounds = array<i64: 32, 2>}, {pipeline_mode = #tpu.pipeline_mode<synchronous>, transform_indices = @transform_9, window_bounds = array<i64: 1, 2>}, {pipeline_mode = #tpu.pipeline_mode<synchronous>, transform_indices = @transform_10, window_bounds = array<i64: 2, 48>}]} {
    %c0_i32 = arith.constant 0 : i32
    %0 = arith.cmpi eq, %arg0, %c0_i32 : i32
    %1 = arith.extui %0 : i1 to i32
    %c0_i32_0 = arith.constant 0 : i32
    %2 = arith.cmpi ne, %1, %c0_i32_0 : i32
    scf.if %2 {
      %c0_28 = arith.constant 0 : index
      %c0_29 = arith.constant 0 : index
      %44 = vector.load %arg3[%c0_28, %c0_29] : memref<48x10xf32, #tpu.memory_space<vmem>>, vector<48x10xf32>
      %c0_30 = arith.constant 0 : index
      %c0_31 = arith.constant 0 : index
      %45 = vector.load %arg4[%c0_30, %c0_31] : memref<10x32xf32, #tpu.memory_space<vmem>>, vector<10x32xf32>
      %cst_32 = arith.constant dense<0.000000e+00> : vector<48x32xf32>
      %46 = tpu.matmul %44, %45, %cst_32 {dimension_numbers = #tpu.dot_dimension_numbers<[1], [0], [0], [1], [0, 0, 1, 1], [], []>} : vector<48x10xf32>, vector<10x32xf32>, vector<48x32xf32> -> vector<48x32xf32>
      %47 = arith.truncf %46 : vector<48x32xf32> to vector<48x32xbf16>
      %c0_33 = arith.constant 0 : index
      %c0_34 = arith.constant 0 : index
      %48 = vector.load %arg12[%c0_33, %c0_34] : memref<48x32xbf16, #tpu.memory_space<vmem>>, vector<48x32xbf16>
      tpu.vector_store %arg12[%c0_33, %c0_34], %47 {strides = array<i32>} : memref<48x32xbf16, #tpu.memory_space<vmem>>, vector<48x32xbf16>,
      %c0_35 = arith.constant 0 : index
      %c0_36 = arith.constant 0 : index
      %49 = vector.load %arg5[%c0_35, %c0_36] : memref<10x32xf32, #tpu.memory_space<vmem>>, vector<10x32xf32>
      %cst_37 = arith.constant dense<0.000000e+00> : vector<48x32xf32>
      %50 = tpu.matmul %44, %49, %cst_37 {dimension_numbers = #tpu.dot_dimension_numbers<[1], [0], [0], [1], [0, 0, 1, 1], [], []>} : vector<48x10xf32>, vector<10x32xf32>, vector<48x32xf32> -> vector<48x32xf32>
      %51 = arith.truncf %50 : vector<48x32xf32> to vector<48x32xbf16>
      %c0_38 = arith.constant 0 : index
      %c0_39 = arith.constant 0 : index
      %52 = vector.load %arg13[%c0_38, %c0_39] : memref<48x32xbf16, #tpu.memory_space<vmem>>, vector<48x32xbf16>
      tpu.vector_store %arg13[%c0_38, %c0_39], %51 {strides = array<i32>} : memref<48x32xbf16, #tpu.memory_space<vmem>>, vector<48x32xbf16>,
    } else {
    }
    %c0 = arith.constant 0 : index
    %c0_1 = arith.constant 0 : index
    %3 = vector.load %arg12[%c0, %c0_1] : memref<48x32xbf16, #tpu.memory_space<vmem>>, vector<48x32xbf16>
    %c0_2 = arith.constant 0 : index
    %c0_3 = arith.constant 0 : index
    %4 = vector.load %arg13[%c0_2, %c0_3] : memref<48x32xbf16, #tpu.memory_space<vmem>>, vector<48x32xbf16>
    %c0_i32_4 = arith.constant 0 : i32
    %5 = arith.cmpi eq, %arg0, %c0_i32_4 : i32
    %6 = arith.extui %5 : i1 to i32
    %c0_i32_5 = arith.constant 0 : i32
    %7 = arith.cmpi ne, %6, %c0_i32_5 : i32
    scf.if %7 {
      %cst_28 = arith.constant 0.000000e+00 : f32
      %44 = vector.broadcast %cst_28 : f32 to vector<2x48xf32>
      %c0_29 = arith.constant 0 : index
      %c0_30 = arith.constant 0 : index
      %45 = vector.load %arg11[%c0_29, %c0_30] : memref<2x48xf32, #tpu.memory_space<vmem>>, vector<2x48xf32>
      tpu.vector_store %arg11[%c0_29, %c0_30], %44 {strides = array<i32>} : memref<2x48xf32, #tpu.memory_space<vmem>>, vector<2x48xf32>,
    } else {
    }
    %8 = tpu.iota {dimensions = array<i32: 1>} : vector<512x48xi32>
    %c0_6 = arith.constant 0 : index
    %c0_7 = arith.constant 0 : index
    %9 = vector.load %arg2[%c0_6, %c0_7] : memref<512x1xi32, #tpu.memory_space<vmem>>, vector<512x1xi32>
    %10 = vector.broadcast %9 : vector<512x1xi32> to vector<512x48xi32>
    %11 = arith.cmpi eq, %10, %8 : vector<512x48xi32>
    %c0_8 = arith.constant 0 : index
    %c0_9 = arith.constant 0 : index
    %12 = vector.load %arg1[%c0_8, %c0_9] : memref<512x1xi32, #tpu.memory_space<vmem>>, vector<512x1xi32>
    %13 = vector.broadcast %12 : vector<512x1xi32> to vector<512x48xi32>
    %14 = arith.cmpi eq, %13, %8 : vector<512x48xi32>
    %15 = arith.extui %11 : vector<512x48xi1> to vector<512x48xi32>
    %16 = arith.sitofp %15 : vector<512x48xi32> to vector<512x48xf32>
    %17 = arith.truncf %16 : vector<512x48xf32> to vector<512x48xbf16>
    %18 = arith.extui %14 : vector<512x48xi1> to vector<512x48xi32>
    %19 = arith.sitofp %18 : vector<512x48xi32> to vector<512x48xf32>
    %20 = arith.truncf %19 : vector<512x48xf32> to vector<512x48xbf16>
    %cst = arith.constant dense<0.000000e+00> : vector<512x32xf32>
    %21 = tpu.matmul %17, %3, %cst {dimension_numbers = #tpu.dot_dimension_numbers<[1], [0], [0], [1], [0, 0, 1, 1], [], []>} : vector<512x48xbf16>, vector<48x32xbf16>, vector<512x32xf32> -> vector<512x32xf32>
    %cst_10 = arith.constant dense<0.000000e+00> : vector<512x32xf32>
    %22 = tpu.matmul %20, %4, %cst_10 {dimension_numbers = #tpu.dot_dimension_numbers<[1], [0], [0], [1], [0, 0, 1, 1], [], []>} : vector<512x48xbf16>, vector<48x32xbf16>, vector<512x32xf32> -> vector<512x32xf32>
    %23 = arith.addf %21, %22 : vector<512x32xf32>
    %c0_11 = arith.constant 0 : index
    %c0_12 = arith.constant 0 : index
    %24 = vector.load %arg6[%c0_11, %c0_12] : memref<1x32xf32, #tpu.memory_space<vmem>>, vector<1x32xf32>
    %25 = vector.broadcast %24 : vector<1x32xf32> to vector<512x32xf32>
    %26 = arith.addf %23, %25 : vector<512x32xf32>
    %27 = math.tanh %26 : vector<512x32xf32>
    %c0_13 = arith.constant 0 : index
    %c0_14 = arith.constant 0 : index
    %28 = vector.load %arg7[%c0_13, %c0_14] : memref<32x32xf32, #tpu.memory_space<vmem>>, vector<32x32xf32>
    %c0_15 = arith.constant 0 : index
    %c0_16 = arith.constant 0 : index
    %29 = vector.load %arg8[%c0_15, %c0_16] : memref<1x32xf32, #tpu.memory_space<vmem>>, vector<1x32xf32>
    %cst_17 = arith.constant dense<0.000000e+00> : vector<512x32xf32>
    %30 = tpu.matmul %27, %28, %cst_17 {dimension_numbers = #tpu.dot_dimension_numbers<[1], [0], [0], [1], [0, 0, 1, 1], [], []>} : vector<512x32xf32>, vector<32x32xf32>, vector<512x32xf32> -> vector<512x32xf32>
    %31 = vector.broadcast %29 : vector<1x32xf32> to vector<512x32xf32>
    %32 = arith.addf %30, %31 : vector<512x32xf32>
    %33 = math.tanh %32 : vector<512x32xf32>
    %c0_18 = arith.constant 0 : index
    %c0_19 = arith.constant 0 : index
    %34 = vector.load %arg9[%c0_18, %c0_19] : memref<32x2xf32, #tpu.memory_space<vmem>>, vector<32x2xf32>
    %cst_20 = arith.constant dense<0.000000e+00> : vector<512x2xf32>
    %35 = tpu.matmul %33, %34, %cst_20 {dimension_numbers = #tpu.dot_dimension_numbers<[1], [0], [0], [1], [0, 0, 1, 1], [], []>} : vector<512x32xf32>, vector<32x2xf32>, vector<512x2xf32> -> vector<512x2xf32>
    %c0_21 = arith.constant 0 : index
    %c0_22 = arith.constant 0 : index
    %36 = vector.load %arg10[%c0_21, %c0_22] : memref<1x2xf32, #tpu.memory_space<vmem>>, vector<1x2xf32>
    %37 = vector.broadcast %36 : vector<1x2xf32> to vector<512x2xf32>
    %38 = arith.addf %35, %37 : vector<512x2xf32>
    %39 = arith.truncf %38 : vector<512x2xf32> to vector<512x2xbf16>
    %cst_23 = arith.constant dense<0.000000e+00> : vector<2x48xf32>
    %40 = tpu.matmul %39, %17, %cst_23 {dimension_numbers = #tpu.dot_dimension_numbers<[0], [0], [1], [1], [0, 1, 1, 1], [], []>} : vector<512x2xbf16>, vector<512x48xbf16>, vector<2x48xf32> -> vector<2x48xf32>
    %c0_24 = arith.constant 0 : index
    %c0_25 = arith.constant 0 : index
    %41 = vector.load %arg11[%c0_24, %c0_25] : memref<2x48xf32, #tpu.memory_space<vmem>>, vector<2x48xf32>
    %42 = arith.addf %41, %40 : vector<2x48xf32>
    %c0_26 = arith.constant 0 : index
    %c0_27 = arith.constant 0 : index
    %43 = vector.load %arg11[%c0_26, %c0_27] : memref<2x48xf32, #tpu.memory_space<vmem>>, vector<2x48xf32>
    tpu.vector_store %arg11[%c0_26, %c0_27], %42 {strides = array<i32>} : memref<2x48xf32, #tpu.memory_space<vmem>>, vector<2x48xf32>,
    return
  }
  func.func @transform_0(%arg0: i32) -> (i32, i32) {
    %c0_i32 = arith.constant 0 : i32
    %c0_i32_0 = arith.constant 0 : i32
    return %arg0, %c0_i32 : i32, i32
  }
  func.func @transform_1(%arg0: i32) -> (i32, i32) {
    %c0_i32 = arith.constant 0 : i32
    %c0_i32_0 = arith.constant 0 : i32
    return %arg0, %c0_i32 : i32, i32
  }
  func.func @transform_2(%arg0: i32) -> (i32, i32) {
    %c0_i32 = arith.constant 0 : i32
    %c0_i32_0 = arith.constant 0 : i32
    %c0_i32_1 = arith.constant 0 : i32
    return %c0_i32, %c0_i32_0 : i32, i32
  }
  func.func @transform_3(%arg0: i32) -> (i32, i32) {
    %c0_i32 = arith.constant 0 : i32
    %c0_i32_0 = arith.constant 0 : i32
    %c0_i32_1 = arith.constant 0 : i32
    return %c0_i32, %c0_i32_0 : i32, i32
  }
  func.func @transform_4(%arg0: i32) -> (i32, i32) {
    %c0_i32 = arith.constant 0 : i32
    %c0_i32_0 = arith.constant 0 : i32
    %c0_i32_1 = arith.constant 0 : i32
    return %c0_i32, %c0_i32_0 : i32, i32
  }
  func.func @transform_5(%arg0: i32) -> (i32, i32) {
    %c0_i32 = arith.constant 0 : i32
    %c0_i32_0 = arith.constant 0 : i32
    %c0_i32_1 = arith.constant 0 : i32
    return %c0_i32, %c0_i32_0 : i32, i32
  }
  func.func @transform_6(%arg0: i32) -> (i32, i32) {
    %c0_i32 = arith.constant 0 : i32
    %c0_i32_0 = arith.constant 0 : i32
    %c0_i32_1 = arith.constant 0 : i32
    return %c0_i32, %c0_i32_0 : i32, i32
  }
  func.func @transform_7(%arg0: i32) -> (i32, i32) {
    %c0_i32 = arith.constant 0 : i32
    %c0_i32_0 = arith.constant 0 : i32
    %c0_i32_1 = arith.constant 0 : i32
    return %c0_i32, %c0_i32_0 : i32, i32
  }
  func.func @transform_8(%arg0: i32) -> (i32, i32) {
    %c0_i32 = arith.constant 0 : i32
    %c0_i32_0 = arith.constant 0 : i32
    %c0_i32_1 = arith.constant 0 : i32
    return %c0_i32, %c0_i32_0 : i32, i32
  }
  func.func @transform_9(%arg0: i32) -> (i32, i32) {
    %c0_i32 = arith.constant 0 : i32
    %c0_i32_0 = arith.constant 0 : i32
    %c0_i32_1 = arith.constant 0 : i32
    return %c0_i32, %c0_i32_0 : i32, i32
  }
  func.func @transform_10(%arg0: i32) -> (i32, i32) {
    %c0_i32 = arith.constant 0 : i32
    %c0_i32_0 = arith.constant 0 : i32
    %c0_i32_1 = arith.constant 0 : i32
    return %c0_i32, %c0_i32_0 : i32, i32
  }
}

module attributes {stable_mosaic.version = 11 : i64} {
  func.func @kernel(%arg0: i32, %arg1: memref<48x8xf32, #tpu.memory_space<vmem>>, %arg2: memref<48x1xf32, #tpu.memory_space<vmem>>, %arg3: memref<8x32xf32, #tpu.memory_space<vmem>>, %arg4: memref<1x32xf32, #tpu.memory_space<vmem>>, %arg5: memref<1x32xf32, #tpu.memory_space<vmem>>, %arg6: memref<32x32xf32, #tpu.memory_space<vmem>>, %arg7: memref<1x32xf32, #tpu.memory_space<vmem>>, %arg8: memref<32x4xf32, #tpu.memory_space<vmem>>, %arg9: memref<1x4xf32, #tpu.memory_space<vmem>>, %arg10: memref<48x4xf32, #tpu.memory_space<vmem>>) attributes {dimension_semantics = [#tpu.dimension_semantics<parallel>], iteration_bounds = array<i64: 1>, scalar_prefetch = 0 : i64, scratch_operands = 0 : i64, tpu.core_type = #tpu.core_type<tc>, window_params = [{transform_indices = @transform_0, window_bounds = array<i64: 48, 8>}, {transform_indices = @transform_1, window_bounds = array<i64: 48, 1>}, {pipeline_mode = #tpu.pipeline_mode<synchronous>, transform_indices = @transform_2, window_bounds = array<i64: 8, 32>}, {pipeline_mode = #tpu.pipeline_mode<synchronous>, transform_indices = @transform_3, window_bounds = array<i64: 1, 32>}, {pipeline_mode = #tpu.pipeline_mode<synchronous>, transform_indices = @transform_4, window_bounds = array<i64: 1, 32>}, {pipeline_mode = #tpu.pipeline_mode<synchronous>, transform_indices = @transform_5, window_bounds = array<i64: 32, 32>}, {pipeline_mode = #tpu.pipeline_mode<synchronous>, transform_indices = @transform_6, window_bounds = array<i64: 1, 32>}, {pipeline_mode = #tpu.pipeline_mode<synchronous>, transform_indices = @transform_7, window_bounds = array<i64: 32, 4>}, {pipeline_mode = #tpu.pipeline_mode<synchronous>, transform_indices = @transform_8, window_bounds = array<i64: 1, 4>}, {transform_indices = @transform_9, window_bounds = array<i64: 48, 4>}]} {
    %c0 = arith.constant 0 : index
    %c0_0 = arith.constant 0 : index
    %0 = vector.load %arg1[%c0, %c0_0] : memref<48x8xf32, #tpu.memory_space<vmem>>, vector<48x8xf32>
    %c0_1 = arith.constant 0 : index
    %c0_2 = arith.constant 0 : index
    %1 = vector.load %arg2[%c0_1, %c0_2] : memref<48x1xf32, #tpu.memory_space<vmem>>, vector<48x1xf32>
    %c0_3 = arith.constant 0 : index
    %c0_4 = arith.constant 0 : index
    %2 = vector.load %arg3[%c0_3, %c0_4] : memref<8x32xf32, #tpu.memory_space<vmem>>, vector<8x32xf32>
    %cst = arith.constant dense<0.000000e+00> : vector<48x32xf32>
    %3 = tpu.matmul %0, %2, %cst {dimension_numbers = #tpu.dot_dimension_numbers<[1], [0], [0], [1], [0, 0, 1, 1], [], []>} : vector<48x8xf32>, vector<8x32xf32>, vector<48x32xf32> -> vector<48x32xf32>
    %c0_5 = arith.constant 0 : index
    %c0_6 = arith.constant 0 : index
    %4 = vector.load %arg4[%c0_5, %c0_6] : memref<1x32xf32, #tpu.memory_space<vmem>>, vector<1x32xf32>
    %5 = vector.broadcast %1 : vector<48x1xf32> to vector<48x32xf32>
    %6 = vector.broadcast %4 : vector<1x32xf32> to vector<48x32xf32>
    %7 = arith.mulf %5, %6 : vector<48x32xf32>
    %8 = arith.addf %3, %7 : vector<48x32xf32>
    %c0_7 = arith.constant 0 : index
    %c0_8 = arith.constant 0 : index
    %9 = vector.load %arg5[%c0_7, %c0_8] : memref<1x32xf32, #tpu.memory_space<vmem>>, vector<1x32xf32>
    %10 = vector.broadcast %9 : vector<1x32xf32> to vector<48x32xf32>
    %11 = arith.addf %8, %10 : vector<48x32xf32>
    %12 = math.tanh %11 : vector<48x32xf32>
    %c0_9 = arith.constant 0 : index
    %c0_10 = arith.constant 0 : index
    %13 = vector.load %arg6[%c0_9, %c0_10] : memref<32x32xf32, #tpu.memory_space<vmem>>, vector<32x32xf32>
    %c0_11 = arith.constant 0 : index
    %c0_12 = arith.constant 0 : index
    %14 = vector.load %arg7[%c0_11, %c0_12] : memref<1x32xf32, #tpu.memory_space<vmem>>, vector<1x32xf32>
    %cst_13 = arith.constant dense<0.000000e+00> : vector<48x32xf32>
    %15 = tpu.matmul %12, %13, %cst_13 {dimension_numbers = #tpu.dot_dimension_numbers<[1], [0], [0], [1], [0, 0, 1, 1], [], []>} : vector<48x32xf32>, vector<32x32xf32>, vector<48x32xf32> -> vector<48x32xf32>
    %16 = vector.broadcast %14 : vector<1x32xf32> to vector<48x32xf32>
    %17 = arith.addf %15, %16 : vector<48x32xf32>
    %18 = math.tanh %17 : vector<48x32xf32>
    %c0_14 = arith.constant 0 : index
    %c0_15 = arith.constant 0 : index
    %19 = vector.load %arg8[%c0_14, %c0_15] : memref<32x4xf32, #tpu.memory_space<vmem>>, vector<32x4xf32>
    %cst_16 = arith.constant dense<0.000000e+00> : vector<48x4xf32>
    %20 = tpu.matmul %18, %19, %cst_16 {dimension_numbers = #tpu.dot_dimension_numbers<[1], [0], [0], [1], [0, 0, 1, 1], [], []>} : vector<48x32xf32>, vector<32x4xf32>, vector<48x4xf32> -> vector<48x4xf32>
    %c0_17 = arith.constant 0 : index
    %c0_18 = arith.constant 0 : index
    %21 = vector.load %arg9[%c0_17, %c0_18] : memref<1x4xf32, #tpu.memory_space<vmem>>, vector<1x4xf32>
    %22 = vector.broadcast %21 : vector<1x4xf32> to vector<48x4xf32>
    %23 = arith.addf %20, %22 : vector<48x4xf32>
    %24 = vector.extract_strided_slice %0 {offsets = [0, 4], sizes = [48, 4], strides = [1, 1]} : vector<48x8xf32> to vector<48x4xf32>
    %25 = arith.addf %24, %23 : vector<48x4xf32>
    %c0_19 = arith.constant 0 : index
    %c0_20 = arith.constant 0 : index
    %26 = vector.load %arg10[%c0_19, %c0_20] : memref<48x4xf32, #tpu.memory_space<vmem>>, vector<48x4xf32>
    tpu.vector_store %arg10[%c0_19, %c0_20], %25 {strides = array<i32>} : memref<48x4xf32, #tpu.memory_space<vmem>>, vector<48x4xf32>,
    return
  }
  func.func @transform_0(%arg0: i32) -> (i32, i32) {
    %c0_i32 = arith.constant 0 : i32
    %c0_i32_0 = arith.constant 0 : i32
    return %arg0, %c0_i32 : i32, i32
  }
  func.func @transform_1(%arg0: i32) -> (i32, i32) {
    %c0_i32 = arith.constant 0 : i32
    %c0_i32_0 = arith.constant 0 : i32
    return %arg0, %c0_i32 : i32, i32
  }
  func.func @transform_2(%arg0: i32) -> (i32, i32) {
    %c0_i32 = arith.constant 0 : i32
    %c0_i32_0 = arith.constant 0 : i32
    %c0_i32_1 = arith.constant 0 : i32
    return %c0_i32, %c0_i32_0 : i32, i32
  }
  func.func @transform_3(%arg0: i32) -> (i32, i32) {
    %c0_i32 = arith.constant 0 : i32
    %c0_i32_0 = arith.constant 0 : i32
    %c0_i32_1 = arith.constant 0 : i32
    return %c0_i32, %c0_i32_0 : i32, i32
  }
  func.func @transform_4(%arg0: i32) -> (i32, i32) {
    %c0_i32 = arith.constant 0 : i32
    %c0_i32_0 = arith.constant 0 : i32
    %c0_i32_1 = arith.constant 0 : i32
    return %c0_i32, %c0_i32_0 : i32, i32
  }
  func.func @transform_5(%arg0: i32) -> (i32, i32) {
    %c0_i32 = arith.constant 0 : i32
    %c0_i32_0 = arith.constant 0 : i32
    %c0_i32_1 = arith.constant 0 : i32
    return %c0_i32, %c0_i32_0 : i32, i32
  }
  func.func @transform_6(%arg0: i32) -> (i32, i32) {
    %c0_i32 = arith.constant 0 : i32
    %c0_i32_0 = arith.constant 0 : i32
    %c0_i32_1 = arith.constant 0 : i32
    return %c0_i32, %c0_i32_0 : i32, i32
  }
  func.func @transform_7(%arg0: i32) -> (i32, i32) {
    %c0_i32 = arith.constant 0 : i32
    %c0_i32_0 = arith.constant 0 : i32
    %c0_i32_1 = arith.constant 0 : i32
    return %c0_i32, %c0_i32_0 : i32, i32
  }
  func.func @transform_8(%arg0: i32) -> (i32, i32) {
    %c0_i32 = arith.constant 0 : i32
    %c0_i32_0 = arith.constant 0 : i32
    %c0_i32_1 = arith.constant 0 : i32
    return %c0_i32, %c0_i32_0 : i32, i32
  }
  func.func @transform_9(%arg0: i32) -> (i32, i32) {
    %c0_i32 = arith.constant 0 : i32
    %c0_i32_0 = arith.constant 0 : i32
    return %arg0, %c0_i32 : i32, i32
  }
}

</mosaic_0001>

<bundles_post_ra>
// kernel: neg.1
= control target key start
LH: loop header
LB: loop body
LE: loop exit
PB: predicated region body
PF: predicated region fallthrough
CT: control target
= control target key end

     0   :  { %s24_s0 = inlined_call_operand.vmem [shape: f32[2,32], index: 0, kind: input, shape index: {}]   ;;  %s25_s1 = inlined_call_operand.vmem [shape: f32[2,32], index: 1, kind: output, shape index: {}]  }
   0x1   :  { %v2_v0 = vld [vmem:[%s24_s0] sm:$0x3] }
   0x2   :  { %v5_v1 = vxor.u32 2147483648, %v2_v0 }
   0x4   :  { %7 = vst [vmem:[%s25_s1] sm:$0x3] %v5_v1 }

// kernel: graphpde_forward.3
= control target key start
LH: loop header
LB: loop body
LE: loop exit
PB: predicated region body
PF: predicated region fallthrough
CT: control target
= control target key end

     0   :  { %vm88_vm0 = vcmask 64512   ;;  %v682_v3 = vmov 0   ;;  %vm232_vm1 = vcmask 261120   ;;  %s683_s29 = smov 4   ;;  %vm530_vm2 = vcmask 31744   ;;  %s870_s2 = inlined_call_operand.vmem [shape: f32[8,32], index: 2, kind: input, shape index: {}]   ;;  %s871_s0 = inlined_call_operand.vmem [shape: f32[48,8], index: 0, kind: input, shape index: {}]   ;;  %s872_s1 = inlined_call_operand.vmem [shape: f32[48,1], index: 1, kind: input, shape index: {}]   ;;  %s873_s5 = inlined_call_operand.vmem [shape: f32[32,32], index: 5, kind: input, shape index: {}]   ;;  %s874_s3 = inlined_call_operand.vmem [shape: f32[1,32], index: 3, kind: input, shape index: {}]   ;;  %s875_s4 = inlined_call_operand.vmem [shape: f32[1,32], index: 4, kind: input, shape index: {}]   ;;  %s876_s7 = inlined_call_operand.vmem [shape: f32[32,4], index: 7, kind: input, shape index: {}]   ;;  %s877_s6 = inlined_call_operand.vmem [shape: f32[1,32], index: 6, kind: input, shape index: {}]   ;;  %s878_s8 = inlined_call_operand.vmem [shape: f32[1,4], index: 8, kind: input, shape index: {}]   ;;  %s879_s9 = inlined_call_operand.vmem [shape: f32[48,4], index: 9, kind: output, shape index: {}]  }
   0x1   :  { %v44_v0 = vld [vmem:[%s870_s2] sm:$0xff]  ;;  %656 = vset.pattern.permute.xlu0 %v682_v3  ;;  %657 = vset.pattern.permute.xlu1 %v682_v3  ;;  %v751_v4 = vld [vmem:[%s871_s0 + $0x8] sm:$0xff]  ;;  %v761_v6 = vld [vmem:[%s871_s0 + $0x10] sm:$0xff] }
   0x2   :  { %v741_v1 = vld [vmem:[%s871_s0] sm:$0xff]  ;;  %590 = vmatprep.subr.mxu0 %v44_v0  ;;  %651 = vmatprep.subr.mxu1 %v44_v0  ;;  %v756_v5 = vld [vmem:[%s871_s0 + $0x28] sm:$0xff]  ;;  %v40_v8 = vld [vmem:[%s872_s1 + $0x10] sm:$0xff] }
   0x3   :  { %v746_v2 = vld [vmem:[%s871_s0 + $0x20] sm:$0xff]  ;;  %591 = vmatpush3.msra.mxu0 %v44_v0  ;;  %652 = vmatpush3.msra.mxu1 %v44_v0  ;;  %v782_v9 = vld [vmem:[%s871_s0 + $0x18] sm:$0xff]  ;;  %v39_v10 = vld [vmem:[%s872_s1 + $0x8] sm:$0xff] }
   0x4   :  { %v38_v7 = vld [vmem:[%s872_s1] sm:$0xff]  ;;  %592 = vmatprep.mubr.msk.f32.mxu0 %vm88_vm0, %v741_v1  ;;  %598 = vmatprep.mubr.msk.f32.mxu1 %vm88_vm0, %v746_v2  ;;  %v41_v11 = vld [vmem:[%s872_s1 + $0x18] sm:$0xff]  ;;  %v43_v13 = vld [vmem:[%s872_s1 + $0x28] sm:$0xff] }
   0x5   :  { %593 = vmatmul.mubr.msk.f32.vlgmr.msra.gmra.mrb[0].mxu0 %vm88_vm0, %v751_v4  ;;  %599 = vmatmul.mubr.msk.f32.vlgmr.msra.gmra.mrb[0].mxu1 %vm88_vm0, %v756_v5  ;;  %v42_v12 = vld [vmem:[%s872_s1 + $0x20] sm:$0xff]  ;;  %v222_v15 = vld [vmem:[%s873_s5 + $0x8] sm:$0xff]  ;;  %v223_v17 = vld [vmem:[%s873_s5 + $0x10] sm:$0xff] }
   0x6   :  { %595 = vmatprep.mubr.msk.f32.mxu0 %vm88_vm0, %v761_v6  ;;  %48 = vperm.xlu0 %656, %v38_v7   ;;  %v221_v14 = vld [vmem:[%s873_s5] sm:$0xff]  ;;  %v224_v18 = vld [vmem:[%s873_s5 + $0x18] sm:$0xff]  ;;  %v353_v59 = vld [vmem:[%s876_s7 + $0x8] sm:$0xff] }
   0x7   :  { %58 = vperm.xlu1 %657, %v40_v8   ;;  %v635_v16 = vpack.c.bf16 %v222_v15, %v221_v14  ;;  %v639_v19 = vpack.c.bf16 %v224_v18, %v223_v17  ;;  %v541_v24 = vld [vmem:[%s874_s3] ss:$0 sm:$0xff]  ;;  %v354_v61 = vld [vmem:[%s876_s7 + $0x10] sm:$0xff]  ;;  %v355_v62 = vld [vmem:[%s876_s7 + $0x18] sm:$0xff] }
   0x8   :  { %v548_v32 = vld [vmem:[%s875_s4] ss:$0 sm:$0xff]  ;;  %v647_v63 = vpack.c.bf16 %v355_v62, %v354_v61 }
   0x9   :  { %596 = vmatmul.mubr.msk.f32.gmra.mrb[2].mxu0 %vm88_vm0, %v782_v9  ;;  %636 = vmatprep.subr.bf16.mxu1 %v635_v16  ;;  %v352_v58 = vld [vmem:[%s876_s7] sm:$0xff] }
   0xa   :  { %53 = vperm.xlu0 %656, %v39_v10   ;;  %638 = vmatpush3.bf16.msra.mxu1 %v635_v16  ;;  %v643_v60 = vpack.c.bf16 %v353_v59, %v352_v58  ;;  %v549_v0 = vld [vmem:[%s877_s6] ss:$0 sm:$0xff] }
   0xb   :  { %63 = vperm.xlu1 %657, %v41_v11   ;;  %640 = vmatprep.subr.bf16.mxu1 %v639_v19 }
   0xc   :  { %644 = vmatprep.subr.bf16.mxu0 %v643_v60 }
   0xd   :  { %646 = vmatpush3.bf16.msra.mxu0 %v643_v60 }
   0xe   :  { %68 = vperm.xlu0 %656, %v42_v12   ;;  %642 = vmatpush3.bf16.msra.mxu1 %v639_v19 }
   0xf   :  { %73 = vperm.xlu1 %657, %v43_v13   ;;  %648 = vmatprep.subr.bf16.mxu0 %v647_v63 }
  0x11   :  { %650 = vmatpush3.bf16.msra.mxu0 %v647_v63 }
  0x85   :  { %v49_v20 = vpop.permute.xlu0 %48 }
  0x86   :  { %v59_v21 = vpop.permute.xlu1 %58  ;;  %v82_v28 = vmul.f32 %v541_v24, %v49_v20 }
  0x87   :  { %v84_v38 = vmul.f32 %v541_v24, %v59_v21 }
  0x89   :  { %v54_v22 = vpop.permute.xlu0 %53 }
  0x8a   :  { %v64_v23 = vpop.permute.xlu1 %63  ;;  %v83_v25 = vmul.f32 %v541_v24, %v54_v22 }
  0x8b   :  { %v85_v36 = vmul.f32 %v541_v24, %v64_v23 }
  0x8d   :  { %v69_v26 = vpop.permute.xlu0 %68 }
  0x8e   :  { %v74_v27 = vpop.permute.xlu1 %73  ;;  %v86_v37 = vmul.f32 %v541_v24, %v69_v26 }
  0x8f   :  { %v87_v39 = vmul.f32 %v541_v24, %v74_v27 }
  0xd8   :  { %v594_v29 = vpop.f32.mrb[0].mxu0  ;;  %v600_v30 = vpop.f32.mrb[0].mxu1 }
  0xd9   :  { %v179_v31 = vadd.f32 %v594_v29, %v83_v25  ;;  %v173_v33 = vpop.f32.mrb[1].mxu0  ;;  %v193_v34 = vpop.f32.mrb[1].mxu1  ;;  %v199_v47 = vadd.f32 %v600_v30, %v87_v39  ;;  %v556_v25 = vld [vmem:[%s878_s8] ss:$0 sm:$0xff]  ;;  %s684_s8 = smov 124  }
  0xda   :  { %v174_v35 = vadd.f32 %v173_v33, %v82_v28  ;;  %v194_v43 = vadd.f32 %v193_v34, %v86_v37 }
  0xdb   :  { %v210_v40 = vadd.f32 %v548_v32, %v179_v31  ;;  %v214_v51 = vadd.f32 %v548_v32, %v199_v47 }
  0xdc   :  { %v209_v41 = vadd.f32 %v548_v32, %v174_v35  ;;  %v597_v42 = vpop.f32.mrb[2].mxu0  ;;  %v213_v50 = vadd.f32 %v548_v32, %v194_v43 }
  0xdd   :  { %v189_v44 = vadd.f32 %v597_v42, %v85_v36  ;;  %v183_v45 = vpop.f32.mrb[3].mxu0 }
  0xde   :  { %v184_v46 = vadd.f32 %v183_v45, %v84_v38  ;;  %658 = vtanh.f32 %v209_v41 }
  0xdf   :  { %660 = vtanh.f32 %v210_v40  ;;  %v212_v48 = vadd.f32 %v548_v32, %v189_v44 }
  0xe0   :  { %v211_v49 = vadd.f32 %v548_v32, %v184_v46 }
  0xe2   :  { %662 = vtanh.f32 %v211_v49 }
  0xe3   :  { %664 = vtanh.f32 %v212_v48 }
  0xe4   :  { %666 = vtanh.f32 %v213_v50 }
  0xe5   :  { %668 = vtanh.f32 %v214_v51 }
  0xe8   :  { %v659_v52 = vpop.eup %658 }
  0xe9   :  { %v661_v53 = vpop.eup %660  ;;  %609 = vmatprep.mubr.msk.f32.mxu1 %vm232_vm1, %v659_v52 }
  0xea   :  { %610 = vmatmul.mubr.msk.f32.vlgmr.msra.gmra.mrb[2].mxu1 %vm232_vm1, %v661_v53 }
  0xec   :  { %v663_v54 = vpop.eup %662 }
  0xed   :  { %612 = vmatprep.mubr.msk.f32.mxu1 %vm232_vm1, %v663_v54  ;;  %v665_v55 = vpop.eup %664 }
  0xee   :  { %v667_v56 = vpop.eup %666  ;;  %613 = vmatmul.mubr.msk.f32.gmra.mrb[4].mxu1 %vm232_vm1, %v665_v55 }
  0xef   :  { %615 = vmatprep.mubr.msk.f32.mxu1 %vm232_vm1, %v667_v56  ;;  %v669_v57 = vpop.eup %668 }
  0xf2   :  { %616 = vmatmul.mubr.msk.f32.gmra.mrb[6].mxu1 %vm232_vm1, %v669_v57 }
 0x1bd   :  { %v611_v3 = vpop.f32.mrb[2].mxu1 }
 0x1be   :  { %v323_v7 = vadd.f32 %v611_v3, %v549_v0  ;;  %v317_v8 = vpop.f32.mrb[3].mxu1 }
 0x1bf   :  { %v318_v10 = vadd.f32 %v549_v0, %v317_v8 }
 0x1c1   :  { %670 = vtanh.f32 %v318_v10  ;;  %v614_v11 = vpop.f32.mrb[4].mxu1 }
 0x1c2   :  { %672 = vtanh.f32 %v323_v7  ;;  %v333_v12 = vadd.f32 %v614_v11, %v549_v0  ;;  %v327_v13 = vpop.f32.mrb[5].mxu1 }
 0x1c3   :  { %v328_v14 = vadd.f32 %v549_v0, %v327_v13 }
 0x1c5   :  { %674 = vtanh.f32 %v328_v14  ;;  %v617_v15 = vpop.f32.mrb[6].mxu1 }
 0x1c6   :  { %676 = vtanh.f32 %v333_v12  ;;  %v343_v16 = vadd.f32 %v617_v15, %v549_v0  ;;  %v337_v17 = vpop.f32.mrb[7].mxu1 }
 0x1c7   :  { %v338_v18 = vadd.f32 %v549_v0, %v337_v17 }
 0x1c9   :  { %678 = vtanh.f32 %v338_v18 }
 0x1ca   :  { %680 = vtanh.f32 %v343_v16 }
 0x1cb   :  { %v671_v19 = vpop.eup %670 }
 0x1cc   :  { %v673_v20 = vpop.eup %672  ;;  %626 = vmatprep.mubr.msk.f32.mxu0 %vm232_vm1, %v671_v19 }
 0x1cd   :  { %627 = vmatmul.mubr.msk.f32.vlgmr.msra.gmra.mrb[4].mxu0 %vm232_vm1, %v673_v20 }
 0x1cf   :  { %v675_v21 = vpop.eup %674 }
 0x1d0   :  { %v677_v22 = vpop.eup %676  ;;  %629 = vmatprep.mubr.msk.f32.mxu0 %vm232_vm1, %v675_v21 }
 0x1d1   :  { %630 = vmatmul.mubr.msk.f32.gmra.mrb[6].mxu0 %vm232_vm1, %v677_v22 }
 0x1d3   :  { %v679_v23 = vpop.eup %678 }
 0x1d4   :  { %v681_v24 = vpop.eup %680  ;;  %632 = vmatprep.mubr.msk.f32.mxu0 %vm232_vm1, %v679_v23 }
 0x1d5   :  { %633 = vmatmul.mubr.msk.f32.gmra.mrb[8].mxu0 %vm232_vm1, %v681_v24 }
 0x2a0   :  { %v628_v26 = vpop.f32.mrb[4].mxu0 }
 0x2a1   :  { %v453_v27 = vadd.f32 %v628_v26, %v556_v25  ;;  %v447_v28 = vpop.f32.mrb[5].mxu0 }
 0x2a2   :  { %v448_v29 = vadd.f32 %v556_v25, %v447_v28 }
 0x2a3   :  { %484 = vrot.lane.b32.xlu1 %v453_v27, %s683_s29 }
 0x2a4   :  { %v631_v30 = vpop.f32.mrb[6].mxu0  ;;  %482 = vrot.lane.b32.xlu0 %v448_v29, %s683_s29 }
 0x2a5   :  { %v463_v31 = vadd.f32 %v631_v30, %v556_v25  ;;  %v457_v32 = vpop.f32.mrb[7].mxu0 }
 0x2a6   :  { %v458_v33 = vadd.f32 %v556_v25, %v457_v32 }
 0x2a7   :  { %488 = vrot.lane.b32.xlu1 %v463_v31, %s683_s29 }
 0x2a8   :  { %v634_v34 = vpop.f32.mrb[8].mxu0  ;;  %486 = vrot.lane.b32.xlu0 %v458_v33, %s683_s29 }
 0x2a9   :  { %v473_v35 = vadd.f32 %v634_v34, %v556_v25  ;;  %v467_v36 = vpop.f32.mrb[9].mxu0 }
 0x2aa   :  { %v468_v37 = vadd.f32 %v556_v25, %v467_v36 }
 0x2ab   :  { %492 = vrot.lane.b32.xlu1 %v473_v35, %s683_s29 }
 0x2ac   :  { %490 = vrot.lane.b32.xlu0 %v468_v37, %s683_s29 }
 0x315   :  { %v485_v38 = vpop.permute.xlu1 %484 }
 0x316   :  { %v501_v39 = vadd.f32 %v485_v38, %v751_v4  ;;  %v483_v40 = vpop.permute.xlu0 %482 }
 0x317   :  { %v500_v41 = vadd.f32 %v483_v40, %v741_v1 }
 0x318   :  { %514 = vrot.lane.b32.xlu1 %v501_v39, %s684_s8 }
 0x319   :  { %v489_v42 = vpop.permute.xlu1 %488  ;;  %512 = vrot.lane.b32.xlu0 %v500_v41, %s684_s8 }
 0x31a   :  { %v503_v43 = vadd.f32 %v489_v42, %v782_v9  ;;  %v487_v44 = vpop.permute.xlu0 %486 }
 0x31b   :  { %v502_v45 = vadd.f32 %v487_v44, %v761_v6 }
 0x31c   :  { %518 = vrot.lane.b32.xlu1 %v503_v43, %s684_s8 }
 0x31d   :  { %v493_v46 = vpop.permute.xlu1 %492  ;;  %516 = vrot.lane.b32.xlu0 %v502_v45, %s684_s8 }
 0x31e   :  { %v505_v47 = vadd.f32 %v493_v46, %v756_v5  ;;  %v491_v48 = vpop.permute.xlu0 %490 }
 0x31f   :  { %v504_v4 = vadd.f32 %v491_v48, %v746_v2 }
 0x320   :  { %522 = vrot.lane.b32.xlu1 %v505_v47, %s684_s8 }
 0x321   :  { %520 = vrot.lane.b32.xlu0 %v504_v4, %s684_s8 }
 0x38a   :  { %v515_v1 = vpop.permute.xlu1 %514 }
 0x38b   :  { %532 = vst.msk [vmem:[%s879_s9 + $0x8] sm:$0xff] %vm530_vm2, %v515_v1  ;;  %v513_v9 = vpop.permute.xlu0 %512 }
 0x38c   :  { %531 = vst.msk [vmem:[%s879_s9] sm:$0xff] %vm530_vm2, %v513_v9 }
 0x38e   :  { %v519_v6 = vpop.permute.xlu1 %518 }
 0x38f   :  { %534 = vst.msk [vmem:[%s879_s9 + $0x18] sm:$0xff] %vm530_vm2, %v519_v6  ;;  %v517_v5 = vpop.permute.xlu0 %516 }
 0x390   :  { %533 = vst.msk [vmem:[%s879_s9 + $0x10] sm:$0xff] %vm530_vm2, %v517_v5 }
 0x392   :  { %v523_v2 = vpop.permute.xlu1 %522 }
 0x393   :  { %536 = vst.msk [vmem:[%s879_s9 + $0x28] sm:$0xff] %vm530_vm2, %v523_v2  ;;  %v521_v49 = vpop.permute.xlu0 %520 }
 0x394   :  { %535 = vst.msk [vmem:[%s879_s9 + $0x20] sm:$0xff] %vm530_vm2, %v521_v49 }

// kernel: graphpde_forward.2
= control target key start
LH: loop header
LB: loop body
LE: loop exit
PB: predicated region body
PF: predicated region fallthrough
CT: control target
= control target key end

     0   :  { %s5437_s13 = smov 0   ;;  %s6758_s0 = inlined_call_operand.vmem [shape: s32[1024,1], index: 0, kind: input, shape index: {}]   ;;  %s6759_s1 = inlined_call_operand.vmem [shape: s32[1024,1], index: 1, kind: input, shape index: {}]   ;;  %s6760_s2 = inlined_call_operand.vmem [shape: f32[48,10], index: 2, kind: input, shape index: {}]   ;;  %s6761_s3 = inlined_call_operand.vmem [shape: f32[10,32], index: 3, kind: input, shape index: {}]   ;;  %s6762_s4 = inlined_call_operand.vmem [shape: f32[10,32], index: 4, kind: input, shape index: {}]   ;;  %s6763_s5 = inlined_call_operand.vmem [shape: f32[1,32], index: 5, kind: input, shape index: {}]   ;;  %s6764_s6 = inlined_call_operand.vmem [shape: f32[32,32], index: 6, kind: input, shape index: {}]   ;;  %s6765_s7 = inlined_call_operand.vmem [shape: f32[1,32], index: 7, kind: input, shape index: {}]   ;;  %s6766_s8 = inlined_call_operand.vmem [shape: f32[32,2], index: 8, kind: input, shape index: {}]   ;;  %s6767_s9 = inlined_call_operand.vmem [shape: f32[1,2], index: 9, kind: input, shape index: {}]   ;;  %s6768_s10 = inlined_call_operand.vmem [shape: f32[2,48], index: 10, kind: output, shape index: {}]  }
   0x1 LB: > { %s3953_s14 = sadd.s32 4294967295, %s5375_s13   ;;  %p3956_p0 = scmp.ge.s32.totalorder %s5375_s13, 1  ;;  %s5375_s13 = sphi %s5437_s13, %s20_s13  }
   0x2   : > { %p319_p1 = scmp.lt.s32.totalorder %s5375_s13, 3 }
   0x4   : > { %p320_p2 = pnand %p3956_p0, %p319_p1 }
   0x5   : > { %s3957_s15 = sshll.u32 (!%p320_p2), %s3953_s14, 6  ;;  %p5455_p4 = scmp.ne.s32.totalorder (!%p320_p2), %s3953_s14, 0 }
   0x6   : > { %323 = sbr.rel (%p320_p2) target bundleno = 1644 (0x66c), region = 60  ;;  %p358_p3 = scmp.lt.s32.totalorder (!%p320_p2), %s3957_s15, 127 }
   0xd   : > { %s6865_s15 = smov (!%p358_p3, %s3957_s15), 127  ;;  %373 = sbr.rel (%p5455_p4) target bundleno = 246 (0xf6), region = 64 }
   0xe   : > { %s3958_s16 = sshll.u32 %s6865_s15, 3  ;;  %v380_v0 = vld [vmem:[%s6761_s3] sm:$0xff] (!%p5455_p4)  ;;  %v381_v1 = vld [vmem:[%s6761_s3 + $0x8] sm:$0x3] (!%p5455_p4)  ;;  %vm401_vm0 = vcmask (!%p5455_p4), 1041408   ;;  %vm5377_vm1 = vmmov (!%p5455_p4), 1  }
   0xf   : > { %s5448_s19 = scalar_lea.vmem %s6758_s0, %s3958_s16  ;;  %s5453_s22 = scalar_lea.vmem %s6759_s1, %s3958_s16  ;;  %v507_v2 = vld [vmem:[%s6762_s4] sm:$0xff] (!%p5455_p4)  ;;  %v5006_v3 = vpack.c.bf16 (!%p5455_p4), %v381_v1, %v380_v0  ;;  %vm5007_vm2 = vmpackc.low (!%p5455_p4), %vm401_vm0, %vm5377_vm1  ;;  %v508_v4 = vld [vmem:[%s6762_s4 + $0x8] sm:$0x3] (!%p5455_p4)  ;;  %vm382_vm3 = vcmask (!%p5455_p4), 80896   ;;  %vm503_vm4 = vcmask (!%p5455_p4), 261120  }
  0x10   : > { %v374_v5 = vld [vmem:[%s6760_s2] sm:$0xff] (!%p5455_p4)  ;;  %v5012_v6 = vpack.c.bf16 (!%p5455_p4), %v508_v4, %v507_v2  ;;  %v375_v7 = vld [vmem:[%s6760_s2 + $0x8] sm:$0xff] (!%p5455_p4)  ;;  %v376_v8 = vld [vmem:[%s6760_s2 + $0x10] sm:$0xff] (!%p5455_p4) }
  0x11   : > { %4636 = vmatprep.mubr.msk.f32.mxu0 (!%p5455_p4), %vm382_vm3, %v374_v5  ;;  %4649 = vmatprep.mubr.msk.f32.mxu1 (!%p5455_p4), %vm382_vm3, %v374_v5  ;;  %v377_v9 = vld [vmem:[%s6760_s2 + $0x18] sm:$0xff] (!%p5455_p4)  ;;  %v378_v10 = vld [vmem:[%s6760_s2 + $0x20] sm:$0xff] (!%p5455_p4)  ;;  %v379_v11 = vld [vmem:[%s6760_s2 + $0x28] sm:$0xff] (!%p5455_p4) }
  0x12   : > { %5008 = vmatprep.subr.msk.bf16.mxu0 (!%p5455_p4), %vm5007_vm2, %v5006_v3  ;;  %5014 = vmatprep.subr.msk.bf16.mxu1 (!%p5455_p4), %vm5007_vm2, %v5012_v6 }
  0x13   : > { %5011 = vmatpush3.bf16.msk.msra.mxu0 (!%p5455_p4), %vm5007_vm2, %v5006_v3  ;;  %5017 = vmatpush3.bf16.msk.msra.mxu1 (!%p5455_p4), %vm5007_vm2, %v5012_v6 }
  0x16   : > { %4637 = vmatmul.mubr.msk.f32.vlgmr.msra.gmra.mrb[0].mxu0 %vm382_vm3, %v375_v7  ;;  %4650 = vmatmul.mubr.msk.f32.vlgmr.msra.gmra.mrb[0].mxu1 %vm382_vm3, %v375_v7 }
  0x17   : > { %4639 = vmatprep.mubr.msk.f32.mxu0 %vm382_vm3, %v376_v8  ;;  %4652 = vmatprep.mubr.msk.f32.mxu1 %vm382_vm3, %v376_v8 }
  0x1a   : > { %4640 = vmatmul.mubr.msk.f32.gmra.mrb[2].mxu0 %vm382_vm3, %v377_v9  ;;  %4653 = vmatmul.mubr.msk.f32.gmra.mrb[2].mxu1 %vm382_vm3, %v377_v9 }
  0x1b   : > { %4642 = vmatprep.mubr.msk.f32.mxu0 %vm382_vm3, %v378_v10  ;;  %4655 = vmatprep.mubr.msk.f32.mxu1 %vm382_vm3, %v378_v10 }
  0x1e   : > { %4643 = vmatmul.mubr.msk.f32.gmra.mrb[4].mxu0 %vm382_vm3, %v379_v11  ;;  %4656 = vmatmul.mubr.msk.f32.gmra.mrb[4].mxu1 %vm382_vm3, %v379_v11 }
  0xe9   : > { %v4638_v12 = vpop.f32.mrb[0].mxu0  ;;  %v4651_v13 = vpop.f32.mrb[0].mxu1 }
  0xea   : > { %v471_v14 = vpop.f32.mrb[1].mxu0  ;;  %v578_v16 = vpop.f32.mrb[1].mxu1 }
  0xeb   : > { %v500_v15 = vpack.c.bf16 %v4638_v12, %v471_v14  ;;  %v607_v17 = vpack.c.bf16 %v4651_v13, %v578_v16 }
  0xed   : > { %504 = vst.msk [vmem:[#allocation2] sm:$0xff] %vm503_vm4, %v500_v15  ;;  %v4641_v18 = vpop.f32.mrb[2].mxu0  ;;  %610 = vst.msk [vmem:[#allocation3] sm:$0xff] %vm503_vm4, %v607_v17  ;;  %v4654_v19 = vpop.f32.mrb[2].mxu1 }
  0xee   : > { %v481_v20 = vpop.f32.mrb[3].mxu0  ;;  %v588_v22 = vpop.f32.mrb[3].mxu1 }
  0xef   : > { %v501_v21 = vpack.c.bf16 %v4641_v18, %v481_v20  ;;  %v608_v23 = vpack.c.bf16 %v4654_v19, %v588_v22 }
  0xf1   : > { %505 = vst.msk [vmem:[#allocation2 + $0x8] sm:$0xff] %vm503_vm4, %v501_v21  ;;  %v4644_v24 = vpop.f32.mrb[4].mxu0  ;;  %611 = vst.msk [vmem:[#allocation3 + $0x8] sm:$0xff] %vm503_vm4, %v608_v23  ;;  %v4657_v25 = vpop.f32.mrb[4].mxu1 }
  0xf2   : > { %v491_v26 = vpop.f32.mrb[5].mxu0  ;;  %v598_v28 = vpop.f32.mrb[5].mxu1 }
  0xf3   : > { %v502_v27 = vpack.c.bf16 %v4644_v24, %v491_v26  ;;  %v609_v29 = vpack.c.bf16 %v4657_v25, %v598_v28 }
  0xf5   : > { %506 = vst.msk [vmem:[#allocation2 + $0x10] sm:$0xff] %vm503_vm4, %v502_v27  ;;  %612 = vst.msk [vmem:[#allocation3 + $0x10] sm:$0xff] %vm503_vm4, %v609_v29 }
  0xf6 PF: > { %v5509_v30 = vld [vmem:[#allocation2] sm:$0xff]  ;;  %v616_v33 = vld [vmem:[#allocation3] sm:$0xff]  ;;  %621 = sbr.rel (%p5455_p4) target bundleno = 253 (0xfd), region = 68  ;;  %vm622_vm5 = vcmask (!%p5455_p4), 386048   ;;  %v5378_v36 = vmov (!%p5455_p4), 0.0  }
  0xf7   : > { %623 = vst.msk [vmem:[%s6768_s10] sm:$0x3] (!%p5455_p4), %vm622_vm5, %v5378_v36 }
  0xf8   : > { %v5511_v31 = vld [vmem:[#allocation2 + $0x8] sm:$0xff]  ;;  %v617_v34 = vld [vmem:[#allocation3 + $0x8] sm:$0xff] }
  0xfc   : > { %v5513_v32 = vld [vmem:[#allocation2 + $0x10] sm:$0xff]  ;;  %v618_v35 = vld [vmem:[#allocation3 + $0x10] sm:$0xff] }
  0xfd PF: > { %v948_v37 = vld [vmem:[%s5448_s19 + $0x10] sm:$0xff]  ;;  %v946_v38 = vld [vmem:[%s5448_s19] sm:$0xff]  ;;  %4658 = vmatprep.subr.bf16.mxu0 %v616_v33  ;;  %v5379_v39 = vmov 0   ;;  %v949_v40 = vld [vmem:[%s5448_s19 + $0x18] sm:$0xff]  ;;  %vm6769_vm10 = vcmask 392192  }
  0xfe   : > { %5112 = vset.pattern.permute.xlu1 %v5379_v39  ;;  %5111 = vset.pattern.permute.xlu0 %v5379_v39  ;;  %v947_v41 = vld [vmem:[%s5448_s19 + $0x8] sm:$0xff]  ;;  %v950_v43 = vld [vmem:[%s5448_s19 + $0x20] sm:$0xff]  ;;  %v953_v44 = vld [vmem:[%s5448_s19 + $0x38] sm:$0xff] }
  0xff   : > { %1017 = vperm.xlu1 %5112, %v948_v37   ;;  %1011 = vperm.xlu0 %5111, %v946_v38   ;;  %v951_v42 = vld [vmem:[%s5448_s19 + $0x28] sm:$0xff]  ;;  %v952_v45 = vld [vmem:[%s5448_s19 + $0x30] sm:$0xff]  ;;  %v954_v47 = vld [vmem:[%s5448_s19 + $0x40] sm:$0xff] }
 0x100   : > { %4659 = vmatpush3.bf16.msra.mxu0 %v616_v33  ;;  %v955_v46 = vld [vmem:[%s5448_s19 + $0x48] sm:$0xff]  ;;  %v957_v48 = vld [vmem:[%s5448_s19 + $0x58] sm:$0xff]  ;;  %v956_v49 = vld [vmem:[%s5448_s19 + $0x50] sm:$0xff] }
 0x101   : > { %4660 = vmatprep.subr.bf16.mxu0 %v617_v34  ;;  %v959_v50 = vld [vmem:[%s5448_s19 + $0x68] sm:$0xff]  ;;  %v958_v51 = vld [vmem:[%s5448_s19 + $0x60] sm:$0xff]  ;;  %v961_v52 = vld [vmem:[%s5448_s19 + $0x78] sm:$0xff] }
 0x102   : > { %v960_v53 = vld [vmem:[%s5448_s19 + $0x70] sm:$0xff]  ;;  %v963_v54 = vld [vmem:[%s5448_s19 + $0x88] sm:$0xff]  ;;  %v962_v55 = vld [vmem:[%s5448_s19 + $0x80] sm:$0xff] }
 0x103   : > { %1020 = vperm.xlu1 %5112, %v949_v40   ;;  %1014 = vperm.xlu0 %5111, %v947_v41   ;;  %v965_v56 = vld [vmem:[%s5448_s19 + $0x98] sm:$0xff]  ;;  %v964_v57 = vld [vmem:[%s5448_s19 + $0x90] sm:$0xff]  ;;  %v967_v58 = vld [vmem:[%s5448_s19 + $0xa8] sm:$0xff]  ;;  %v624_v41 = vlaneseq }
 0x104   : > { %4661 = vmatpush3.bf16.msra.mxu0 %v617_v34  ;;  %v966_v59 = vld [vmem:[%s5448_s19 + $0xa0] sm:$0xff]  ;;  %v969_v60 = vld [vmem:[%s5448_s19 + $0xb8] sm:$0xff]  ;;  %v968_v61 = vld [vmem:[%s5448_s19 + $0xb0] sm:$0xff] }
 0x105   : > { %4662 = vmatprep.subr.bf16.mxu0 %v618_v35  ;;  %v971_v62 = vld [vmem:[%s5448_s19 + $0xc8] sm:$0xff]  ;;  %v970_v63 = vld [vmem:[%s5448_s19 + $0xc0] sm:$0xff]  ;;  %v973_v0 = vld [vmem:[%s5448_s19 + $0xd8] sm:$0xff] }
 0x106   : > { %v972_v1 = vld [vmem:[%s5448_s19 + $0xd0] sm:$0xff]  ;;  %v975_v2 = vld [vmem:[%s5448_s19 + $0xe8] sm:$0xff]  ;;  %v974_v3 = vld [vmem:[%s5448_s19 + $0xe0] sm:$0xff] }
 0x107   : > { %1026 = vperm.xlu1 %5112, %v951_v42   ;;  %1023 = vperm.xlu0 %5111, %v950_v43   ;;  %v977_v4 = vld [vmem:[%s5448_s19 + $0xf8] sm:$0xff]  ;;  %v976_v5 = vld [vmem:[%s5448_s19 + $0xf0] sm:$0xff]  ;;  %v979_v6 = vld [vmem:[%s5448_s19 + $0x108] sm:$0xff] }
 0x108   : > { %4663 = vmatpush3.bf16.msra.mxu0 %v618_v35  ;;  %v978_v7 = vld [vmem:[%s5448_s19 + $0x100] sm:$0xff]  ;;  %v981_v8 = vld [vmem:[%s5448_s19 + $0x118] sm:$0xff]  ;;  %v980_v9 = vld [vmem:[%s5448_s19 + $0x110] sm:$0xff] }
 0x109   : > { %4728 = vmatprep.subr.bf16.mxu0 %v5509_v30  ;;  %v983_v10 = vld [vmem:[%s5448_s19 + $0x128] sm:$0xff]  ;;  %v982_v11 = vld [vmem:[%s5448_s19 + $0x120] sm:$0xff]  ;;  %v985_v12 = vld [vmem:[%s5448_s19 + $0x138] sm:$0xff] }
 0x10a   : > { %v984_v13 = vld [vmem:[%s5448_s19 + $0x130] sm:$0xff]  ;;  %v987_v14 = vld [vmem:[%s5448_s19 + $0x148] sm:$0xff]  ;;  %v986_v15 = vld [vmem:[%s5448_s19 + $0x140] sm:$0xff] }
 0x10b   : > { %1032 = vperm.xlu1 %5112, %v953_v44   ;;  %1029 = vperm.xlu0 %5111, %v952_v45   ;;  %v989_v16 = vld [vmem:[%s5448_s19 + $0x158] sm:$0xff]  ;;  %v988_v17 = vld [vmem:[%s5448_s19 + $0x150] sm:$0xff]  ;;  %v991_v18 = vld [vmem:[%s5448_s19 + $0x168] sm:$0xff]  ;;  %v5587_v44 = vand.u32 127, %v624_v41 }
 0x10c   : > { %v990_v19 = vld [vmem:[%s5448_s19 + $0x160] sm:$0xff]  ;;  %v993_v20 = vld [vmem:[%s5448_s19 + $0x178] sm:$0xff]  ;;  %v992_v21 = vld [vmem:[%s5448_s19 + $0x170] sm:$0xff] }
 0x10d   : > { %v995_v22 = vld [vmem:[%s5448_s19 + $0x188] sm:$0xff]  ;;  %v994_v23 = vld [vmem:[%s5448_s19 + $0x180] sm:$0xff]  ;;  %v997_v24 = vld [vmem:[%s5448_s19 + $0x198] sm:$0xff] }
 0x10e   : > { %v996_v25 = vld [vmem:[%s5448_s19 + $0x190] sm:$0xff]  ;;  %v999_v26 = vld [vmem:[%s5448_s19 + $0x1a8] sm:$0xff]  ;;  %v998_v27 = vld [vmem:[%s5448_s19 + $0x1a0] sm:$0xff] }
 0x10f   : > { %1038 = vperm.xlu1 %5112, %v955_v46   ;;  %1035 = vperm.xlu0 %5111, %v954_v47   ;;  %v1001_v28 = vld [vmem:[%s5448_s19 + $0x1b8] sm:$0xff]  ;;  %v1000_v29 = vld [vmem:[%s5448_s19 + $0x1b0] sm:$0xff]  ;;  %v1003_v33 = vld [vmem:[%s5448_s19 + $0x1c8] sm:$0xff] }
 0x110   : > { %v1002_v34 = vld [vmem:[%s5448_s19 + $0x1c0] sm:$0xff]  ;;  %v1005_v35 = vld [vmem:[%s5448_s19 + $0x1d8] sm:$0xff]  ;;  %v1004_v36 = vld [vmem:[%s5448_s19 + $0x1d0] sm:$0xff] }
 0x111   : > { %v1007_v37 = vld [vmem:[%s5448_s19 + $0x1e8] sm:$0xff]  ;;  %v1006_v38 = vld [vmem:[%s5448_s19 + $0x1e0] sm:$0xff]  ;;  %v1009_v39 = vld [vmem:[%s5448_s19 + $0x1f8] sm:$0xff] }
 0x112   : > { %v1008_v40 = vld [vmem:[%s5448_s19 + $0x1f0] sm:$0xff]  ;;  %v627_v42 = vld [vmem:[%s5453_s22 + $0x8] sm:$0xff]  ;;  %v626_v43 = vld [vmem:[%s5453_s22] sm:$0xff] }
 0x113   : > { %1044 = vperm.xlu1 %5112, %v957_v48   ;;  %1041 = vperm.xlu0 %5111, %v956_v49   ;;  %v629_v47 = vld [vmem:[%s5453_s22 + $0x18] sm:$0xff]  ;;  %v628_v48 = vld [vmem:[%s5453_s22 + $0x10] sm:$0xff] }
 0x117   : > { %1050 = vperm.xlu1 %5112, %v959_v50   ;;  %1047 = vperm.xlu0 %5111, %v958_v51   ;;  %v5380_v51 = vmov 0.0  }
 0x11b   : > { %1056 = vperm.xlu1 %5112, %v961_v52   ;;  %1053 = vperm.xlu0 %5111, %v960_v53  }
 0x11f   : > { %1062 = vperm.xlu1 %5112, %v963_v54   ;;  %1059 = vperm.xlu0 %5111, %v962_v55   ;;  %v631_v54 = vld [vmem:[%s5453_s22 + $0x28] sm:$0xff]  ;;  %v630_v55 = vld [vmem:[%s5453_s22 + $0x20] sm:$0xff] }
 0x123   : > { %1068 = vperm.xlu1 %5112, %v965_v56   ;;  %1065 = vperm.xlu0 %5111, %v964_v57  }
 0x127   : > { %1074 = vperm.xlu1 %5112, %v967_v58   ;;  %1071 = vperm.xlu0 %5111, %v966_v59  }
 0x12b   : > { %1080 = vperm.xlu1 %5112, %v969_v60   ;;  %1077 = vperm.xlu0 %5111, %v968_v61  }
 0x12f   : > { %1086 = vperm.xlu1 %5112, %v971_v62   ;;  %1083 = vperm.xlu0 %5111, %v970_v63  }
 0x133   : > { %1092 = vperm.xlu1 %5112, %v973_v0   ;;  %1089 = vperm.xlu0 %5111, %v972_v1   ;;  %v633_v0 = vld [vmem:[%s5453_s22 + $0x38] sm:$0xff]  ;;  %v632_v1 = vld [vmem:[%s5453_s22 + $0x30] sm:$0xff] }
 0x137   : > { %1098 = vperm.xlu1 %5112, %v975_v2   ;;  %1095 = vperm.xlu0 %5111, %v974_v3  }
 0x13b   : > { %1104 = vperm.xlu1 %5112, %v977_v4   ;;  %1101 = vperm.xlu0 %5111, %v976_v5  }
 0x13f   : > { %1110 = vperm.xlu1 %5112, %v979_v6   ;;  %1107 = vperm.xlu0 %5111, %v978_v7   ;;  %v635_v7 = vld [vmem:[%s5453_s22 + $0x48] sm:$0xff] }
 0x143   : > { %1116 = vperm.xlu1 %5112, %v981_v8   ;;  %1113 = vperm.xlu0 %5111, %v980_v9   ;;  %v634_v8 = vld [vmem:[%s5453_s22 + $0x40] sm:$0xff] }
 0x147   : > { %1122 = vperm.xlu1 %5112, %v983_v10   ;;  %1119 = vperm.xlu0 %5111, %v982_v11  }
 0x14b   : > { %1128 = vperm.xlu1 %5112, %v985_v12   ;;  %1125 = vperm.xlu0 %5111, %v984_v13   ;;  %v637_v13 = vld [vmem:[%s5453_s22 + $0x58] sm:$0xff] }
 0x14f   : > { %1134 = vperm.xlu1 %5112, %v987_v14   ;;  %1131 = vperm.xlu0 %5111, %v986_v15   ;;  %v636_v14 = vld [vmem:[%s5453_s22 + $0x50] sm:$0xff] }
 0x153   : > { %1140 = vperm.xlu1 %5112, %v989_v16   ;;  %1137 = vperm.xlu0 %5111, %v988_v17  }
 0x157   : > { %1146 = vperm.xlu1 %5112, %v991_v18   ;;  %1143 = vperm.xlu0 %5111, %v990_v19   ;;  %v639_v19 = vld [vmem:[%s5453_s22 + $0x68] sm:$0xff] }
 0x15b   : > { %1152 = vperm.xlu1 %5112, %v993_v20   ;;  %1149 = vperm.xlu0 %5111, %v992_v21   ;;  %v638_v20 = vld [vmem:[%s5453_s22 + $0x60] sm:$0xff] }
 0x15f   : > { %1158 = vperm.xlu1 %5112, %v995_v22   ;;  %1155 = vperm.xlu0 %5111, %v994_v23  }
 0x163   : > { %1164 = vperm.xlu1 %5112, %v997_v24   ;;  %1161 = vperm.xlu0 %5111, %v996_v25   ;;  %v641_v25 = vld [vmem:[%s5453_s22 + $0x78] sm:$0xff] }
 0x167   : > { %1170 = vperm.xlu1 %5112, %v999_v26   ;;  %1167 = vperm.xlu0 %5111, %v998_v27   ;;  %v640_v26 = vld [vmem:[%s5453_s22 + $0x70] sm:$0xff] }
 0x16b   : > { %1176 = vperm.xlu1 %5112, %v1001_v28   ;;  %1173 = vperm.xlu0 %5111, %v1000_v29  }
 0x16f   : > { %1182 = vperm.xlu1 %5112, %v1003_v33   ;;  %1179 = vperm.xlu0 %5111, %v1002_v34  }
 0x173   : > { %1188 = vperm.xlu1 %5112, %v1005_v35   ;;  %1185 = vperm.xlu0 %5111, %v1004_v36   ;;  %v643_v35 = vld [vmem:[%s5453_s22 + $0x88] sm:$0xff]  ;;  %v642_v36 = vld [vmem:[%s5453_s22 + $0x80] sm:$0xff] }
 0x177   : > { %1194 = vperm.xlu1 %5112, %v1007_v37   ;;  %1191 = vperm.xlu0 %5111, %v1006_v38  }
 0x17b   : > { %1200 = vperm.xlu1 %5112, %v1009_v39   ;;  %1197 = vperm.xlu0 %5111, %v1008_v40  }
 0x17e   : > { %v1018_v45 = vpop.permute.xlu1 %1017  ;;  %v1012_v46 = vpop.permute.xlu0 %1011 }
 0x17f   : > { %694 = vperm.xlu1 %5112, %v627_v42   ;;  %691 = vperm.xlu0 %5111, %v626_v43   ;;  %vm1204_vm6 = vcmp.eq.s32.totalorder %v1018_v45, %v5587_v44  ;;  %vm1202_vm7 = vcmp.eq.s32.totalorder %v1012_v46, %v5587_v44  ;;  %v645_v42 = vld [vmem:[%s5453_s22 + $0x98] sm:$0xff]  ;;  %v644_v43 = vld [vmem:[%s5453_s22 + $0x90] sm:$0xff] }
 0x180   : > { %v4043_v52 = vsel %vm1204_vm6, 1.0, %v5380_v51  ;;  %v4041_v56 = vsel %vm1202_vm7, 1.0, %v5380_v51 }
 0x182   : > { %v1021_v49 = vpop.permute.xlu1 %1020  ;;  %v1015_v50 = vpop.permute.xlu0 %1014 }
 0x183   : > { %vm1205_vm8 = vcmp.eq.s32.totalorder %v1021_v49, %v5587_v44  ;;  %vm1203_vm9 = vcmp.eq.s32.totalorder %v1015_v50, %v5587_v44  ;;  %700 = vperm.xlu1 %5112, %v629_v47   ;;  %697 = vperm.xlu0 %5111, %v628_v48   ;;  %v647_v50 = vld [vmem:[%s5453_s22 + $0xa8] sm:$0xff] }
 0x184   : > { %v4044_v53 = vsel %vm1205_vm8, 1.0, %v5380_v51  ;;  %v4042_v57 = vsel %vm1203_vm9, 1.0, %v5380_v51 }
 0x185   : > { %v1555_v58 = vpack.c.bf16 %v4044_v53, %v4043_v52  ;;  %v1554_v59 = vpack.c.bf16 %v4042_v57, %v4041_v56  ;;  %v646_v52 = vld [vmem:[%s5453_s22 + $0xa0] sm:$0xff] }
 0x186   : > { %v1027_v60 = vpop.permute.xlu1 %1026  ;;  %v1024_v61 = vpop.permute.xlu0 %1023 }
 0x187   : > { %vm1207_vm11 = vcmp.eq.s32.totalorder %v1027_v60, %v5587_v44  ;;  %vm1206_vm12 = vcmp.eq.s32.totalorder %v1024_v61, %v5587_v44  ;;  %706 = vperm.xlu1 %5112, %v631_v54   ;;  %703 = vperm.xlu0 %5111, %v630_v55  }
 0x188   : > { %v4046_v62 = vsel %vm1207_vm11, 1.0, %v5380_v51  ;;  %v4045_v63 = vsel %vm1206_vm12, 1.0, %v5380_v51  ;;  %4664 = vmatprep.mubr.msk.bf16.mxu0 %vm6769_vm10, %v1554_v59  ;;  %v648_v59 = vld [vmem:[%s5453_s22 + $0xb0] sm:$0xff] }
 0x189   : > { %v1556_v2 = vpack.c.bf16 %v4046_v62, %v4045_v63  ;;  %4665 = vmatmul.mubr.msk.bf16.vlgmr.msra.gmra.mrb[0].mxu0 %vm6769_vm10, %v1555_v58  ;;  %v649_v58 = vld [vmem:[%s5453_s22 + $0xb8] sm:$0xff] }
 0x18a   : > { %4729 = vmatpush3.bf16.msra.mxu0 %v5509_v30  ;;  %v1033_v3 = vpop.permute.xlu1 %1032  ;;  %v1030_v4 = vpop.permute.xlu0 %1029 }
 0x18b   : > { %vm1209_vm13 = vcmp.eq.s32.totalorder %v1033_v3, %v5587_v44  ;;  %vm1208_vm14 = vcmp.eq.s32.totalorder %v1030_v4, %v5587_v44  ;;  %712 = vperm.xlu1 %5112, %v633_v0   ;;  %709 = vperm.xlu0 %5111, %v632_v1   ;;  %v651_v1 = vld [vmem:[%s5453_s22 + $0xc8] sm:$0xff] }
 0x18c   : > { %v4048_v5 = vsel %vm1209_vm13, 1.0, %v5380_v51  ;;  %v4047_v6 = vsel %vm1208_vm14, 1.0, %v5380_v51  ;;  %4668 = vmatprep.mubr.msk.bf16.mxu0 %vm6769_vm10, %v1556_v2  ;;  %4730 = vmatprep.subr.bf16.mxu0 %v5511_v31  ;;  %v650_v2 = vld [vmem:[%s5453_s22 + $0xc0] sm:$0xff] }
 0x18d   : > { %v1557_v30 = vpack.c.bf16 %v4048_v5, %v4047_v6 }
 0x18e   : > { %v1039_v9 = vpop.permute.xlu1 %1038  ;;  %v1036_v10 = vpop.permute.xlu0 %1035  ;;  %4731 = vmatpush3.bf16.msra.mxu0 %v5511_v31 }
 0x18f   : > { %vm1211_vm15 = vcmp.eq.s32.totalorder %v1039_v9, %v5587_v44  ;;  %vm1210_vm0 = vcmp.eq.s32.totalorder %v1036_v10, %v5587_v44  ;;  %718 = vperm.xlu1 %5112, %v635_v7   ;;  %715 = vperm.xlu0 %5111, %v634_v8   ;;  %v653_v8 = vld [vmem:[%s5453_s22 + $0xd8] sm:$0xff] }
 0x190   : > { %v4050_v11 = vsel %vm1211_vm15, 1.0, %v5380_v51  ;;  %v4049_v12 = vsel %vm1210_vm0, 1.0, %v5380_v51  ;;  %4732 = vmatprep.subr.bf16.mxu0 %v5513_v32 }
 0x191   : > { %v1558_v15 = vpack.c.bf16 %v4050_v11, %v4049_v12  ;;  %4669 = vmatmul.mubr.msk.bf16.gmra.mrb[4].mxu0 %vm6769_vm10, %v1557_v30  ;;  %v652_v30 = vld [vmem:[%s5453_s22 + $0xd0] sm:$0xff] }
 0x192   : > { %v1045_v31 = vpop.permute.xlu1 %1044  ;;  %v1042_v16 = vpop.permute.xlu0 %1041  ;;  %4733 = vmatpush3.bf16.msra.mxu0 %v5513_v32 }
 0x193   : > { %vm1213_vm1 = vcmp.eq.s32.totalorder %v1045_v31, %v5587_v44  ;;  %vm1212_vm2 = vcmp.eq.s32.totalorder %v1042_v16, %v5587_v44  ;;  %724 = vperm.xlu1 %5112, %v637_v13   ;;  %721 = vperm.xlu0 %5111, %v636_v14   ;;  %v655_v14 = vld [vmem:[%s5453_s22 + $0xe8] sm:$0xff] }
 0x194   : > { %v4052_v17 = vsel %vm1213_vm1, 1.0, %v5380_v51  ;;  %v4051_v18 = vsel %vm1212_vm2, 1.0, %v5380_v51  ;;  %4672 = vmatprep.mubr.msk.bf16.mxu0 %vm6769_vm10, %v1558_v15  ;;  %v654_v15 = vld [vmem:[%s5453_s22 + $0xe0] sm:$0xff] }
 0x195   : > { %v1559_v21 = vpack.c.bf16 %v4052_v17, %v4051_v18 }
 0x196   : > { %v1051_v22 = vpop.permute.xlu1 %1050  ;;  %v1048_v23 = vpop.permute.xlu0 %1047 }
 0x197   : > { %vm1215_vm3 = vcmp.eq.s32.totalorder %v1051_v22, %v5587_v44  ;;  %vm1214_vm4 = vcmp.eq.s32.totalorder %v1048_v23, %v5587_v44  ;;  %730 = vperm.xlu1 %5112, %v639_v19   ;;  %727 = vperm.xlu0 %5111, %v638_v20   ;;  %v657_v20 = vld [vmem:[%s5453_s22 + $0xf8] sm:$0xff] }
 0x198   : > { %v4054_v32 = vsel %vm1215_vm3, 1.0, %v5380_v51  ;;  %v4053_v24 = vsel %vm1214_vm4, 1.0, %v5380_v51 }
 0x199   : > { %v1560_v27 = vpack.c.bf16 %v4054_v32, %v4053_v24  ;;  %4673 = vmatmul.mubr.msk.bf16.gmra.mrb[8].mxu0 %vm6769_vm10, %v1559_v21  ;;  %v656_v21 = vld [vmem:[%s5453_s22 + $0xf0] sm:$0xff] }
 0x19a   : > { %v1057_v28 = vpop.permute.xlu1 %1056  ;;  %v1054_v29 = vpop.permute.xlu0 %1053 }
 0x19b   : > { %vm1217_vm5 = vcmp.eq.s32.totalorder %v1057_v28, %v5587_v44  ;;  %vm1216_vm6 = vcmp.eq.s32.totalorder %v1054_v29, %v5587_v44  ;;  %736 = vperm.xlu1 %5112, %v641_v25   ;;  %733 = vperm.xlu0 %5111, %v640_v26   ;;  %v659_v26 = vld [vmem:[%s5453_s22 + $0x108] sm:$0xff] }
 0x19c   : > { %v4056_v33 = vsel %vm1217_vm5, 1.0, %v5380_v51  ;;  %v4055_v34 = vsel %vm1216_vm6, 1.0, %v5380_v51  ;;  %4676 = vmatprep.mubr.msk.bf16.mxu0 %vm6769_vm10, %v1560_v27  ;;  %v658_v27 = vld [vmem:[%s5453_s22 + $0x100] sm:$0xff] }
 0x19d   : > { %v1561_v37 = vpack.c.bf16 %v4056_v33, %v4055_v34 }
 0x19e   : > { %v1063_v38 = vpop.permute.xlu1 %1062  ;;  %v1060_v39 = vpop.permute.xlu0 %1059 }
 0x19f   : > { %vm1219_vm7 = vcmp.eq.s32.totalorder %v1063_v38, %v5587_v44  ;;  %vm1218_vm8 = vcmp.eq.s32.totalorder %v1060_v39, %v5587_v44  ;;  %742 = vperm.xlu1 %5112, %v643_v35   ;;  %739 = vperm.xlu0 %5111, %v642_v36   ;;  %v661_v36 = vld [vmem:[%s5453_s22 + $0x118] sm:$0xff] }
 0x1a0   : > { %v4058_v40 = vsel %vm1219_vm7, 1.0, %v5380_v51  ;;  %v4057_v41 = vsel %vm1218_vm8, 1.0, %v5380_v51 }
 0x1a1   : > { %v1562_v45 = vpack.c.bf16 %v4058_v40, %v4057_v41  ;;  %4677 = vmatmul.mubr.msk.bf16.gmra.mrb[12].mxu0 %vm6769_vm10, %v1561_v37  ;;  %v660_v37 = vld [vmem:[%s5453_s22 + $0x110] sm:$0xff] }
 0x1a2   : > { %v1069_v46 = vpop.permute.xlu1 %1068  ;;  %v1066_v47 = vpop.permute.xlu0 %1065 }
 0x1a3   : > { %vm1221_vm9 = vcmp.eq.s32.totalorder %v1069_v46, %v5587_v44  ;;  %vm1220_vm11 = vcmp.eq.s32.totalorder %v1066_v47, %v5587_v44  ;;  %748 = vperm.xlu1 %5112, %v645_v42   ;;  %745 = vperm.xlu0 %5111, %v644_v43   ;;  %v663_v43 = vld [vmem:[%s5453_s22 + $0x128] sm:$0xff] }
 0x1a4   : > { %v4060_v48 = vsel %vm1221_vm9, 1.0, %v5380_v51  ;;  %v4059_v49 = vsel %vm1220_vm11, 1.0, %v5380_v51  ;;  %4680 = vmatprep.mubr.msk.bf16.mxu0 %vm6769_vm10, %v1562_v45  ;;  %v662_v45 = vld [vmem:[%s5453_s22 + $0x120] sm:$0xff] }
 0x1a5   : > { %v1563_v53 = vpack.c.bf16 %v4060_v48, %v4059_v49 }
 0x1a6   : > { %v1075_v54 = vpop.permute.xlu1 %1074  ;;  %v1072_v55 = vpop.permute.xlu0 %1071 }
 0x1a7   : > { %vm1223_vm12 = vcmp.eq.s32.totalorder %v1075_v54, %v5587_v44  ;;  %vm1222_vm13 = vcmp.eq.s32.totalorder %v1072_v55, %v5587_v44  ;;  %754 = vperm.xlu1 %5112, %v647_v50   ;;  %751 = vperm.xlu0 %5111, %v646_v52   ;;  %v665_v52 = vld [vmem:[%s5453_s22 + $0x138] sm:$0xff] }
 0x1a8   : > { %v4062_v56 = vsel %vm1223_vm12, 1.0, %v5380_v51  ;;  %v4061_v57 = vsel %vm1222_vm13, 1.0, %v5380_v51 }
 0x1a9   : > { %v1564_v60 = vpack.c.bf16 %v4062_v56, %v4061_v57  ;;  %4681 = vmatmul.mubr.msk.bf16.gmra.mrb[16].mxu0 %vm6769_vm10, %v1563_v53  ;;  %v664_v53 = vld [vmem:[%s5453_s22 + $0x130] sm:$0xff] }
 0x1aa   : > { %v1081_v61 = vpop.permute.xlu1 %1080  ;;  %v1078_v62 = vpop.permute.xlu0 %1077 }
 0x1ab   : > { %vm1225_vm14 = vcmp.eq.s32.totalorder %v1081_v61, %v5587_v44  ;;  %vm1224_vm15 = vcmp.eq.s32.totalorder %v1078_v62, %v5587_v44  ;;  %760 = vperm.xlu1 %5112, %v649_v58   ;;  %757 = vperm.xlu0 %5111, %v648_v59   ;;  %v667_v59 = vld [vmem:[%s5453_s22 + $0x148] sm:$0xff] }
 0x1ac   : > { %v4064_v63 = vsel %vm1225_vm14, 1.0, %v5380_v51  ;;  %v4063_v0 = vsel %vm1224_vm15, 1.0, %v5380_v51  ;;  %4684 = vmatprep.mubr.msk.bf16.mxu0 %vm6769_vm10, %v1564_v60  ;;  %v666_v60 = vld [vmem:[%s5453_s22 + $0x140] sm:$0xff] }
 0x1ad   : > { %v1565_v3 = vpack.c.bf16 %v4064_v63, %v4063_v0 }
 0x1ae   : > { %v1087_v4 = vpop.permute.xlu1 %1086  ;;  %v1084_v5 = vpop.permute.xlu0 %1083 }
 0x1af   : > { %vm1227_vm0 = vcmp.eq.s32.totalorder %v1087_v4, %v5587_v44  ;;  %vm1226_vm1 = vcmp.eq.s32.totalorder %v1084_v5, %v5587_v44  ;;  %766 = vperm.xlu1 %5112, %v651_v1   ;;  %763 = vperm.xlu0 %5111, %v650_v2   ;;  %v669_v2 = vld [vmem:[%s5453_s22 + $0x158] sm:$0xff] }
 0x1b0   : > { %v4066_v6 = vsel %vm1227_vm0, 1.0, %v5380_v51  ;;  %v4065_v7 = vsel %vm1226_vm1, 1.0, %v5380_v51 }
 0x1b1   : > { %v1566_v9 = vpack.c.bf16 %v4066_v6, %v4065_v7  ;;  %4685 = vmatmul.mubr.msk.bf16.gmra.mrb[20].mxu0 %vm6769_vm10, %v1565_v3  ;;  %v668_v3 = vld [vmem:[%s5453_s22 + $0x150] sm:$0xff] }
 0x1b2   : > { %v1093_v10 = vpop.permute.xlu1 %1092  ;;  %v1090_v11 = vpop.permute.xlu0 %1089 }
 0x1b3   : > { %vm1229_vm2 = vcmp.eq.s32.totalorder %v1093_v10, %v5587_v44  ;;  %vm1228_vm3 = vcmp.eq.s32.totalorder %v1090_v11, %v5587_v44  ;;  %772 = vperm.xlu1 %5112, %v653_v8   ;;  %769 = vperm.xlu0 %5111, %v652_v30   ;;  %v671_v30 = vld [vmem:[%s5453_s22 + $0x168] sm:$0xff] }
 0x1b4   : > { %v4068_v12 = vsel %vm1229_vm2, 1.0, %v5380_v51  ;;  %v4067_v13 = vsel %vm1228_vm3, 1.0, %v5380_v51  ;;  %4688 = vmatprep.mubr.msk.bf16.mxu0 %vm6769_vm10, %v1566_v9  ;;  %v670_v9 = vld [vmem:[%s5453_s22 + $0x160] sm:$0xff] }
 0x1b5   : > { %v1567_v31 = vpack.c.bf16 %v4068_v12, %v4067_v13 }
 0x1b6   : > { %v1099_v16 = vpop.permute.xlu1 %1098  ;;  %v1096_v17 = vpop.permute.xlu0 %1095 }
 0x1b7   : > { %vm1231_vm4 = vcmp.eq.s32.totalorder %v1099_v16, %v5587_v44  ;;  %vm1230_vm5 = vcmp.eq.s32.totalorder %v1096_v17, %v5587_v44  ;;  %778 = vperm.xlu1 %5112, %v655_v14   ;;  %775 = vperm.xlu0 %5111, %v654_v15   ;;  %v673_v15 = vld [vmem:[%s5453_s22 + $0x178] sm:$0xff] }
 0x1b8   : > { %v4070_v18 = vsel %vm1231_vm4, 1.0, %v5380_v51  ;;  %v4069_v19 = vsel %vm1230_vm5, 1.0, %v5380_v51 }
 0x1b9   : > { %v1568_v22 = vpack.c.bf16 %v4070_v18, %v4069_v19  ;;  %4689 = vmatmul.mubr.msk.bf16.gmra.mrb[24].mxu0 %vm6769_vm10, %v1567_v31  ;;  %v672_v31 = vld [vmem:[%s5453_s22 + $0x170] sm:$0xff] }
 0x1ba   : > { %v1105_v23 = vpop.permute.xlu1 %1104  ;;  %v1102_v32 = vpop.permute.xlu0 %1101 }
 0x1bb   : > { %vm1233_vm6 = vcmp.eq.s32.totalorder %v1105_v23, %v5587_v44  ;;  %vm1232_vm7 = vcmp.eq.s32.totalorder %v1102_v32, %v5587_v44  ;;  %784 = vperm.xlu1 %5112, %v657_v20   ;;  %781 = vperm.xlu0 %5111, %v656_v21   ;;  %v675_v21 = vld [vmem:[%s5453_s22 + $0x188] sm:$0xff] }
 0x1bc   : > { %v4072_v24 = vsel %vm1233_vm6, 1.0, %v5380_v51  ;;  %v4071_v25 = vsel %vm1232_vm7, 1.0, %v5380_v51  ;;  %4692 = vmatprep.mubr.msk.bf16.mxu0 %vm6769_vm10, %v1568_v22  ;;  %v674_v22 = vld [vmem:[%s5453_s22 + $0x180] sm:$0xff] }
 0x1bd   : > { %v1569_v28 = vpack.c.bf16 %v4072_v24, %v4071_v25 }
 0x1be   : > { %v1111_v29 = vpop.permute.xlu1 %1110  ;;  %v1108_v33 = vpop.permute.xlu0 %1107 }
 0x1bf   : > { %vm1235_vm8 = vcmp.eq.s32.totalorder %v1111_v29, %v5587_v44  ;;  %vm1234_vm9 = vcmp.eq.s32.totalorder %v1108_v33, %v5587_v44  ;;  %790 = vperm.xlu1 %5112, %v659_v26   ;;  %787 = vperm.xlu0 %5111, %v658_v27   ;;  %v677_v27 = vld [vmem:[%s5453_s22 + $0x198] sm:$0xff] }
 0x1c0   : > { %v4074_v34 = vsel %vm1235_vm8, 1.0, %v5380_v51  ;;  %v4073_v35 = vsel %vm1234_vm9, 1.0, %v5380_v51 }
 0x1c1   : > { %v1570_v38 = vpack.c.bf16 %v4074_v34, %v4073_v35  ;;  %4693 = vmatmul.mubr.msk.bf16.gmra.mrb[28].mxu0 %vm6769_vm10, %v1569_v28  ;;  %v676_v28 = vld [vmem:[%s5453_s22 + $0x190] sm:$0xff] }
 0x1c2   : > { %v1117_v39 = vpop.permute.xlu1 %1116  ;;  %v1114_v40 = vpop.permute.xlu0 %1113 }
 0x1c3   : > { %vm1237_vm11 = vcmp.eq.s32.totalorder %v1117_v39, %v5587_v44  ;;  %vm1236_vm12 = vcmp.eq.s32.totalorder %v1114_v40, %v5587_v44  ;;  %796 = vperm.xlu1 %5112, %v661_v36   ;;  %793 = vperm.xlu0 %5111, %v660_v37   ;;  %v679_v37 = vld [vmem:[%s5453_s22 + $0x1a8] sm:$0xff] }
 0x1c4   : > { %v4076_v41 = vsel %vm1237_vm11, 1.0, %v5380_v51  ;;  %v4075_v42 = vsel %vm1236_vm12, 1.0, %v5380_v51  ;;  %4696 = vmatprep.mubr.msk.bf16.mxu0 %vm6769_vm10, %v1570_v38  ;;  %v678_v38 = vld [vmem:[%s5453_s22 + $0x1a0] sm:$0xff] }
 0x1c5   : > { %v1571_v46 = vpack.c.bf16 %v4076_v41, %v4075_v42 }
 0x1c6   : > { %v1123_v47 = vpop.permute.xlu1 %1122  ;;  %v1120_v48 = vpop.permute.xlu0 %1119 }
 0x1c7   : > { %vm1239_vm13 = vcmp.eq.s32.totalorder %v1123_v47, %v5587_v44  ;;  %vm1238_vm14 = vcmp.eq.s32.totalorder %v1120_v48, %v5587_v44  ;;  %802 = vperm.xlu1 %5112, %v663_v43   ;;  %799 = vperm.xlu0 %5111, %v662_v45   ;;  %v681_v45 = vld [vmem:[%s5453_s22 + $0x1b8] sm:$0xff] }
 0x1c8   : > { %v4078_v49 = vsel %vm1239_vm13, 1.0, %v5380_v51  ;;  %v4077_v50 = vsel %vm1238_vm14, 1.0, %v5380_v51 }
 0x1c9   : > { %v1572_v54 = vpack.c.bf16 %v4078_v49, %v4077_v50  ;;  %4697 = vmatmul.mubr.msk.bf16.gmra.mrb[32].mxu0 %vm6769_vm10, %v1571_v46  ;;  %v680_v46 = vld [vmem:[%s5453_s22 + $0x1b0] sm:$0xff] }
 0x1ca   : > { %v1129_v55 = vpop.permute.xlu1 %1128  ;;  %v1126_v56 = vpop.permute.xlu0 %1125 }
 0x1cb   : > { %vm1241_vm15 = vcmp.eq.s32.totalorder %v1129_v55, %v5587_v44  ;;  %vm1240_vm0 = vcmp.eq.s32.totalorder %v1126_v56, %v5587_v44  ;;  %808 = vperm.xlu1 %5112, %v665_v52   ;;  %805 = vperm.xlu0 %5111, %v664_v53   ;;  %v683_v53 = vld [vmem:[%s5453_s22 + $0x1c8] sm:$0xff] }
 0x1cc   : > { %v4080_v57 = vsel %vm1241_vm15, 1.0, %v5380_v51  ;;  %v4079_v58 = vsel %vm1240_vm0, 1.0, %v5380_v51  ;;  %4700 = vmatprep.mubr.msk.bf16.mxu0 %vm6769_vm10, %v1572_v54  ;;  %v682_v54 = vld [vmem:[%s5453_s22 + $0x1c0] sm:$0xff] }
 0x1cd   : > { %v1573_v61 = vpack.c.bf16 %v4080_v57, %v4079_v58 }
 0x1ce   : > { %v1135_v62 = vpop.permute.xlu1 %1134  ;;  %v1132_v63 = vpop.permute.xlu0 %1131 }
 0x1cf   : > { %vm1243_vm1 = vcmp.eq.s32.totalorder %v1135_v62, %v5587_v44  ;;  %vm1242_vm2 = vcmp.eq.s32.totalorder %v1132_v63, %v5587_v44  ;;  %814 = vperm.xlu1 %5112, %v667_v59   ;;  %811 = vperm.xlu0 %5111, %v666_v60   ;;  %v685_v60 = vld [vmem:[%s5453_s22 + $0x1d8] sm:$0xff] }
 0x1d0   : > { %v4082_v0 = vsel %vm1243_vm1, 1.0, %v5380_v51  ;;  %v4081_v1 = vsel %vm1242_vm2, 1.0, %v5380_v51 }
 0x1d1   : > { %v1574_v4 = vpack.c.bf16 %v4082_v0, %v4081_v1  ;;  %4701 = vmatmul.mubr.msk.bf16.gmra.mrb[36].mxu0 %vm6769_vm10, %v1573_v61  ;;  %v684_v61 = vld [vmem:[%s5453_s22 + $0x1d0] sm:$0xff] }
 0x1d2   : > { %v1141_v5 = vpop.permute.xlu1 %1140  ;;  %v1138_v6 = vpop.permute.xlu0 %1137 }
 0x1d3   : > { %vm1245_vm3 = vcmp.eq.s32.totalorder %v1141_v5, %v5587_v44  ;;  %vm1244_vm4 = vcmp.eq.s32.totalorder %v1138_v6, %v5587_v44  ;;  %820 = vperm.xlu1 %5112, %v669_v2   ;;  %817 = vperm.xlu0 %5111, %v668_v3   ;;  %v687_v3 = vld [vmem:[%s5453_s22 + $0x1e8] sm:$0xff] }
 0x1d4   : > { %v4084_v7 = vsel %vm1245_vm3, 1.0, %v5380_v51  ;;  %v4083_v8 = vsel %vm1244_vm4, 1.0, %v5380_v51  ;;  %4704 = vmatprep.mubr.msk.bf16.mxu0 %vm6769_vm10, %v1574_v4  ;;  %v686_v4 = vld [vmem:[%s5453_s22 + $0x1e0] sm:$0xff] }
 0x1d5   : > { %v1575_v10 = vpack.c.bf16 %v4084_v7, %v4083_v8 }
 0x1d6   : > { %v1147_v11 = vpop.permute.xlu1 %1146  ;;  %v1144_v12 = vpop.permute.xlu0 %1143 }
 0x1d7   : > { %vm1247_vm5 = vcmp.eq.s32.totalorder %v1147_v11, %v5587_v44  ;;  %vm1246_vm6 = vcmp.eq.s32.totalorder %v1144_v12, %v5587_v44  ;;  %826 = vperm.xlu1 %5112, %v671_v30   ;;  %823 = vperm.xlu0 %5111, %v670_v9   ;;  %v689_v9 = vld [vmem:[%s5453_s22 + $0x1f8] sm:$0xff] }
 0x1d8   : > { %v4086_v13 = vsel %vm1247_vm5, 1.0, %v5380_v51  ;;  %v4085_v14 = vsel %vm1246_vm6, 1.0, %v5380_v51 }
 0x1d9   : > { %v1576_v16 = vpack.c.bf16 %v4086_v13, %v4085_v14  ;;  %4705 = vmatmul.mubr.msk.bf16.gmra.mrb[40].mxu0 %vm6769_vm10, %v1575_v10  ;;  %v688_v10 = vld [vmem:[%s5453_s22 + $0x1f0] sm:$0xff] }
 0x1da   : > { %v1153_v17 = vpop.permute.xlu1 %1152  ;;  %v1150_v18 = vpop.permute.xlu0 %1149 }
 0x1db   : > { %vm1249_vm7 = vcmp.eq.s32.totalorder %v1153_v17, %v5587_v44  ;;  %vm1248_vm8 = vcmp.eq.s32.totalorder %v1150_v18, %v5587_v44  ;;  %832 = vperm.xlu1 %5112, %v673_v15   ;;  %829 = vperm.xlu0 %5111, %v672_v31  }
 0x1dc   : > { %v4088_v19 = vsel %vm1249_vm7, 1.0, %v5380_v51  ;;  %v4087_v20 = vsel %vm1248_vm8, 1.0, %v5380_v51  ;;  %4708 = vmatprep.mubr.msk.bf16.mxu0 %vm6769_vm10, %v1576_v16 }
 0x1dd   : > { %v1577_v23 = vpack.c.bf16 %v4088_v19, %v4087_v20 }
 0x1de   : > { %v1159_v32 = vpop.permute.xlu1 %1158  ;;  %v1156_v24 = vpop.permute.xlu0 %1155 }
 0x1df   : > { %vm1251_vm9 = vcmp.eq.s32.totalorder %v1159_v32, %v5587_v44  ;;  %vm1250_vm11 = vcmp.eq.s32.totalorder %v1156_v24, %v5587_v44  ;;  %838 = vperm.xlu1 %5112, %v675_v21   ;;  %835 = vperm.xlu0 %5111, %v674_v22  }
 0x1e0   : > { %v4090_v25 = vsel %vm1251_vm9, 1.0, %v5380_v51  ;;  %v4089_v26 = vsel %vm1250_vm11, 1.0, %v5380_v51 }
 0x1e1   : > { %v1578_v29 = vpack.c.bf16 %v4090_v25, %v4089_v26  ;;  %4709 = vmatmul.mubr.msk.bf16.gmra.mrb[44].mxu0 %vm6769_vm10, %v1577_v23 }
 0x1e2   : > { %v1165_v33 = vpop.permute.xlu1 %1164  ;;  %v1162_v34 = vpop.permute.xlu0 %1161 }
 0x1e3   : > { %vm1253_vm12 = vcmp.eq.s32.totalorder %v1165_v33, %v5587_v44  ;;  %vm1252_vm13 = vcmp.eq.s32.totalorder %v1162_v34, %v5587_v44  ;;  %844 = vperm.xlu1 %5112, %v677_v27   ;;  %841 = vperm.xlu0 %5111, %v676_v28  }
 0x1e4   : > { %v4092_v35 = vsel %vm1253_vm12, 1.0, %v5380_v51  ;;  %v4091_v36 = vsel %vm1252_vm13, 1.0, %v5380_v51  ;;  %4712 = vmatprep.mubr.msk.bf16.mxu0 %vm6769_vm10, %v1578_v29 }
 0x1e5   : > { %v1579_v39 = vpack.c.bf16 %v4092_v35, %v4091_v36 }
 0x1e6   : > { %v1171_v40 = vpop.permute.xlu1 %1170  ;;  %v1168_v41 = vpop.permute.xlu0 %1167 }
 0x1e7   : > { %vm1255_vm14 = vcmp.eq.s32.totalorder %v1171_v40, %v5587_v44  ;;  %vm1254_vm15 = vcmp.eq.s32.totalorder %v1168_v41, %v5587_v44  ;;  %850 = vperm.xlu1 %5112, %v679_v37   ;;  %847 = vperm.xlu0 %5111, %v678_v38  }
 0x1e8   : > { %v4094_v42 = vsel %vm1255_vm14, 1.0, %v5380_v51  ;;  %v4093_v43 = vsel %vm1254_vm15, 1.0, %v5380_v51 }
 0x1e9   : > { %v1580_v47 = vpack.c.bf16 %v4094_v42, %v4093_v43  ;;  %4713 = vmatmul.mubr.msk.bf16.gmra.mrb[48].mxu0 %vm6769_vm10, %v1579_v39 }
 0x1ea   : > { %v1177_v48 = vpop.permute.xlu1 %1176  ;;  %v1174_v49 = vpop.permute.xlu0 %1173 }
 0x1eb   : > { %vm1257_vm0 = vcmp.eq.s32.totalorder %v1177_v48, %v5587_v44  ;;  %vm1256_vm1 = vcmp.eq.s32.totalorder %v1174_v49, %v5587_v44  ;;  %856 = vperm.xlu1 %5112, %v681_v45   ;;  %853 = vperm.xlu0 %5111, %v680_v46  }
 0x1ec   : > { %v4096_v50 = vsel %vm1257_vm0, 1.0, %v5380_v51  ;;  %v4095_v52 = vsel %vm1256_vm1, 1.0, %v5380_v51  ;;  %4716 = vmatprep.mubr.msk.bf16.mxu0 %vm6769_vm10, %v1580_v47  ;;  %v6795_v47 = vmov 0 }
 0x1ed   : > { %v1581_v55 = vpack.c.bf16 %v4096_v50, %v4095_v52 }
 0x1ee   : > { %v1183_v56 = vpop.permute.xlu1 %1182  ;;  %v1180_v57 = vpop.permute.xlu0 %1179 }
 0x1ef   : > { %vm1259_vm2 = vcmp.eq.s32.totalorder %v1183_v56, %v5587_v44  ;;  %vm1258_vm3 = vcmp.eq.s32.totalorder %v1180_v57, %v5587_v44  ;;  %862 = vperm.xlu1 %5112, %v683_v53   ;;  %859 = vperm.xlu0 %5111, %v682_v54   ;;  %v6797_v54 = vmov 0 }
 0x1f0   : > { %v4098_v58 = vsel %vm1259_vm2, 1.0, %v5380_v51  ;;  %v4097_v59 = vsel %vm1258_vm3, 1.0, %v5380_v51 }
 0x1f1   : > { %v1582_v62 = vpack.c.bf16 %v4098_v58, %v4097_v59  ;;  %4717 = vmatmul.mubr.msk.bf16.gmra.mrb[52].mxu0 %vm6769_vm10, %v1581_v55 }
 0x1f2   : > { %v1189_v63 = vpop.permute.xlu1 %1188  ;;  %v1186_v0 = vpop.permute.xlu0 %1185 }
 0x1f3   : > { %vm1261_vm4 = vcmp.eq.s32.totalorder %v1189_v63, %v5587_v44  ;;  %vm1260_vm5 = vcmp.eq.s32.totalorder %v1186_v0, %v5587_v44  ;;  %868 = vperm.xlu1 %5112, %v685_v60   ;;  %865 = vperm.xlu0 %5111, %v684_v61   ;;  %v6799_v60 = vmov 0 }
 0x1f4   : > { %v4100_v1 = vsel %vm1261_vm4, 1.0, %v5380_v51  ;;  %v4099_v2 = vsel %vm1260_vm5, 1.0, %v5380_v51  ;;  %4720 = vmatprep.mubr.msk.bf16.mxu0 %vm6769_vm10, %v1582_v62 }
 0x1f5   : > { %v1583_v5 = vpack.c.bf16 %v4100_v1, %v4099_v2  ;;  %v6801_v2 = vmov 0 }
 0x1f6   : > { %v1195_v6 = vpop.permute.xlu1 %1194  ;;  %v1192_v7 = vpop.permute.xlu0 %1191 }
 0x1f7   : > { %vm1263_vm6 = vcmp.eq.s32.totalorder %v1195_v6, %v5587_v44  ;;  %vm1262_vm7 = vcmp.eq.s32.totalorder %v1192_v7, %v5587_v44  ;;  %874 = vperm.xlu1 %5112, %v687_v3   ;;  %871 = vperm.xlu0 %5111, %v686_v4  }
 0x1f8   : > { %v4102_v8 = vsel %vm1263_vm6, 1.0, %v5380_v51  ;;  %v4101_v30 = vsel %vm1262_vm7, 1.0, %v5380_v51 }
 0x1f9   : > { %v1584_v11 = vpack.c.bf16 %v4102_v8, %v4101_v30  ;;  %4721 = vmatmul.mubr.msk.bf16.gmra.mrb[56].mxu0 %vm6769_vm10, %v1583_v5 }
 0x1fa   : > { %v1201_v12 = vpop.permute.xlu1 %1200  ;;  %v1198_v13 = vpop.permute.xlu0 %1197 }
 0x1fb   : > { %vm1265_vm8 = vcmp.eq.s32.totalorder %v1201_v12, %v5587_v44  ;;  %vm1264_vm9 = vcmp.eq.s32.totalorder %v1198_v13, %v5587_v44  ;;  %880 = vperm.xlu1 %5112, %v689_v9   ;;  %877 = vperm.xlu0 %5111, %v688_v10  }
 0x1fc   : > { %v4104_v14 = vsel %vm1265_vm8, 1.0, %v5380_v51  ;;  %v4103_v15 = vsel %vm1264_vm9, 1.0, %v5380_v51  ;;  %4724 = vmatprep.mubr.msk.bf16.mxu0 %vm6769_vm10, %v1584_v11 }
 0x1fd   : > { %v1585_v31 = vpack.c.bf16 %v4104_v14, %v4103_v15 }
 0x1fe   : > { %v695_v16 = vpop.permute.xlu1 %694  ;;  %v692_v17 = vpop.permute.xlu0 %691 }
 0x1ff   : > { %vm883_vm11 = vcmp.eq.s32.totalorder %v695_v16, %v5587_v44  ;;  %vm882_vm12 = vcmp.eq.s32.totalorder %v692_v17, %v5587_v44 }
 0x200   : > { %v3978_v18 = vsel %vm883_vm11, 1.0, %v5380_v51  ;;  %v3977_v19 = vsel %vm882_vm12, 1.0, %v5380_v51  ;;  %vm5819_vm13 = vmpackc.low %vm883_vm11, %vm882_vm12 }
 0x201   : > { %v1394_v21 = vpack.c.bf16 %v3978_v18, %v3977_v19  ;;  %4725 = vmatmul.mubr.msk.bf16.gmra.mrb[60].mxu0 %vm6769_vm10, %v1585_v31 }
 0x202   : > { %v701_v22 = vpop.permute.xlu1 %700  ;;  %v698_v23 = vpop.permute.xlu0 %697 }
 0x203   : > { %vm885_vm14 = vcmp.eq.s32.totalorder %v701_v22, %v5587_v44  ;;  %vm884_vm15 = vcmp.eq.s32.totalorder %v698_v23, %v5587_v44  ;;  %4734 = vmatprep.mubr.msk.bf16.mxu0 %vm6769_vm10, %v1394_v21 }
 0x204   : > { %v3980_v32 = vsel %vm885_vm14, 1.0, %v5380_v51  ;;  %v3979_v24 = vsel %vm884_vm15, 1.0, %v5380_v51  ;;  %vm5829_vm0 = vmpackc.low %vm885_vm14, %vm884_vm15 }
 0x205   : > { %v1395_v26 = vpack.c.bf16 %v3980_v32, %v3979_v24 }
 0x206   : > { %v707_v27 = vpop.permute.xlu1 %706  ;;  %v704_v28 = vpop.permute.xlu0 %703 }
 0x207   : > { %vm887_vm1 = vcmp.eq.s32.totalorder %v707_v27, %v5587_v44  ;;  %vm886_vm2 = vcmp.eq.s32.totalorder %v704_v28, %v5587_v44 }
 0x208   : > { %v3982_v29 = vsel %vm887_vm1, 1.0, %v5380_v51  ;;  %v3981_v33 = vsel %vm886_vm2, 1.0, %v5380_v51  ;;  %vm5837_vm3 = vmpackc.low %vm887_vm1, %vm886_vm2 }
 0x209   : > { %v1396_v35 = vpack.c.bf16 %v3982_v29, %v3981_v33  ;;  %4735 = vmatmul.mubr.msk.bf16.vlgmr.msra.gmra.mrb[0].mxu0 %vm6769_vm10, %v1395_v26 }
 0x20a   : > { %v713_v36 = vpop.permute.xlu1 %712  ;;  %v710_v37 = vpop.permute.xlu0 %709 }
 0x20b   : > { %vm889_vm4 = vcmp.eq.s32.totalorder %v713_v36, %v5587_v44  ;;  %vm888_vm5 = vcmp.eq.s32.totalorder %v710_v37, %v5587_v44  ;;  %4738 = vmatprep.mubr.msk.bf16.mxu0 %vm6769_vm10, %v1396_v35  ;;  %v6811_v35 = vmov 0 }
 0x20c   : > { %v3984_v38 = vsel %vm889_vm4, 1.0, %v5380_v51  ;;  %v3983_v39 = vsel %vm888_vm5, 1.0, %v5380_v51  ;;  %vm5847_vm6 = vmpackc.low %vm889_vm4, %vm888_vm5 }
 0x20d   : > { %v1397_v41 = vpack.c.bf16 %v3984_v38, %v3983_v39 }
 0x20e   : > { %v719_v42 = vpop.permute.xlu1 %718  ;;  %v716_v43 = vpop.permute.xlu0 %715 }
 0x20f   : > { %vm891_vm7 = vcmp.eq.s32.totalorder %v719_v42, %v5587_v44  ;;  %vm890_vm8 = vcmp.eq.s32.totalorder %v716_v43, %v5587_v44  ;;  %v6815_v42 = vmov 0 }
 0x210   : > { %v3986_v45 = vsel %vm891_vm7, 1.0, %v5380_v51  ;;  %v3985_v46 = vsel %vm890_vm8, 1.0, %v5380_v51  ;;  %vm5855_vm9 = vmpackc.low %vm891_vm7, %vm890_vm8 }
 0x211   : > { %v6796_v47 = vsel %vm5855_vm9, 4294967295, %v6795_v47  ;;  %v1398_v48 = vpack.c.bf16 %v3986_v45, %v3985_v46  ;;  %4739 = vmatmul.mubr.msk.bf16.gmra.mrb[4].mxu0 %vm6769_vm10, %v1397_v41 }
 0x212   : > { %v725_v49 = vpop.permute.xlu1 %724  ;;  %v722_v50 = vpop.permute.xlu0 %721 }
 0x213   : > { %vm893_vm11 = vcmp.eq.s32.totalorder %v725_v49, %v5587_v44  ;;  %vm892_vm12 = vcmp.eq.s32.totalorder %v722_v50, %v5587_v44  ;;  %4742 = vmatprep.mubr.msk.bf16.mxu0 %vm6769_vm10, %v1398_v48  ;;  %v6817_v50 = vmov 0 }
 0x214   : > { %v3988_v52 = vsel %vm893_vm11, 1.0, %v5380_v51  ;;  %v3987_v53 = vsel %vm892_vm12, 1.0, %v5380_v51  ;;  %vm5865_vm14 = vmpackc.low %vm893_vm11, %vm892_vm12 }
 0x215   : > { %v6798_v54 = vsel %vm5865_vm14, 4294967295, %v6797_v54  ;;  %v1399_v55 = vpack.c.bf16 %v3988_v52, %v3987_v53 }
 0x216   : > { %v731_v56 = vpop.permute.xlu1 %730  ;;  %v728_v57 = vpop.permute.xlu0 %727 }
 0x217   : > { %vm895_vm15 = vcmp.eq.s32.totalorder %v731_v56, %v5587_v44  ;;  %vm894_vm1 = vcmp.eq.s32.totalorder %v728_v57, %v5587_v44 }
 0x218   : > { %v3990_v58 = vsel %vm895_vm15, 1.0, %v5380_v51  ;;  %v3989_v59 = vsel %vm894_vm1, 1.0, %v5380_v51  ;;  %vm5873_vm2 = vmpackc.low %vm895_vm15, %vm894_vm1 }
 0x219   : > { %v6800_v60 = vsel %vm5873_vm2, 4294967295, %v6799_v60  ;;  %v1400_v61 = vpack.c.bf16 %v3990_v58, %v3989_v59  ;;  %4743 = vmatmul.mubr.msk.bf16.gmra.mrb[8].mxu0 %vm6769_vm10, %v1399_v55  ;;  %v6821_v58 = vmov 0 }
 0x21a   : > { %v737_v62 = vpop.permute.xlu1 %736  ;;  %v734_v63 = vpop.permute.xlu0 %733 }
 0x21b   : > { %vm897_vm4 = vcmp.eq.s32.totalorder %v737_v62, %v5587_v44  ;;  %vm896_vm5 = vcmp.eq.s32.totalorder %v734_v63, %v5587_v44  ;;  %4746 = vmatprep.mubr.msk.bf16.mxu0 %vm6769_vm10, %v1400_v61 }
 0x21c   : > { %v3992_v0 = vsel %vm897_vm4, 1.0, %v5380_v51  ;;  %v3991_v1 = vsel %vm896_vm5, 1.0, %v5380_v51  ;;  %vm5883_vm7 = vmpackc.low %vm897_vm4, %vm896_vm5 }
 0x21d   : > { %v6802_v2 = vsel %vm5883_vm7, 4294967295, %v6801_v2  ;;  %v1401_v3 = vpack.c.bf16 %v3992_v0, %v3991_v1 }
 0x21e   : > { %v743_v4 = vpop.permute.xlu1 %742  ;;  %v740_v5 = vpop.permute.xlu0 %739 }
 0x21f   : > { %vm899_vm8 = vcmp.eq.s32.totalorder %v743_v4, %v5587_v44  ;;  %vm898_vm11 = vcmp.eq.s32.totalorder %v740_v5, %v5587_v44 }
 0x220   : > { %v3994_v6 = vsel %vm899_vm8, 1.0, %v5380_v51  ;;  %v3993_v7 = vsel %vm898_vm11, 1.0, %v5380_v51  ;;  %vm5891_vm12 = vmpackc.low %vm899_vm8, %vm898_vm11 }
 0x221   : > { %v1402_v30 = vpack.c.bf16 %v3994_v6, %v3993_v7  ;;  %4747 = vmatmul.mubr.msk.bf16.gmra.mrb[12].mxu0 %vm6769_vm10, %v1401_v3 }
 0x222   : > { %v749_v9 = vpop.permute.xlu1 %748  ;;  %v746_v10 = vpop.permute.xlu0 %745 }
 0x223   : > { %vm901_vm15 = vcmp.eq.s32.totalorder %v749_v9, %v5587_v44  ;;  %vm900_vm1 = vcmp.eq.s32.totalorder %v746_v10, %v5587_v44  ;;  %4750 = vmatprep.mubr.msk.bf16.mxu0 %vm6769_vm10, %v1402_v30 }
 0x224   : > { %v3996_v11 = vsel %vm901_vm15, 1.0, %v5380_v51  ;;  %v3995_v12 = vsel %vm900_vm1, 1.0, %v5380_v51  ;;  %vm5901_vm4 = vmpackc.low %vm901_vm15, %vm900_vm1 }
 0x225   : > { %v1403_v14 = vpack.c.bf16 %v3996_v11, %v3995_v12 }
 0x226   : > { %v755_v15 = vpop.permute.xlu1 %754  ;;  %v752_v31 = vpop.permute.xlu0 %751 }
 0x227   : > { %vm903_vm5 = vcmp.eq.s32.totalorder %v755_v15, %v5587_v44  ;;  %vm902_vm8 = vcmp.eq.s32.totalorder %v752_v31, %v5587_v44 }
 0x228   : > { %v3998_v16 = vsel %vm903_vm5, 1.0, %v5380_v51  ;;  %v3997_v17 = vsel %vm902_vm8, 1.0, %v5380_v51  ;;  %vm5909_vm11 = vmpackc.low %vm903_vm5, %vm902_vm8 }
 0x229   : > { %v1404_v19 = vpack.c.bf16 %v3998_v16, %v3997_v17  ;;  %4751 = vmatmul.mubr.msk.bf16.gmra.mrb[16].mxu0 %vm6769_vm10, %v1403_v14 }
 0x22a   : > { %v761_v21 = vpop.permute.xlu1 %760  ;;  %v758_v22 = vpop.permute.xlu0 %757 }
 0x22b   : > { %vm905_vm15 = vcmp.eq.s32.totalorder %v761_v21, %v5587_v44  ;;  %vm904_vm1 = vcmp.eq.s32.totalorder %v758_v22, %v5587_v44  ;;  %4754 = vmatprep.mubr.msk.bf16.mxu0 %vm6769_vm10, %v1404_v19 }
 0x22c   : > { %v4000_v23 = vsel %vm905_vm15, 1.0, %v5380_v51  ;;  %v3999_v32 = vsel %vm904_vm1, 1.0, %v5380_v51  ;;  %vm5919_vm7 = vmpackc.low %vm905_vm15, %vm904_vm1  ;;  %vm6813_vm15 = vcmask 392192  }
 0x22d   : > { %v1405_v26 = vpack.c.bf16 %v4000_v23, %v3999_v32  ;;  %vm6814_vm14 = vmmov %vm6813_vm15 }
 0x22e   : > { %v767_v27 = vpop.permute.xlu1 %766  ;;  %v764_v28 = vpop.permute.xlu0 %763 }
 0x22f   : > { %vm907_vm5 = vcmp.eq.s32.totalorder %v767_v27, %v5587_v44  ;;  %vm906_vm8 = vcmp.eq.s32.totalorder %v764_v28, %v5587_v44 }
 0x230   : > { %v4002_v29 = vsel %vm907_vm5, 1.0, %v5380_v51  ;;  %v4001_v33 = vsel %vm906_vm8, 1.0, %v5380_v51  ;;  %vm5927_vm10 = vmpackc.low %vm907_vm5, %vm906_vm8 }
 0x231   : > { %v6812_v35 = vsel %vm5927_vm10, 4294967295, %v6811_v35  ;;  %v1406_v36 = vpack.c.bf16 %v4002_v29, %v4001_v33  ;;  %4755 = vmatmul.mubr.msk.bf16.gmra.mrb[20].mxu0 %vm6813_vm15, %v1405_v26 }
 0x232   : > { %v773_v37 = vpop.permute.xlu1 %772  ;;  %v770_v38 = vpop.permute.xlu0 %769 }
 0x233   : > { %vm909_vm1 = vcmp.eq.s32.totalorder %v773_v37, %v5587_v44  ;;  %vm908_vm2 = vcmp.eq.s32.totalorder %v770_v38, %v5587_v44  ;;  %4758 = vmatprep.mubr.msk.bf16.mxu0 %vm6814_vm14, %v1406_v36 }
 0x234   : > { %v4004_v39 = vsel %vm909_vm1, 1.0, %v5380_v51  ;;  %v4003_v41 = vsel %vm908_vm2, 1.0, %v5380_v51  ;;  %vm5937_vm9 = vmpackc.low %vm909_vm1, %vm908_vm2 }
 0x235   : > { %v6816_v42 = vsel %vm5937_vm9, 4294967295, %v6815_v42  ;;  %v1407_v43 = vpack.c.bf16 %v4004_v39, %v4003_v41  ;;  %vm6819_vm2 = vmmov %vm6813_vm15 }
 0x236   : > { %v779_v45 = vpop.permute.xlu1 %778  ;;  %v776_v46 = vpop.permute.xlu0 %775  ;;  %vm6820_vm9 = vmmov %vm6819_vm2 }
 0x237   : > { %vm911_vm5 = vcmp.eq.s32.totalorder %v779_v45, %v5587_v44  ;;  %vm910_vm8 = vcmp.eq.s32.totalorder %v776_v46, %v5587_v44 }
 0x238   : > { %v4006_v48 = vsel %vm911_vm5, 1.0, %v5380_v51  ;;  %v4005_v49 = vsel %vm910_vm8, 1.0, %v5380_v51  ;;  %vm5945_vm14 = vmpackc.low %vm911_vm5, %vm910_vm8 }
 0x239   : > { %v6818_v50 = vsel %vm5945_vm14, 4294967295, %v6817_v50  ;;  %v1408_v52 = vpack.c.bf16 %v4006_v48, %v4005_v49  ;;  %4759 = vmatmul.mubr.msk.bf16.gmra.mrb[24].mxu0 %vm6819_vm2, %v1407_v43 }
 0x23a   : > { %v785_v53 = vpop.permute.xlu1 %784  ;;  %v782_v55 = vpop.permute.xlu0 %781 }
 0x23b   : > { %vm913_vm15 = vcmp.eq.s32.totalorder %v785_v53, %v5587_v44  ;;  %vm912_vm1 = vcmp.eq.s32.totalorder %v782_v55, %v5587_v44  ;;  %4762 = vmatprep.mubr.msk.bf16.mxu0 %vm6820_vm9, %v1408_v52  ;;  %vm6823_vm9 = vmmov %vm6819_vm2 }
 0x23c   : > { %v4008_v56 = vsel %vm913_vm15, 1.0, %v5380_v51  ;;  %v4007_v57 = vsel %vm912_vm1, 1.0, %v5380_v51  ;;  %vm5955_vm10 = vmpackc.low %vm913_vm15, %vm912_vm1 }
 0x23d   : > { %v6822_v58 = vsel %vm5955_vm10, 4294967295, %v6821_v58  ;;  %v1409_v59 = vpack.c.bf16 %v4008_v56, %v4007_v57  ;;  %vm6824_vm1 = vmmov %vm6823_vm9 }
 0x23e   : > { %v5959_v61 = vpop.permute.xlu1 %790  ;;  %v5961_v62 = vpop.permute.xlu0 %787 }
 0x23f   : > { %vm6772_vm5 = vcmp.eq.s32.totalorder %v5959_v61, %v5587_v44  ;;  %vm6773_vm8 = vcmp.eq.s32.totalorder %v5961_v62, %v5587_v44 }
 0x240   : > { %v4010_v63 = vsel %vm6772_vm5, 1.0, %v5380_v51  ;;  %v4009_v0 = vsel %vm6773_vm8, 1.0, %v5380_v51 }
 0x241   : > { %v1410_v1 = vpack.c.bf16 %v4010_v63, %v4009_v0  ;;  %4763 = vmatmul.mubr.msk.bf16.gmra.mrb[28].mxu0 %vm6823_vm9, %v1409_v59  ;;  %v5381_v59 = vmov 1.0|1.0   ;;  %v2492_v63 = vld [vmem:[%s6764_s6] sm:$0xff]  ;;  %v2493_v0 = vld [vmem:[%s6764_s6 + $0x8] sm:$0xff] }
 0x242   : > { %v5976_v3 = vpop.permute.xlu1 %796  ;;  %v5978_v4 = vpop.permute.xlu0 %793 }
 0x243   : > { %vm6770_vm2 = vcmp.eq.s32.totalorder %v5976_v3, %v5587_v44  ;;  %vm6771_vm15 = vcmp.eq.s32.totalorder %v5978_v4, %v5587_v44  ;;  %4766 = vmatprep.mubr.msk.bf16.mxu0 %vm6824_vm1, %v1410_v1 }
 0x244   : > { %v4012_v5 = vsel %vm6770_vm2, 1.0, %v5380_v51  ;;  %v4011_v6 = vsel %vm6771_vm15, 1.0, %v5380_v51  ;;  %vm6825_vm2 = vcmask 392192  }
 0x245   : > { %v1411_v7 = vpack.c.bf16 %v4012_v5, %v4011_v6  ;;  %vm6826_vm8 = vmmov %vm6825_vm2 }
 0x246   : > { %v5993_v30 = vpop.permute.xlu1 %802  ;;  %v5995_v9 = vpop.permute.xlu0 %799 }
 0x247   : > { %vm6776_vm9 = vcmp.eq.s32.totalorder %v5993_v30, %v5587_v44  ;;  %vm6777_vm1 = vcmp.eq.s32.totalorder %v5995_v9, %v5587_v44 }
 0x248   : > { %v4014_v10 = vsel %vm6776_vm9, 1.0, %v5380_v51  ;;  %v4013_v11 = vsel %vm6777_vm1, 1.0, %v5380_v51 }
 0x249   : > { %v1412_v12 = vpack.c.bf16 %v4014_v10, %v4013_v11  ;;  %4767 = vmatmul.mubr.msk.bf16.gmra.mrb[32].mxu0 %vm6825_vm2, %v1411_v7  ;;  %v2494_v10 = vld [vmem:[%s6764_s6 + $0x10] sm:$0xff]  ;;  %v2495_v11 = vld [vmem:[%s6764_s6 + $0x18] sm:$0xff] }
 0x24a   : > { %v6010_v14 = vpop.permute.xlu1 %808  ;;  %v6012_v15 = vpop.permute.xlu0 %805 }
 0x24b   : > { %vm6774_vm15 = vcmp.eq.s32.totalorder %v6010_v14, %v5587_v44  ;;  %vm6775_vm5 = vcmp.eq.s32.totalorder %v6012_v15, %v5587_v44  ;;  %4770 = vmatprep.mubr.msk.bf16.mxu0 %vm6826_vm8, %v1412_v12 }
 0x24c   : > { %v4016_v31 = vsel %vm6774_vm15, 1.0, %v5380_v51  ;;  %v4015_v16 = vsel %vm6775_vm5, 1.0, %v5380_v51  ;;  %vm6827_vm15 = vcmask 392192  }
 0x24d   : > { %v1413_v17 = vpack.c.bf16 %v4016_v31, %v4015_v16  ;;  %vm6828_vm1 = vmmov %vm6827_vm15 }
 0x24e   : > { %v6027_v19 = vpop.permute.xlu1 %814  ;;  %v6029_v21 = vpop.permute.xlu0 %811 }
 0x24f   : > { %vm6780_vm2 = vcmp.eq.s32.totalorder %v6027_v19, %v5587_v44  ;;  %vm6781_vm8 = vcmp.eq.s32.totalorder %v6029_v21, %v5587_v44  ;;  %vm6843_vm14 = vcmp.eq.s32.totalorder %v6029_v21, %v5587_v44 }
 0x250   : > { %v4018_v22 = vsel %vm6780_vm2, 1.0, %v5380_v51  ;;  %v4017_v23 = vsel %vm6781_vm8, 1.0, %v5380_v51 }
 0x251   : > { %v1414_v32 = vpack.c.bf16 %v4018_v22, %v4017_v23  ;;  %4771 = vmatmul.mubr.msk.bf16.gmra.mrb[36].mxu0 %vm6827_vm15, %v1413_v17  ;;  %v3145_v22 = vld [vmem:[%s6766_s8] sm:$0xff]  ;;  %v3146_v23 = vld [vmem:[%s6766_s8 + $0x8] sm:$0xff] }
 0x252   : > { %v6044_v26 = vpop.permute.xlu1 %820  ;;  %v6046_v27 = vpop.permute.xlu0 %817 }
 0x253   : > { %vm6778_vm5 = vcmp.eq.s32.totalorder %v6044_v26, %v5587_v44  ;;  %vm6779_vm9 = vcmp.eq.s32.totalorder %v6046_v27, %v5587_v44  ;;  %4774 = vmatprep.mubr.msk.bf16.mxu0 %vm6828_vm1, %v1414_v32 }
 0x254   : > { %v4020_v28 = vsel %vm6778_vm5, 1.0, %v5380_v51  ;;  %v4019_v29 = vsel %vm6779_vm9, 1.0, %v5380_v51  ;;  %vm6829_vm5 = vcmask 392192  }
 0x255   : > { %v1415_v33 = vpack.c.bf16 %v4020_v28, %v4019_v29  ;;  %vm6830_vm8 = vmmov %vm6829_vm5 }
 0x256   : > { %v6061_v36 = vpop.permute.xlu1 %826  ;;  %v6063_v37 = vpop.permute.xlu0 %823 }
 0x257   : > { %vm6782_vm15 = vcmp.eq.s32.totalorder %v6061_v36, %v5587_v44  ;;  %vm6784_vm1 = vcmp.eq.s32.totalorder %v6063_v37, %v5587_v44 }
 0x258   : > { %v4022_v38 = vsel %vm6782_vm15, 1.0, %v5380_v51  ;;  %v4021_v39 = vsel %vm6784_vm1, 1.0, %v5380_v51  ;;  %vm6832_vm1 = vcmp.eq.s32.totalorder %v5959_v61, %v5587_v44  ;;  %v5018_v61 = vpack.c.bf16 %v2493_v0, %v2492_v63  ;;  %v6224_v0 = vld [vmem:[%s6763_s5] ss:$0 sm:$0xff] }
 0x259   : > { %v1416_v41 = vpack.c.bf16 %v4022_v38, %v4021_v39  ;;  %4775 = vmatmul.mubr.msk.bf16.gmra.mrb[40].mxu0 %vm6829_vm5, %v1415_v33 }
 0x25a   : > { %v6078_v43 = vpop.permute.xlu1 %832  ;;  %v6080_v45 = vpop.permute.xlu0 %829  ;;  %5019 = vmatprep.subr.bf16.mxu1 %v5018_v61 }
 0x25b   : > { %vm6783_vm9 = vcmp.eq.s32.totalorder %v6078_v43, %v5587_v44  ;;  %vm6785_vm2 = vcmp.eq.s32.totalorder %v6080_v45, %v5587_v44  ;;  %4778 = vmatprep.mubr.msk.bf16.mxu0 %vm6830_vm8, %v1416_v41  ;;  %5021 = vmatpush3.bf16.msra.mxu1 %v5018_v61 }
 0x25c   : > { %v4024_v46 = vsel %vm6783_vm9, 1.0, %v5380_v51  ;;  %v4023_v48 = vsel %vm6785_vm2, 1.0, %v5380_v51  ;;  %vm6831_vm9 = vcmp.eq.s32.totalorder %v5961_v62, %v5587_v44  ;;  %vm6833_vm2 = vcmask 392192  }
 0x25d   : > { %v1417_v49 = vpack.c.bf16 %v4024_v46, %v4023_v48  ;;  %vm4332_vm10 = vmpackc.low %vm6832_vm1, %vm6831_vm9 }
 0x25e   : > { %v839_v52 = vpop.permute.xlu1 %838  ;;  %v836_v53 = vpop.permute.xlu0 %835 }
 0x25f   : > { %vm931_vm5 = vcmp.eq.s32.totalorder %v839_v52, %v5587_v44  ;;  %vm930_vm15 = vcmp.eq.s32.totalorder %v836_v53, %v5587_v44 }
 0x260   : > { %v4026_v55 = vsel %vm931_vm5, 1.0, %v5380_v51  ;;  %v4025_v56 = vsel %vm930_vm15, 1.0, %v5380_v51  ;;  %vm4348_vm8 = vmpackc.low %vm931_vm5, %vm930_vm15  ;;  %vm6834_vm15 = vcmask 392192   ;;  %vm6835_vm5 = vcmp.eq.s32.totalorder %v5978_v4, %v5587_v44 }
 0x261   : > { %v1418_v57 = vpack.c.bf16 %v4026_v55, %v4025_v56  ;;  %4779 = vmatmul.mubr.msk.bf16.gmra.mrb[44].mxu0 %vm6833_vm2, %v1417_v49  ;;  %4610 = vmatprep.subr.msk.bf16.mxu0 %vm4348_vm8, %v5381_v59  ;;  %vm6836_vm8 = vcmp.eq.s32.totalorder %v5976_v3, %v5587_v44  ;;  %v5022_v4 = vpack.c.bf16 %v2495_v11, %v2494_v10 }
 0x262   : > { %v845_v1 = vpop.permute.xlu1 %844  ;;  %v842_v62 = vpop.permute.xlu0 %841  ;;  %4611 = vmatpush3.bf16.msk.msra.mxu0 %vm4332_vm10, %v5381_v59  ;;  %vm4334_vm10 = vmpackc.low %vm6836_vm8, %vm6835_vm5  ;;  %vm6838_vm5 = vcmp.eq.s32.totalorder %v5993_v30, %v5587_v44  ;;  %v6152_v30 = vpack.c.bf16 %v3146_v23, %v3145_v22 }
 0x263   : > { %vm933_vm9 = vcmp.eq.s32.totalorder %v845_v1, %v5587_v44  ;;  %vm932_vm2 = vcmp.eq.s32.totalorder %v842_v62, %v5587_v44  ;;  %4782 = vmatprep.mubr.msk.bf16.mxu0 %vm6834_vm15, %v1418_v57  ;;  %5023 = vmatprep.subr.bf16.mxu1 %v5022_v4 }
 0x264   : > { %v4028_v5 = vsel %vm933_vm9, 1.0, %v5380_v51  ;;  %v4027_v6 = vsel %vm932_vm2, 1.0, %v5380_v51  ;;  %vm4350_vm1 = vmpackc.low %vm933_vm9, %vm932_vm2  ;;  %5025 = vmatpush3.bf16.msra.mxu1 %v5022_v4 }
 0x265   : > { %v1419_v7 = vpack.c.bf16 %v4028_v5, %v4027_v6  ;;  %4612 = vmatprep.subr.msk.bf16.mxu0 %vm4350_vm1, %v5381_v59  ;;  %vm6837_vm1 = vcmp.eq.s32.totalorder %v5995_v9, %v5587_v44  ;;  %5027 = vmatprep.subr.bf16.mxu1 %v6152_v30 }
 0x266   : > { %v851_v12 = vpop.permute.xlu1 %850  ;;  %v848_v31 = vpop.permute.xlu0 %847  ;;  %4613 = vmatpush3.bf16.msk.msra.mxu0 %vm4334_vm10, %v5381_v59  ;;  %vm4336_vm8 = vmpackc.low %vm6838_vm5, %vm6837_vm1  ;;  %vm6839_vm10 = vcmask 392192   ;;  %vm6841_vm5 = vcmp.eq.s32.totalorder %v6012_v15, %v5587_v44 }
 0x267   : > { %vm935_vm9 = vcmp.eq.s32.totalorder %v851_v12, %v5587_v44  ;;  %vm934_vm2 = vcmp.eq.s32.totalorder %v848_v31, %v5587_v44 }
 0x268   : > { %v4030_v3 = vsel %vm935_vm9, 1.0, %v5380_v51  ;;  %v4029_v16 = vsel %vm934_vm2, 1.0, %v5380_v51  ;;  %vm4352_vm15 = vmpackc.low %vm935_vm9, %vm934_vm2 }
 0x269   : > { %v1420_v17 = vpack.c.bf16 %v4030_v3, %v4029_v16  ;;  %4783 = vmatmul.mubr.msk.bf16.gmra.mrb[48].mxu0 %vm6839_vm10, %v1419_v7  ;;  %4614 = vmatprep.subr.msk.bf16.mxu0 %vm4352_vm15, %v5381_v59  ;;  %vm6840_vm15 = vmmov %vm6839_vm10  ;;  %v3147_v3 = vld [vmem:[%s6766_s8 + $0x10] sm:$0xff]  ;;  %v3148_v16 = vld [vmem:[%s6766_s8 + $0x18] sm:$0xff] }
 0x26a   : > { %v857_v32 = vpop.permute.xlu1 %856  ;;  %v854_v28 = vpop.permute.xlu0 %853  ;;  %4615 = vmatpush3.bf16.msk.msra.mxu0 %vm4336_vm8, %v5381_v59  ;;  %vm6842_vm8 = vcmp.eq.s32.totalorder %v6010_v14, %v5587_v44  ;;  %v5030_v23 = vpack.c.bf16 %v3148_v16, %v3147_v3 }
 0x26b   : > { %vm937_vm9 = vcmp.eq.s32.totalorder %v857_v32, %v5587_v44  ;;  %vm936_vm2 = vcmp.eq.s32.totalorder %v854_v28, %v5587_v44  ;;  %4786 = vmatprep.mubr.msk.bf16.mxu0 %vm6840_vm15, %v1420_v17  ;;  %vm4338_vm10 = vmpackc.low %vm6842_vm8, %vm6841_vm5  ;;  %vm6844_vm5 = vcmp.eq.s32.totalorder %v6027_v19, %v5587_v44  ;;  %vm6845_vm8 = vcmask 392192  }
 0x26c   : > { %v4032_v9 = vsel %vm937_vm9, 1.0, %v5380_v51  ;;  %v4031_v29 = vsel %vm936_vm2, 1.0, %v5380_v51  ;;  %vm4354_vm1 = vmpackc.low %vm937_vm9, %vm936_vm2 }
 0x26d   : > { %v1421_v33 = vpack.c.bf16 %v4032_v9, %v4031_v29  ;;  %4616 = vmatprep.subr.msk.bf16.mxu0 %vm4354_vm1, %v5381_v59  ;;  %vm4340_vm1 = vmpackc.low %vm6844_vm5, %vm6843_vm14  ;;  %vm6847_vm5 = vcmp.eq.s32.totalorder %v6046_v27, %v5587_v44 }
 0x26e   : > { %v863_v38 = vpop.permute.xlu1 %862  ;;  %v860_v39 = vpop.permute.xlu0 %859  ;;  %4617 = vmatpush3.bf16.msk.msra.mxu0 %vm4338_vm10, %v5381_v59 }
 0x26f   : > { %vm939_vm15 = vcmp.eq.s32.totalorder %v863_v38, %v5587_v44  ;;  %vm938_vm9 = vcmp.eq.s32.totalorder %v860_v39, %v5587_v44 }
 0x270   : > { %v4034_v41 = vsel %vm939_vm15, 1.0, %v5380_v51  ;;  %v4033_v46 = vsel %vm938_vm9, 1.0, %v5380_v51  ;;  %vm4356_vm2 = vmpackc.low %vm939_vm15, %vm938_vm9 }
 0x271   : > { %v1422_v14 = vpack.c.bf16 %v4034_v41, %v4033_v46  ;;  %4787 = vmatmul.mubr.msk.bf16.gmra.mrb[52].mxu0 %vm6845_vm8, %v1421_v33  ;;  %4618 = vmatprep.subr.msk.bf16.mxu0 %vm4356_vm2, %v5381_v59  ;;  %vm6846_vm9 = vmmov %vm6845_vm8  ;;  %vm6848_vm2 = vcmp.eq.s32.totalorder %v6044_v26, %v5587_v44 }
 0x272   : > { %v869_v15 = vpop.permute.xlu1 %868  ;;  %v866_v48 = vpop.permute.xlu0 %865  ;;  %4619 = vmatpush3.bf16.msk.msra.mxu0 %vm4340_vm1, %v5381_v59  ;;  %vm4342_vm8 = vmpackc.low %vm6848_vm2, %vm6847_vm5  ;;  %vm6850_vm5 = vcmp.eq.s32.totalorder %v6061_v36, %v5587_v44  ;;  %vm6851_vm2 = vcmask 392192  }
 0x273   : > { %vm941_vm10 = vcmp.eq.s32.totalorder %v869_v15, %v5587_v44  ;;  %vm940_vm15 = vcmp.eq.s32.totalorder %v866_v48, %v5587_v44  ;;  %4790 = vmatprep.mubr.msk.bf16.mxu0 %vm6846_vm9, %v1422_v14 }
 0x274   : > { %v4036_v21 = vsel %vm941_vm10, 1.0, %v5380_v51  ;;  %v4035_v19 = vsel %vm940_vm15, 1.0, %v5380_v51  ;;  %vm4358_vm14 = vmpackc.low %vm941_vm10, %vm940_vm15  ;;  %vm6849_vm15 = vcmp.eq.s32.totalorder %v6063_v37, %v5587_v44 }
 0x275   : > { %v1423_v49 = vpack.c.bf16 %v4036_v21, %v4035_v19  ;;  %4620 = vmatprep.subr.msk.bf16.mxu0 %vm4358_vm14, %v5381_v59  ;;  %vm4344_vm14 = vmpackc.low %vm6850_vm5, %vm6849_vm15  ;;  %vm6853_vm5 = vcmp.eq.s32.totalorder %v6080_v45, %v5587_v44 }
 0x276   : > { %v875_v52 = vpop.permute.xlu1 %874  ;;  %v872_v53 = vpop.permute.xlu0 %871  ;;  %4621 = vmatpush3.bf16.msk.msra.mxu0 %vm4342_vm8, %v5381_v59 }
 0x277   : > { %vm943_vm1 = vcmp.eq.s32.totalorder %v875_v52, %v5587_v44  ;;  %vm942_vm9 = vcmp.eq.s32.totalorder %v872_v53, %v5587_v44 }
 0x278   : > { %v4038_v55 = vsel %vm943_vm1, 1.0, %v5380_v51  ;;  %v4037_v56 = vsel %vm942_vm9, 1.0, %v5380_v51  ;;  %vm4360_vm10 = vmpackc.low %vm943_vm1, %vm942_vm9 }
 0x279   : > { %v1424_v26 = vpack.c.bf16 %v4038_v55, %v4037_v56  ;;  %4791 = vmatmul.mubr.msk.bf16.gmra.mrb[56].mxu0 %vm6851_vm2, %v1423_v49  ;;  %4622 = vmatprep.subr.msk.bf16.mxu0 %vm4360_vm10, %v5381_v59  ;;  %vm6852_vm9 = vmmov %vm6851_vm2  ;;  %vm6854_vm10 = vcmp.eq.s32.totalorder %v6078_v43, %v5587_v44 }
 0x27a   : > { %v881_v27 = vpop.permute.xlu1 %880  ;;  %v878_v57 = vpop.permute.xlu0 %877  ;;  %4623 = vmatpush3.bf16.msk.msra.mxu0 %vm4344_vm14, %v5381_v59  ;;  %vm4346_vm2 = vmpackc.low %vm6854_vm10, %vm6853_vm5 }
 0x27b   : > { %vm945_vm8 = vcmp.eq.s32.totalorder %v881_v27, %v5587_v44  ;;  %vm944_vm1 = vcmp.eq.s32.totalorder %v878_v57, %v5587_v44  ;;  %4794 = vmatprep.mubr.msk.bf16.mxu0 %vm6852_vm9, %v1424_v26  ;;  %vm6855_vm14 = vmmov %vm6852_vm9 }
 0x27c   : > { %v4040_v37 = vsel %vm945_vm8, 1.0, %v5380_v51  ;;  %v4039_v36 = vsel %vm944_vm1, 1.0, %v5380_v51  ;;  %vm4362_vm15 = vmpackc.low %vm945_vm8, %vm944_vm1  ;;  %vm2503_vm8 = vcmask 261120   ;;  %vm3911_vm1 = vcmask 386048  }
 0x27d   : > { %v1425_v63 = vpack.c.bf16 %v4040_v37, %v4039_v36  ;;  %4624 = vmatprep.subr.msk.bf16.mxu0 %vm4362_vm15, %v5381_v59 }
 0x27e   : > { %4625 = vmatpush3.bf16.msk.msra.mxu0 %vm4346_vm2, %v5381_v59 }
 0x281   : > { %4795 = vmatmul.mubr.msk.bf16.gmra.mrb[60].mxu0 %vm6855_vm14, %v1425_v63 }
 0x2dc   : > { %v4736_v51 = vpop.f32.mrb[0].mxu0 }
 0x2dd   : > { %v2102_v1 = vpop.f32.mrb[1].mxu0  ;;  %v2366_v44 = vadd.f32 %v4736_v51, %v6224_v0 }
 0x2de   : > { %v2364_v45 = vadd.f32 %v6224_v0, %v2102_v1  ;;  %v4737_v62 = vpop.f32.mrb[2].mxu0 }
 0x2df   : > { %v2105_v43 = vpop.f32.mrb[3].mxu0  ;;  %v2367_v5 = vadd.f32 %v4737_v62, %v6224_v0 }
 0x2e0   : > { %5113 = vtanh.f32 %v2364_v45  ;;  %v2365_v61 = vadd.f32 %v6224_v0, %v2105_v43 }
 0x2e2   : > { %5115 = vtanh.f32 %v2365_v61 }
 0x2e3   : > { %5117 = vtanh.f32 %v2366_v44 }
 0x2e4   : > { %v4740_v6 = vpop.f32.mrb[4].mxu0  ;;  %5119 = vtanh.f32 %v2367_v5 }
 0x2e5   : > { %v2118_v7 = vpop.f32.mrb[5].mxu0  ;;  %v2370_v12 = vadd.f32 %v4740_v6, %v6224_v0 }
 0x2e6   : > { %v2368_v10 = vadd.f32 %v6224_v0, %v2118_v7  ;;  %v4741_v11 = vpop.f32.mrb[6].mxu0 }
 0x2e7   : > { %v2121_v31 = vpop.f32.mrb[7].mxu0  ;;  %v2371_v22 = vadd.f32 %v4741_v11, %v6224_v0 }
 0x2e8   : > { %5121 = vtanh.f32 %v2368_v10  ;;  %v2369_v4 = vadd.f32 %v6224_v0, %v2121_v31 }
 0x2ea   : > { %v5114_v17 = vpop.eup %5113  ;;  %5123 = vtanh.f32 %v2369_v4 }
 0x2eb   : > { %5125 = vtanh.f32 %v2370_v12  ;;  %4806 = vmatprep.mubr.msk.f32.mxu1 %vm2503_vm8, %v5114_v17 }
 0x2ec   : > { %v5116_v32 = vpop.eup %5115  ;;  %v4744_v28 = vpop.f32.mrb[8].mxu0  ;;  %5127 = vtanh.f32 %v2371_v22 }
 0x2ed   : > { %v5118_v9 = vpop.eup %5117  ;;  %v2134_v29 = vpop.f32.mrb[9].mxu0  ;;  %4807 = vmatmul.mubr.msk.f32.vlgmr.msra.gmra.mrb[0].mxu1 %vm2503_vm8, %v5116_v32  ;;  %v2374_v39 = vadd.f32 %v4744_v28, %v6224_v0 }
 0x2ee   : > { %v2372_v33 = vadd.f32 %v6224_v0, %v2134_v29  ;;  %5029 = vmatpush3.bf16.msra.mxu1 %v6152_v30  ;;  %v4745_v38 = vpop.f32.mrb[10].mxu0  ;;  %4809 = vmatprep.mubr.msk.f32.mxu1 %vm2503_vm8, %v5118_v9  ;;  %v5120_v46 = vpop.eup %5119 }
 0x2ef   : > { %v2137_v41 = vpop.f32.mrb[11].mxu0  ;;  %5031 = vmatprep.subr.bf16.mxu1 %v5030_v23  ;;  %v2375_v48 = vadd.f32 %v4745_v38, %v6224_v0 }
 0x2f0   : > { %5129 = vtanh.f32 %v2372_v33  ;;  %v2373_v14 = vadd.f32 %v6224_v0, %v2137_v41 }
 0x2f1   : > { %4810 = vmatmul.mubr.msk.f32.gmra.mrb[2].mxu1 %vm2503_vm8, %v5120_v46 }
 0x2f2   : > { %v5122_v15 = vpop.eup %5121  ;;  %5131 = vtanh.f32 %v2373_v14  ;;  %5033 = vmatpush3.bf16.msra.mxu1 %v5030_v23 }
 0x2f3   : > { %5133 = vtanh.f32 %v2374_v39  ;;  %4588 = vmatprep.subr.msk.bf16.mxu1 %vm5891_vm12, %v5381_v59  ;;  %4812 = vmatprep.mubr.msk.f32.mxu1 %vm2503_vm8, %v5122_v15  ;;  %vm6861_vm12 = vnez %v6800_v60 }
 0x2f4   : > { %v5124_v30 = vpop.eup %5123  ;;  %v4748_v21 = vpop.f32.mrb[12].mxu0  ;;  %5135 = vtanh.f32 %v2375_v48 }
 0x2f5   : > { %v5126_v19 = vpop.eup %5125  ;;  %v2150_v49 = vpop.f32.mrb[13].mxu0  ;;  %4813 = vmatmul.mubr.msk.f32.gmra.mrb[4].mxu1 %vm2503_vm8, %v5124_v30  ;;  %v2378_v55 = vadd.f32 %v4748_v21, %v6224_v0 }
 0x2f6   : > { %v2376_v52 = vadd.f32 %v6224_v0, %v2150_v49  ;;  %v4749_v53 = vpop.f32.mrb[14].mxu0  ;;  %4815 = vmatprep.mubr.msk.f32.mxu1 %vm2503_vm8, %v5126_v19  ;;  %v5128_v26 = vpop.eup %5127 }
 0x2f7   : > { %v2153_v56 = vpop.f32.mrb[15].mxu0  ;;  %v2379_v57 = vadd.f32 %v4749_v53, %v6224_v0 }
 0x2f8   : > { %5137 = vtanh.f32 %v2376_v52  ;;  %v2377_v8 = vadd.f32 %v6224_v0, %v2153_v56 }
 0x2f9   : > { %4816 = vmatmul.mubr.msk.f32.gmra.mrb[6].mxu1 %vm2503_vm8, %v5128_v26 }
 0x2fa   : > { %v5130_v27 = vpop.eup %5129  ;;  %5139 = vtanh.f32 %v2377_v8 }
 0x2fb   : > { %5141 = vtanh.f32 %v2378_v55  ;;  %4818 = vmatprep.mubr.msk.f32.mxu1 %vm2503_vm8, %v5130_v27 }
 0x2fc   : > { %v5132_v37 = vpop.eup %5131  ;;  %v4752_v36 = vpop.f32.mrb[16].mxu0  ;;  %5143 = vtanh.f32 %v2379_v57 }
 0x2fd   : > { %v5134_v63 = vpop.eup %5133  ;;  %v2166_v51 = vpop.f32.mrb[17].mxu0  ;;  %4819 = vmatmul.mubr.msk.f32.gmra.mrb[8].mxu1 %vm2503_vm8, %v5132_v37  ;;  %v2382_v62 = vadd.f32 %v4752_v36, %v6224_v0 }
 0x2fe   : > { %v2380_v1 = vadd.f32 %v6224_v0, %v2166_v51  ;;  %v4753_v45 = vpop.f32.mrb[18].mxu0  ;;  %4821 = vmatprep.mubr.msk.f32.mxu1 %vm2503_vm8, %v5134_v63  ;;  %v5136_v43 = vpop.eup %5135 }
 0x2ff   : > { %v2169_v44 = vpop.f32.mrb[19].mxu0  ;;  %v2383_v6 = vadd.f32 %v4753_v45, %v6224_v0 }
 0x300   : > { %5145 = vtanh.f32 %v2380_v1  ;;  %v2381_v61 = vadd.f32 %v6224_v0, %v2169_v44 }
 0x301   : > { %4822 = vmatmul.mubr.msk.f32.gmra.mrb[10].mxu1 %vm2503_vm8, %v5136_v43 }
 0x302   : > { %v5138_v5 = vpop.eup %5137  ;;  %5147 = vtanh.f32 %v2381_v61 }
 0x303   : > { %5149 = vtanh.f32 %v2382_v62  ;;  %4824 = vmatprep.mubr.msk.f32.mxu1 %vm2503_vm8, %v5138_v5 }
 0x304   : > { %v5140_v7 = vpop.eup %5139  ;;  %v4756_v10 = vpop.f32.mrb[20].mxu0  ;;  %5151 = vtanh.f32 %v2383_v6 }
 0x305   : > { %v5142_v11 = vpop.eup %5141  ;;  %v2182_v12 = vpop.f32.mrb[21].mxu0  ;;  %4825 = vmatmul.mubr.msk.f32.gmra.mrb[12].mxu1 %vm2503_vm8, %v5140_v7  ;;  %v2386_v3 = vadd.f32 %v4756_v10, %v6224_v0 }
 0x306   : > { %v2384_v31 = vadd.f32 %v6224_v0, %v2182_v12  ;;  %v4757_v4 = vpop.f32.mrb[22].mxu0  ;;  %4827 = vmatprep.mubr.msk.f32.mxu1 %vm2503_vm8, %v5142_v11  ;;  %v5144_v17 = vpop.eup %5143 }
 0x307   : > { %v2185_v16 = vpop.f32.mrb[23].mxu0  ;;  %v2387_v32 = vadd.f32 %v4757_v4, %v6224_v0 }
 0x308   : > { %5153 = vtanh.f32 %v2384_v31  ;;  %v2385_v22 = vadd.f32 %v6224_v0, %v2185_v16 }
 0x309   : > { %4828 = vmatmul.mubr.msk.f32.gmra.mrb[14].mxu1 %vm2503_vm8, %v5144_v17 }
 0x30a   : > { %v5146_v23 = vpop.eup %5145  ;;  %5155 = vtanh.f32 %v2385_v22 }
 0x30b   : > { %5157 = vtanh.f32 %v2386_v3  ;;  %4830 = vmatprep.mubr.msk.f32.mxu1 %vm2503_vm8, %v5146_v23 }
 0x30c   : > { %v5148_v28 = vpop.eup %5147  ;;  %v4760_v9 = vpop.f32.mrb[24].mxu0  ;;  %5159 = vtanh.f32 %v2387_v32 }
 0x30d   : > { %v5150_v29 = vpop.eup %5149  ;;  %v2198_v33 = vpop.f32.mrb[25].mxu0  ;;  %4831 = vmatmul.mubr.msk.f32.gmra.mrb[16].mxu1 %vm2503_vm8, %v5148_v28  ;;  %v2390_v41 = vadd.f32 %v4760_v9, %v6224_v0 }
 0x30e   : > { %v2388_v38 = vadd.f32 %v6224_v0, %v2198_v33  ;;  %v4761_v39 = vpop.f32.mrb[26].mxu0  ;;  %4833 = vmatprep.mubr.msk.f32.mxu1 %vm2503_vm8, %v5150_v29  ;;  %v5152_v14 = vpop.eup %5151 }
 0x30f   : > { %v2201_v46 = vpop.f32.mrb[27].mxu0  ;;  %v2391_v30 = vadd.f32 %v4761_v39, %v6224_v0 }
 0x310   : > { %5161 = vtanh.f32 %v2388_v38  ;;  %v2389_v15 = vadd.f32 %v6224_v0, %v2201_v46 }
 0x311   : > { %4834 = vmatmul.mubr.msk.f32.gmra.mrb[18].mxu1 %vm2503_vm8, %v5152_v14 }
 0x312   : > { %v5154_v48 = vpop.eup %5153  ;;  %5163 = vtanh.f32 %v2389_v15 }
 0x313   : > { %5165 = vtanh.f32 %v2390_v41  ;;  %4836 = vmatprep.mubr.msk.f32.mxu1 %vm2503_vm8, %v5154_v48 }
 0x314   : > { %v5156_v21 = vpop.eup %5155  ;;  %v4764_v19 = vpop.f32.mrb[28].mxu0  ;;  %5167 = vtanh.f32 %v2391_v30 }
 0x315   : > { %v5158_v49 = vpop.eup %5157  ;;  %v2214_v52 = vpop.f32.mrb[29].mxu0  ;;  %4837 = vmatmul.mubr.msk.f32.gmra.mrb[20].mxu1 %vm2503_vm8, %v5156_v21  ;;  %v2394_v56 = vadd.f32 %v4764_v19, %v6224_v0 }
 0x316   : > { %v2392_v53 = vadd.f32 %v6224_v0, %v2214_v52  ;;  %v4765_v55 = vpop.f32.mrb[30].mxu0  ;;  %4839 = vmatprep.mubr.msk.f32.mxu1 %vm2503_vm8, %v5158_v49  ;;  %v5160_v8 = vpop.eup %5159 }
 0x317   : > { %v2217_v26 = vpop.f32.mrb[31].mxu0  ;;  %v2395_v37 = vadd.f32 %v4765_v55, %v6224_v0 }
 0x318   : > { %5169 = vtanh.f32 %v2392_v53  ;;  %v2393_v27 = vadd.f32 %v6224_v0, %v2217_v26 }
 0x319   : > { %4840 = vmatmul.mubr.msk.f32.gmra.mrb[22].mxu1 %vm2503_vm8, %v5160_v8 }
 0x31a   : > { %v5162_v57 = vpop.eup %5161  ;;  %5171 = vtanh.f32 %v2393_v27 }
 0x31b   : > { %5173 = vtanh.f32 %v2394_v56  ;;  %4842 = vmatprep.mubr.msk.f32.mxu1 %vm2503_vm8, %v5162_v57 }
 0x31c   : > { %v5164_v36 = vpop.eup %5163  ;;  %v4768_v63 = vpop.f32.mrb[32].mxu0  ;;  %5175 = vtanh.f32 %v2395_v37 }
 0x31d   : > { %v5166_v51 = vpop.eup %5165  ;;  %v2230_v1 = vpop.f32.mrb[33].mxu0  ;;  %4843 = vmatmul.mubr.msk.f32.gmra.mrb[24].mxu1 %vm2503_vm8, %v5164_v36  ;;  %v2398_v44 = vadd.f32 %v4768_v63, %v6224_v0 }
 0x31e   : > { %v2396_v45 = vadd.f32 %v6224_v0, %v2230_v1  ;;  %v4769_v62 = vpop.f32.mrb[34].mxu0  ;;  %4845 = vmatprep.mubr.msk.f32.mxu1 %vm2503_vm8, %v5166_v51  ;;  %v5168_v61 = vpop.eup %5167 }
 0x31f   : > { %v2233_v43 = vpop.f32.mrb[35].mxu0  ;;  %v2399_v7 = vadd.f32 %v4769_v62, %v6224_v0 }
 0x320   : > { %5177 = vtanh.f32 %v2396_v45  ;;  %v2397_v5 = vadd.f32 %v6224_v0, %v2233_v43 }
 0x321   : > { %4846 = vmatmul.mubr.msk.f32.gmra.mrb[26].mxu1 %vm2503_vm8, %v5168_v61 }
 0x322   : > { %v5170_v6 = vpop.eup %5169  ;;  %5179 = vtanh.f32 %v2397_v5 }
 0x323   : > { %5181 = vtanh.f32 %v2398_v44  ;;  %4848 = vmatprep.mubr.msk.f32.mxu1 %vm2503_vm8, %v5170_v6 }
 0x324   : > { %v5172_v10 = vpop.eup %5171  ;;  %v4772_v11 = vpop.f32.mrb[36].mxu0  ;;  %5183 = vtanh.f32 %v2399_v7 }
 0x325   : > { %v5174_v12 = vpop.eup %5173  ;;  %v2246_v31 = vpop.f32.mrb[37].mxu0  ;;  %4849 = vmatmul.mubr.msk.f32.gmra.mrb[28].mxu1 %vm2503_vm8, %v5172_v10  ;;  %v2402_v16 = vadd.f32 %v4772_v11, %v6224_v0 }
 0x326   : > { %v2400_v4 = vadd.f32 %v6224_v0, %v2246_v31  ;;  %v4773_v3 = vpop.f32.mrb[38].mxu0  ;;  %4851 = vmatprep.mubr.msk.f32.mxu1 %vm2503_vm8, %v5174_v12  ;;  %v5176_v22 = vpop.eup %5175 }
 0x327   : > { %v2249_v17 = vpop.f32.mrb[39].mxu0  ;;  %v2403_v28 = vadd.f32 %v4773_v3, %v6224_v0 }
 0x328   : > { %5185 = vtanh.f32 %v2400_v4  ;;  %v2401_v23 = vadd.f32 %v6224_v0, %v2249_v17 }
 0x329   : > { %4852 = vmatmul.mubr.msk.f32.gmra.mrb[30].mxu1 %vm2503_vm8, %v5176_v22 }
 0x32a   : > { %v5178_v32 = vpop.eup %5177  ;;  %5187 = vtanh.f32 %v2401_v23 }
 0x32b   : > { %5189 = vtanh.f32 %v2402_v16  ;;  %4854 = vmatprep.mubr.msk.f32.mxu1 %vm2503_vm8, %v5178_v32 }
 0x32c   : > { %v5180_v9 = vpop.eup %5179  ;;  %v4776_v29 = vpop.f32.mrb[40].mxu0  ;;  %5191 = vtanh.f32 %v2403_v28 }
 0x32d   : > { %v5182_v33 = vpop.eup %5181  ;;  %v2262_v38 = vpop.f32.mrb[41].mxu0  ;;  %4855 = vmatmul.mubr.msk.f32.gmra.mrb[32].mxu1 %vm2503_vm8, %v5180_v9  ;;  %v2406_v46 = vadd.f32 %v4776_v29, %v6224_v0 }
 0x32e   : > { %v2404_v39 = vadd.f32 %v6224_v0, %v2262_v38  ;;  %v4777_v41 = vpop.f32.mrb[42].mxu0  ;;  %4857 = vmatprep.mubr.msk.f32.mxu1 %vm2503_vm8, %v5182_v33  ;;  %v5184_v15 = vpop.eup %5183 }
 0x32f   : > { %v2265_v14 = vpop.f32.mrb[43].mxu0  ;;  %v2407_v21 = vadd.f32 %v4777_v41, %v6224_v0 }
 0x330   : > { %5193 = vtanh.f32 %v2404_v39  ;;  %v2405_v48 = vadd.f32 %v6224_v0, %v2265_v14 }
 0x331   : > { %4858 = vmatmul.mubr.msk.f32.gmra.mrb[34].mxu1 %vm2503_vm8, %v5184_v15 }
 0x332   : > { %v5186_v30 = vpop.eup %5185  ;;  %5195 = vtanh.f32 %v2405_v48 }
 0x333   : > { %5197 = vtanh.f32 %v2406_v46  ;;  %4860 = vmatprep.mubr.msk.f32.mxu1 %vm2503_vm8, %v5186_v30 }
 0x334   : > { %v5188_v19 = vpop.eup %5187  ;;  %v4780_v49 = vpop.f32.mrb[44].mxu0  ;;  %5199 = vtanh.f32 %v2407_v21 }
 0x335   : > { %v5190_v52 = vpop.eup %5189  ;;  %v2278_v53 = vpop.f32.mrb[45].mxu0  ;;  %4861 = vmatmul.mubr.msk.f32.gmra.mrb[36].mxu1 %vm2503_vm8, %v5188_v19  ;;  %v2410_v26 = vadd.f32 %v4780_v49, %v6224_v0 }
 0x336   : > { %v2408_v55 = vadd.f32 %v6224_v0, %v2278_v53  ;;  %v4781_v56 = vpop.f32.mrb[46].mxu0  ;;  %4863 = vmatprep.mubr.msk.f32.mxu1 %vm2503_vm8, %v5190_v52  ;;  %v5192_v27 = vpop.eup %5191 }
 0x337   : > { %v2281_v8 = vpop.f32.mrb[47].mxu0  ;;  %v2411_v36 = vadd.f32 %v4781_v56, %v6224_v0 }
 0x338   : > { %5201 = vtanh.f32 %v2408_v55  ;;  %v2409_v57 = vadd.f32 %v6224_v0, %v2281_v8 }
 0x339   : > { %4864 = vmatmul.mubr.msk.f32.gmra.mrb[38].mxu1 %vm2503_vm8, %v5192_v27 }
 0x33a   : > { %v5194_v37 = vpop.eup %5193  ;;  %5203 = vtanh.f32 %v2409_v57 }
 0x33b   : > { %5205 = vtanh.f32 %v2410_v26  ;;  %4866 = vmatprep.mubr.msk.f32.mxu1 %vm2503_vm8, %v5194_v37 }
 0x33c   : > { %v5196_v63 = vpop.eup %5195  ;;  %v4784_v51 = vpop.f32.mrb[48].mxu0  ;;  %5207 = vtanh.f32 %v2411_v36 }
 0x33d   : > { %v5198_v1 = vpop.eup %5197  ;;  %v2294_v45 = vpop.f32.mrb[49].mxu0  ;;  %4867 = vmatmul.mubr.msk.f32.gmra.mrb[40].mxu1 %vm2503_vm8, %v5196_v63  ;;  %v2414_v43 = vadd.f32 %v4784_v51, %v6224_v0 }
 0x33e   : > { %v2412_v62 = vadd.f32 %v6224_v0, %v2294_v45  ;;  %v4785_v44 = vpop.f32.mrb[50].mxu0  ;;  %4869 = vmatprep.mubr.msk.f32.mxu1 %vm2503_vm8, %v5198_v1  ;;  %v5200_v5 = vpop.eup %5199 }
 0x33f   : > { %v2297_v61 = vpop.f32.mrb[51].mxu0  ;;  %v2415_v10 = vadd.f32 %v4785_v44, %v6224_v0 }
 0x340   : > { %5209 = vtanh.f32 %v2412_v62  ;;  %v2413_v6 = vadd.f32 %v6224_v0, %v2297_v61  ;;  %v6367_v61 = vld [vmem:[%s6765_s7] ss:$0 sm:$0xff] }
 0x341   : > { %4870 = vmatmul.mubr.msk.f32.gmra.mrb[42].mxu1 %vm2503_vm8, %v5200_v5 }
 0x342   : > { %v5202_v7 = vpop.eup %5201  ;;  %5211 = vtanh.f32 %v2413_v6 }
 0x343   : > { %5213 = vtanh.f32 %v2414_v43  ;;  %4872 = vmatprep.mubr.msk.f32.mxu1 %vm2503_vm8, %v5202_v7 }
 0x344   : > { %v5204_v11 = vpop.eup %5203  ;;  %v4788_v12 = vpop.f32.mrb[52].mxu0  ;;  %5215 = vtanh.f32 %v2415_v10 }
 0x345   : > { %v5206_v31 = vpop.eup %5205  ;;  %v2310_v4 = vpop.f32.mrb[53].mxu0  ;;  %4873 = vmatmul.mubr.msk.f32.gmra.mrb[44].mxu1 %vm2503_vm8, %v5204_v11  ;;  %v2418_v17 = vadd.f32 %v4788_v12, %v6224_v0 }
 0x346   : > { %v2416_v3 = vadd.f32 %v6224_v0, %v2310_v4  ;;  %v4789_v16 = vpop.f32.mrb[54].mxu0  ;;  %4875 = vmatprep.mubr.msk.f32.mxu1 %vm2503_vm8, %v5206_v31  ;;  %v5208_v23 = vpop.eup %5207 }
 0x347   : > { %v2313_v22 = vpop.f32.mrb[55].mxu0  ;;  %v2419_v9 = vadd.f32 %v4789_v16, %v6224_v0 }
 0x348   : > { %5217 = vtanh.f32 %v2416_v3  ;;  %v2417_v32 = vadd.f32 %v6224_v0, %v2313_v22 }
 0x349   : > { %4876 = vmatmul.mubr.msk.f32.gmra.mrb[46].mxu1 %vm2503_vm8, %v5208_v23 }
 0x34a   : > { %v5210_v28 = vpop.eup %5209  ;;  %5219 = vtanh.f32 %v2417_v32 }
 0x34b   : > { %5221 = vtanh.f32 %v2418_v17  ;;  %4878 = vmatprep.mubr.msk.f32.mxu1 %vm2503_vm8, %v5210_v28 }
 0x34c   : > { %v5212_v29 = vpop.eup %5211  ;;  %v4792_v33 = vpop.f32.mrb[56].mxu0  ;;  %5223 = vtanh.f32 %v2419_v9 }
 0x34d   : > { %v5214_v38 = vpop.eup %5213  ;;  %v2326_v39 = vpop.f32.mrb[57].mxu0  ;;  %4879 = vmatmul.mubr.msk.f32.gmra.mrb[48].mxu1 %vm2503_vm8, %v5212_v29  ;;  %v2422_v14 = vadd.f32 %v4792_v33, %v6224_v0 }
 0x34e   : > { %v2420_v41 = vadd.f32 %v6224_v0, %v2326_v39  ;;  %v4793_v46 = vpop.f32.mrb[58].mxu0  ;;  %4881 = vmatprep.mubr.msk.f32.mxu1 %vm2503_vm8, %v5214_v38  ;;  %v5216_v48 = vpop.eup %5215 }
 0x34f   : > { %v2329_v15 = vpop.f32.mrb[59].mxu0  ;;  %v2423_v19 = vadd.f32 %v4793_v46, %v6224_v0 }
 0x350   : > { %5225 = vtanh.f32 %v2420_v41  ;;  %v2421_v30 = vadd.f32 %v6224_v0, %v2329_v15 }
 0x351   : > { %4882 = vmatmul.mubr.msk.f32.gmra.mrb[50].mxu1 %vm2503_vm8, %v5216_v48 }
 0x352   : > { %v5218_v21 = vpop.eup %5217  ;;  %5227 = vtanh.f32 %v2421_v30 }
 0x353   : > { %5229 = vtanh.f32 %v2422_v14  ;;  %4884 = vmatprep.mubr.msk.f32.mxu1 %vm2503_vm8, %v5218_v21 }
 0x354   : > { %v5220_v49 = vpop.eup %5219  ;;  %v4796_v52 = vpop.f32.mrb[60].mxu0  ;;  %5231 = vtanh.f32 %v2423_v19 }
 0x355   : > { %v5222_v53 = vpop.eup %5221  ;;  %v2342_v55 = vpop.f32.mrb[61].mxu0  ;;  %4885 = vmatmul.mubr.msk.f32.gmra.mrb[52].mxu1 %vm2503_vm8, %v5220_v49  ;;  %v2426_v8 = vadd.f32 %v4796_v52, %v6224_v0 }
 0x356   : > { %v2424_v56 = vadd.f32 %v6224_v0, %v2342_v55  ;;  %v4797_v26 = vpop.f32.mrb[62].mxu0  ;;  %4887 = vmatprep.mubr.msk.f32.mxu1 %vm2503_vm8, %v5222_v53  ;;  %v5224_v57 = vpop.eup %5223 }
 0x357   : > { %v2345_v27 = vpop.f32.mrb[63].mxu0  ;;  %v2427_v63 = vadd.f32 %v4797_v26, %v6224_v0 }
 0x358   : > { %5233 = vtanh.f32 %v2424_v56  ;;  %v2425_v37 = vadd.f32 %v6224_v0, %v2345_v27 }
 0x359   : > { %4888 = vmatmul.mubr.msk.f32.gmra.mrb[54].mxu1 %vm2503_vm8, %v5224_v57 }
 0x35a   : > { %v5226_v36 = vpop.eup %5225  ;;  %5235 = vtanh.f32 %v2425_v37 }
 0x35b   : > { %5237 = vtanh.f32 %v2426_v8  ;;  %4890 = vmatprep.mubr.msk.f32.mxu1 %vm2503_vm8, %v5226_v36 }
 0x35c   : > { %v5228_v51 = vpop.eup %5227  ;;  %5239 = vtanh.f32 %v2427_v63 }
 0x35d   : > { %v5230_v1 = vpop.eup %5229  ;;  %4891 = vmatmul.mubr.msk.f32.gmra.mrb[56].mxu1 %vm2503_vm8, %v5228_v51 }
 0x35e   : > { %4893 = vmatprep.mubr.msk.f32.mxu1 %vm2503_vm8, %v5230_v1  ;;  %v5232_v45 = vpop.eup %5231 }
 0x361   : > { %4894 = vmatmul.mubr.msk.f32.gmra.mrb[58].mxu1 %vm2503_vm8, %v5232_v45 }
 0x362   : > { %v5234_v62 = vpop.eup %5233 }
 0x363   : > { %4896 = vmatprep.mubr.msk.f32.mxu1 %vm2503_vm8, %v5234_v62 }
 0x364   : > { %v5236_v44 = vpop.eup %5235 }
 0x365   : > { %v5238_v43 = vpop.eup %5237  ;;  %4897 = vmatmul.mubr.msk.f32.gmra.mrb[60].mxu1 %vm2503_vm8, %v5236_v44 }
 0x366   : > { %4899 = vmatprep.mubr.msk.f32.mxu1 %vm2503_vm8, %v5238_v43  ;;  %v5240_v0 = vpop.eup %5239 }
 0x369   : > { %4900 = vmatmul.mubr.msk.f32.gmra.mrb[62].mxu1 %vm2503_vm8, %v5240_v0 }
 0x3c0   : > { %v4808_v5 = vpop.f32.mrb[0].mxu1 }
 0x3c1   : > { %v2768_v6 = vadd.f32 %v4808_v5, %v6367_v61  ;;  %v2762_v7 = vpop.f32.mrb[1].mxu1 }
 0x3c2   : > { %v2763_v10 = vadd.f32 %v6367_v61, %v2762_v7 }
 0x3c4   : > { %5241 = vtanh.f32 %v2763_v10  ;;  %v4811_v11 = vpop.f32.mrb[2].mxu1 }
 0x3c5   : > { %5243 = vtanh.f32 %v2768_v6  ;;  %v2778_v12 = vadd.f32 %v4811_v11, %v6367_v61  ;;  %v2772_v31 = vpop.f32.mrb[3].mxu1 }
 0x3c6   : > { %v2773_v4 = vadd.f32 %v6367_v61, %v2772_v31 }
 0x3c8   : > { %5245 = vtanh.f32 %v2773_v4  ;;  %v4814_v3 = vpop.f32.mrb[4].mxu1 }
 0x3c9   : > { %5247 = vtanh.f32 %v2778_v12  ;;  %v2788_v16 = vadd.f32 %v4814_v3, %v6367_v61  ;;  %v2782_v17 = vpop.f32.mrb[5].mxu1 }
 0x3ca   : > { %v2783_v22 = vadd.f32 %v6367_v61, %v2782_v17 }
 0x3cc   : > { %5249 = vtanh.f32 %v2783_v22  ;;  %v4817_v23 = vpop.f32.mrb[6].mxu1 }
 0x3cd   : > { %5251 = vtanh.f32 %v2788_v16  ;;  %v2798_v32 = vadd.f32 %v4817_v23, %v6367_v61  ;;  %v2792_v28 = vpop.f32.mrb[7].mxu1 }
 0x3ce   : > { %v5242_v9 = vpop.eup %5241  ;;  %v2793_v29 = vadd.f32 %v6367_v61, %v2792_v28 }
 0x3cf   : > { %v5244_v33 = vpop.eup %5243  ;;  %4910 = vmatprep.mubr.msk.f32.mxu1 %vm2503_vm8, %v5242_v9 }
 0x3d0   : > { %5253 = vtanh.f32 %v2793_v29  ;;  %v4820_v38 = vpop.f32.mrb[8].mxu1  ;;  %4911 = vmatmul.mubr.msk.f32.vlgmr.msra.gmra.mrb[64].mxu1 %vm2503_vm8, %v5244_v33 }
 0x3d1   : > { %5255 = vtanh.f32 %v2798_v32  ;;  %v2808_v39 = vadd.f32 %v4820_v38, %v6367_v61  ;;  %4589 = vmatpush3.bf16.msk.msra.mxu1 %vm5819_vm13, %v5381_v59  ;;  %v2802_v41 = vpop.f32.mrb[9].mxu1  ;;  %vm6856_vm13 = vnez %v6812_v35 }
 0x3d2   : > { %v5246_v46 = vpop.eup %5245  ;;  %v2803_v14 = vadd.f32 %v6367_v61, %v2802_v41  ;;  %4590 = vmatprep.subr.msk.bf16.mxu1 %vm5901_vm4, %v5381_v59  ;;  %vm6862_vm4 = vnez %v6822_v58 }
 0x3d3   : > { %v5248_v15 = vpop.eup %5247  ;;  %4913 = vmatprep.mubr.msk.f32.mxu1 %vm2503_vm8, %v5246_v46 }
 0x3d4   : > { %5257 = vtanh.f32 %v2803_v14  ;;  %v4823_v48 = vpop.f32.mrb[10].mxu1  ;;  %4914 = vmatmul.mubr.msk.f32.gmra.mrb[66].mxu1 %vm2503_vm8, %v5248_v15 }
 0x3d5   : > { %5259 = vtanh.f32 %v2808_v39  ;;  %v2818_v30 = vadd.f32 %v4823_v48, %v6367_v61  ;;  %4591 = vmatpush3.bf16.msk.msra.mxu1 %vm5829_vm0, %v5381_v59  ;;  %v2812_v20 = vpop.f32.mrb[11].mxu1  ;;  %vm6857_vm0 = vnez %v6796_v47 }
 0x3d6   : > { %v5250_v21 = vpop.eup %5249  ;;  %v2813_v19 = vadd.f32 %v6367_v61, %v2812_v20  ;;  %4592 = vmatprep.subr.msk.bf16.mxu1 %vm5909_vm11, %v5381_v59  ;;  %vm6863_vm11 = vnez %v6802_v2 }
 0x3d7   : > { %v5252_v13 = vpop.eup %5251  ;;  %4916 = vmatprep.mubr.msk.f32.mxu1 %vm2503_vm8, %v5250_v21 }
 0x3d8   : > { %5261 = vtanh.f32 %v2813_v19  ;;  %v4826_v49 = vpop.f32.mrb[12].mxu1  ;;  %4917 = vmatmul.mubr.msk.f32.gmra.mrb[68].mxu1 %vm2503_vm8, %v5252_v13 }
 0x3d9   : > { %5263 = vtanh.f32 %v2818_v30  ;;  %v2828_v52 = vadd.f32 %v4826_v49, %v6367_v61  ;;  %4593 = vmatpush3.bf16.msk.msra.mxu1 %vm5837_vm3, %v5381_v59  ;;  %v2822_v25 = vpop.f32.mrb[13].mxu1  ;;  %vm6858_vm3 = vnez %v6816_v42 }
 0x3da   : > { %v5254_v53 = vpop.eup %5253  ;;  %v2823_v55 = vadd.f32 %v6367_v61, %v2822_v25  ;;  %4594 = vmatprep.subr.msk.bf16.mxu1 %vm5919_vm7, %v5381_v59  ;;  %vm6860_vm7 = vnez %v6818_v50 }
 0x3db   : > { %v5256_v18 = vpop.eup %5255  ;;  %4919 = vmatprep.mubr.msk.f32.mxu1 %vm2503_vm8, %v5254_v53 }
 0x3dc   : > { %5265 = vtanh.f32 %v2823_v55  ;;  %v4829_v56 = vpop.f32.mrb[14].mxu1  ;;  %4920 = vmatmul.mubr.msk.f32.gmra.mrb[70].mxu1 %vm2503_vm8, %v5256_v18 }
 0x3dd   : > { %5267 = vtanh.f32 %v2828_v52  ;;  %v2838_v26 = vadd.f32 %v4829_v56, %v6367_v61  ;;  %4595 = vmatpush3.bf16.msk.msra.mxu1 %vm5847_vm6, %v5381_v59  ;;  %v2832_v34 = vpop.f32.mrb[15].mxu1  ;;  %vm6859_vm6 = vnez %v6798_v54 }
 0x3de   : > { %v5258_v8 = vpop.eup %5257  ;;  %v2833_v27 = vadd.f32 %v6367_v61, %v2832_v34  ;;  %4596 = vmatprep.subr.msk.bf16.mxu1 %vm6856_vm13, %v5381_v59 }
 0x3df   : > { %v5260_v24 = vpop.eup %5259  ;;  %4922 = vmatprep.mubr.msk.f32.mxu1 %vm2503_vm8, %v5258_v8 }
 0x3e0   : > { %5269 = vtanh.f32 %v2833_v27  ;;  %v4832_v57 = vpop.f32.mrb[16].mxu1  ;;  %4923 = vmatmul.mubr.msk.f32.gmra.mrb[72].mxu1 %vm2503_vm8, %v5260_v24 }
 0x3e1   : > { %5271 = vtanh.f32 %v2838_v26  ;;  %v2848_v37 = vadd.f32 %v4832_v57, %v6367_v61  ;;  %4597 = vmatpush3.bf16.msk.msra.mxu1 %vm6857_vm0, %v5381_v59  ;;  %v2842_v40 = vpop.f32.mrb[17].mxu1 }
 0x3e2   : > { %v5262_v36 = vpop.eup %5261  ;;  %v2843_v63 = vadd.f32 %v6367_v61, %v2842_v40  ;;  %4598 = vmatprep.subr.msk.bf16.mxu1 %vm6858_vm3, %v5381_v59 }
 0x3e3   : > { %v5264_v35 = vpop.eup %5263  ;;  %4925 = vmatprep.mubr.msk.f32.mxu1 %vm2503_vm8, %v5262_v36 }
 0x3e4   : > { %5273 = vtanh.f32 %v2843_v63  ;;  %v4835_v51 = vpop.f32.mrb[18].mxu1  ;;  %4926 = vmatmul.mubr.msk.f32.gmra.mrb[74].mxu1 %vm2503_vm8, %v5264_v35 }
 0x3e5   : > { %5275 = vtanh.f32 %v2848_v37  ;;  %v2858_v1 = vadd.f32 %v4835_v51, %v6367_v61  ;;  %4599 = vmatpush3.bf16.msk.msra.mxu1 %vm6859_vm6, %v5381_v59  ;;  %v2852_v47 = vpop.f32.mrb[19].mxu1 }
 0x3e6   : > { %v5266_v45 = vpop.eup %5265  ;;  %v2853_v62 = vadd.f32 %v6367_v61, %v2852_v47  ;;  %4600 = vmatprep.subr.msk.bf16.mxu1 %vm6860_vm7, %v5381_v59 }
 0x3e7   : > { %v5268_v42 = vpop.eup %5267  ;;  %4928 = vmatprep.mubr.msk.f32.mxu1 %vm2503_vm8, %v5266_v45 }
 0x3e8   : > { %5277 = vtanh.f32 %v2853_v62  ;;  %v4838_v44 = vpop.f32.mrb[20].mxu1  ;;  %4929 = vmatmul.mubr.msk.f32.gmra.mrb[76].mxu1 %vm2503_vm8, %v5268_v42 }
 0x3e9   : > { %5279 = vtanh.f32 %v2858_v1  ;;  %v2868_v43 = vadd.f32 %v4838_v44, %v6367_v61  ;;  %4601 = vmatpush3.bf16.msk.msra.mxu1 %vm6861_vm12, %v5381_v59  ;;  %v2862_v54 = vpop.f32.mrb[21].mxu1 }
 0x3ea   : > { %v5270_v0 = vpop.eup %5269  ;;  %v2863_v5 = vadd.f32 %v6367_v61, %v2862_v54  ;;  %4602 = vmatprep.subr.msk.bf16.mxu1 %vm6862_vm4, %v5381_v59 }
 0x3eb   : > { %v5272_v50 = vpop.eup %5271  ;;  %4931 = vmatprep.mubr.msk.f32.mxu1 %vm2503_vm8, %v5270_v0 }
 0x3ec   : > { %5281 = vtanh.f32 %v2863_v5  ;;  %v4841_v6 = vpop.f32.mrb[22].mxu1  ;;  %4932 = vmatmul.mubr.msk.f32.gmra.mrb[78].mxu1 %vm2503_vm8, %v5272_v50 }
 0x3ed   : > { %5283 = vtanh.f32 %v2868_v43  ;;  %v2878_v7 = vadd.f32 %v4841_v6, %v6367_v61  ;;  %4603 = vmatpush3.bf16.msk.msra.mxu1 %vm6863_vm11, %v5381_v59  ;;  %v2872_v60 = vpop.f32.mrb[23].mxu1 }
 0x3ee   : > { %v5274_v10 = vpop.eup %5273  ;;  %v2873_v11 = vadd.f32 %v6367_v61, %v2872_v60 }
 0x3ef   : > { %v5276_v58 = vpop.eup %5275  ;;  %4934 = vmatprep.mubr.msk.f32.mxu1 %vm2503_vm8, %v5274_v10 }
 0x3f0   : > { %5285 = vtanh.f32 %v2873_v11  ;;  %v4844_v12 = vpop.f32.mrb[24].mxu1  ;;  %4935 = vmatmul.mubr.msk.f32.gmra.mrb[80].mxu1 %vm2503_vm8, %v5276_v58 }
 0x3f1   : > { %5287 = vtanh.f32 %v2878_v7  ;;  %v2888_v31 = vadd.f32 %v4844_v12, %v6367_v61  ;;  %v2882_v4 = vpop.f32.mrb[25].mxu1 }
 0x3f2   : > { %v5278_v3 = vpop.eup %5277  ;;  %v2883_v16 = vadd.f32 %v6367_v61, %v2882_v4 }
 0x3f3   : > { %v5280_v2 = vpop.eup %5279  ;;  %4937 = vmatprep.mubr.msk.f32.mxu1 %vm2503_vm8, %v5278_v3 }
 0x3f4   : > { %5289 = vtanh.f32 %v2883_v16  ;;  %v4847_v59 = vpop.f32.mrb[26].mxu1  ;;  %4938 = vmatmul.mubr.msk.f32.gmra.mrb[82].mxu1 %vm2503_vm8, %v5280_v2 }
 0x3f5   : > { %5291 = vtanh.f32 %v2888_v31  ;;  %v2898_v17 = vadd.f32 %v4847_v59, %v6367_v61  ;;  %v2892_v22 = vpop.f32.mrb[27].mxu1 }
 0x3f6   : > { %v5282_v23 = vpop.eup %5281  ;;  %v2893_v32 = vadd.f32 %v6367_v61, %v2892_v22 }
 0x3f7   : > { %v5284_v28 = vpop.eup %5283  ;;  %4940 = vmatprep.mubr.msk.f32.mxu1 %vm2503_vm8, %v5282_v23 }
 0x3f8   : > { %5293 = vtanh.f32 %v2893_v32  ;;  %v4850_v9 = vpop.f32.mrb[28].mxu1  ;;  %4941 = vmatmul.mubr.msk.f32.gmra.mrb[84].mxu1 %vm2503_vm8, %v5284_v28 }
 0x3f9   : > { %5295 = vtanh.f32 %v2898_v17  ;;  %v2908_v29 = vadd.f32 %v4850_v9, %v6367_v61  ;;  %v2902_v33 = vpop.f32.mrb[29].mxu1 }
 0x3fa   : > { %v5286_v38 = vpop.eup %5285  ;;  %v2903_v39 = vadd.f32 %v6367_v61, %v2902_v33 }
 0x3fb   : > { %v5288_v41 = vpop.eup %5287  ;;  %4943 = vmatprep.mubr.msk.f32.mxu1 %vm2503_vm8, %v5286_v38 }
 0x3fc   : > { %5297 = vtanh.f32 %v2903_v39  ;;  %v4853_v46 = vpop.f32.mrb[30].mxu1  ;;  %4944 = vmatmul.mubr.msk.f32.gmra.mrb[86].mxu1 %vm2503_vm8, %v5288_v41 }
 0x3fd   : > { %5299 = vtanh.f32 %v2908_v29  ;;  %v2918_v14 = vadd.f32 %v4853_v46, %v6367_v61  ;;  %v2912_v15 = vpop.f32.mrb[31].mxu1 }
 0x3fe   : > { %v5290_v48 = vpop.eup %5289  ;;  %v2913_v30 = vadd.f32 %v6367_v61, %v2912_v15 }
 0x3ff   : > { %v5292_v20 = vpop.eup %5291  ;;  %4946 = vmatprep.mubr.msk.f32.mxu1 %vm2503_vm8, %v5290_v48 }
 0x400   : > { %5301 = vtanh.f32 %v2913_v30  ;;  %v4856_v21 = vpop.f32.mrb[32].mxu1  ;;  %4947 = vmatmul.mubr.msk.f32.gmra.mrb[88].mxu1 %vm2503_vm8, %v5292_v20 }
 0x401   : > { %5303 = vtanh.f32 %v2918_v14  ;;  %v2928_v19 = vadd.f32 %v4856_v21, %v6367_v61  ;;  %v2922_v13 = vpop.f32.mrb[33].mxu1 }
 0x402   : > { %v5294_v49 = vpop.eup %5293  ;;  %v2923_v52 = vadd.f32 %v6367_v61, %v2922_v13 }
 0x403   : > { %v5296_v25 = vpop.eup %5295  ;;  %4949 = vmatprep.mubr.msk.f32.mxu1 %vm2503_vm8, %v5294_v49 }
 0x404   : > { %5305 = vtanh.f32 %v2923_v52  ;;  %v4859_v53 = vpop.f32.mrb[34].mxu1  ;;  %4950 = vmatmul.mubr.msk.f32.gmra.mrb[90].mxu1 %vm2503_vm8, %v5296_v25 }
 0x405   : > { %5307 = vtanh.f32 %v2928_v19  ;;  %v2938_v55 = vadd.f32 %v4859_v53, %v6367_v61  ;;  %v2932_v18 = vpop.f32.mrb[35].mxu1 }
 0x406   : > { %v5298_v56 = vpop.eup %5297  ;;  %v2933_v26 = vadd.f32 %v6367_v61, %v2932_v18 }
 0x407   : > { %v5300_v34 = vpop.eup %5299  ;;  %4952 = vmatprep.mubr.msk.f32.mxu1 %vm2503_vm8, %v5298_v56 }
 0x408   : > { %5309 = vtanh.f32 %v2933_v26  ;;  %v4862_v8 = vpop.f32.mrb[36].mxu1  ;;  %4953 = vmatmul.mubr.msk.f32.gmra.mrb[92].mxu1 %vm2503_vm8, %v5300_v34 }
 0x409   : > { %5311 = vtanh.f32 %v2938_v55  ;;  %v2948_v27 = vadd.f32 %v4862_v8, %v6367_v61  ;;  %v2942_v24 = vpop.f32.mrb[37].mxu1 }
 0x40a   : > { %v5302_v57 = vpop.eup %5301  ;;  %v2943_v37 = vadd.f32 %v6367_v61, %v2942_v24 }
 0x40b   : > { %v5304_v40 = vpop.eup %5303  ;;  %4955 = vmatprep.mubr.msk.f32.mxu1 %vm2503_vm8, %v5302_v57 }
 0x40c   : > { %5313 = vtanh.f32 %v2943_v37  ;;  %v4865_v36 = vpop.f32.mrb[38].mxu1  ;;  %4956 = vmatmul.mubr.msk.f32.gmra.mrb[94].mxu1 %vm2503_vm8, %v5304_v40 }
 0x40d   : > { %5315 = vtanh.f32 %v2948_v27  ;;  %v2958_v63 = vadd.f32 %v4865_v36, %v6367_v61  ;;  %v2952_v35 = vpop.f32.mrb[39].mxu1 }
 0x40e   : > { %v5306_v51 = vpop.eup %5305  ;;  %v2953_v1 = vadd.f32 %v6367_v61, %v2952_v35 }
 0x40f   : > { %v5308_v47 = vpop.eup %5307  ;;  %4958 = vmatprep.mubr.msk.f32.mxu1 %vm2503_vm8, %v5306_v51 }
 0x410   : > { %5317 = vtanh.f32 %v2953_v1  ;;  %v4868_v45 = vpop.f32.mrb[40].mxu1  ;;  %4959 = vmatmul.mubr.msk.f32.gmra.mrb[96].mxu1 %vm2503_vm8, %v5308_v47 }
 0x411   : > { %5319 = vtanh.f32 %v2958_v63  ;;  %v2968_v62 = vadd.f32 %v4868_v45, %v6367_v61  ;;  %v2962_v42 = vpop.f32.mrb[41].mxu1 }
 0x412   : > { %v5310_v44 = vpop.eup %5309  ;;  %v2963_v43 = vadd.f32 %v6367_v61, %v2962_v42 }
 0x413   : > { %v5312_v54 = vpop.eup %5311  ;;  %4961 = vmatprep.mubr.msk.f32.mxu1 %vm2503_vm8, %v5310_v44 }
 0x414   : > { %5321 = vtanh.f32 %v2963_v43  ;;  %v4871_v0 = vpop.f32.mrb[42].mxu1  ;;  %4962 = vmatmul.mubr.msk.f32.gmra.mrb[98].mxu1 %vm2503_vm8, %v5312_v54 }
 0x415   : > { %5323 = vtanh.f32 %v2968_v62  ;;  %v2978_v5 = vadd.f32 %v4871_v0, %v6367_v61  ;;  %v2972_v50 = vpop.f32.mrb[43].mxu1 }
 0x416   : > { %v5314_v6 = vpop.eup %5313  ;;  %v2973_v7 = vadd.f32 %v6367_v61, %v2972_v50 }
 0x417   : > { %v5316_v60 = vpop.eup %5315  ;;  %4964 = vmatprep.mubr.msk.f32.mxu1 %vm2503_vm8, %v5314_v6 }
 0x418   : > { %5325 = vtanh.f32 %v2973_v7  ;;  %v4874_v10 = vpop.f32.mrb[44].mxu1  ;;  %4965 = vmatmul.mubr.msk.f32.gmra.mrb[100].mxu1 %vm2503_vm8, %v5316_v60 }
 0x419   : > { %5327 = vtanh.f32 %v2978_v5  ;;  %v2988_v11 = vadd.f32 %v4874_v10, %v6367_v61  ;;  %v2982_v58 = vpop.f32.mrb[45].mxu1 }
 0x41a   : > { %v5318_v12 = vpop.eup %5317  ;;  %v2983_v31 = vadd.f32 %v6367_v61, %v2982_v58  ;;  %v6545_v58 = vld [vmem:[%s6767_s9] ss:$0 sm:$0xff] }
 0x41b   : > { %v5320_v4 = vpop.eup %5319  ;;  %4967 = vmatprep.mubr.msk.f32.mxu1 %vm2503_vm8, %v5318_v12 }
 0x41c   : > { %5329 = vtanh.f32 %v2983_v31  ;;  %v4877_v3 = vpop.f32.mrb[46].mxu1  ;;  %4968 = vmatmul.mubr.msk.f32.gmra.mrb[102].mxu1 %vm2503_vm8, %v5320_v4 }
 0x41d   : > { %5331 = vtanh.f32 %v2988_v11  ;;  %v2998_v16 = vadd.f32 %v4877_v3, %v6367_v61  ;;  %v2992_v2 = vpop.f32.mrb[47].mxu1 }
 0x41e   : > { %v5322_v59 = vpop.eup %5321  ;;  %v2993_v17 = vadd.f32 %v6367_v61, %v2992_v2 }
 0x41f   : > { %v5324_v22 = vpop.eup %5323  ;;  %4970 = vmatprep.mubr.msk.f32.mxu1 %vm2503_vm8, %v5322_v59 }
 0x420   : > { %5333 = vtanh.f32 %v2993_v17  ;;  %v4880_v23 = vpop.f32.mrb[48].mxu1  ;;  %4971 = vmatmul.mubr.msk.f32.gmra.mrb[104].mxu1 %vm2503_vm8, %v5324_v22 }
 0x421   : > { %5335 = vtanh.f32 %v2998_v16  ;;  %v3008_v32 = vadd.f32 %v4880_v23, %v6367_v61  ;;  %v3002_v28 = vpop.f32.mrb[49].mxu1 }
 0x422   : > { %v5326_v9 = vpop.eup %5325  ;;  %v3003_v29 = vadd.f32 %v6367_v61, %v3002_v28 }
 0x423   : > { %v5328_v33 = vpop.eup %5327  ;;  %4973 = vmatprep.mubr.msk.f32.mxu1 %vm2503_vm8, %v5326_v9 }
 0x424   : > { %5337 = vtanh.f32 %v3003_v29  ;;  %v4883_v38 = vpop.f32.mrb[50].mxu1  ;;  %4974 = vmatmul.mubr.msk.f32.gmra.mrb[106].mxu1 %vm2503_vm8, %v5328_v33 }
 0x425   : > { %5339 = vtanh.f32 %v3008_v32  ;;  %v3018_v39 = vadd.f32 %v4883_v38, %v6367_v61  ;;  %v3012_v41 = vpop.f32.mrb[51].mxu1 }
 0x426   : > { %v5330_v46 = vpop.eup %5329  ;;  %v3013_v14 = vadd.f32 %v6367_v61, %v3012_v41 }
 0x427   : > { %v5332_v15 = vpop.eup %5331  ;;  %4976 = vmatprep.mubr.msk.f32.mxu1 %vm2503_vm8, %v5330_v46 }
 0x428   : > { %5341 = vtanh.f32 %v3013_v14  ;;  %v4886_v48 = vpop.f32.mrb[52].mxu1  ;;  %4977 = vmatmul.mubr.msk.f32.gmra.mrb[108].mxu1 %vm2503_vm8, %v5332_v15 }
 0x429   : > { %5343 = vtanh.f32 %v3018_v39  ;;  %v3028_v30 = vadd.f32 %v4886_v48, %v6367_v61  ;;  %v3022_v20 = vpop.f32.mrb[53].mxu1 }
 0x42a   : > { %v5334_v21 = vpop.eup %5333  ;;  %v3023_v19 = vadd.f32 %v6367_v61, %v3022_v20 }
 0x42b   : > { %v5336_v13 = vpop.eup %5335  ;;  %4979 = vmatprep.mubr.msk.f32.mxu1 %vm2503_vm8, %v5334_v21 }
 0x42c   : > { %5345 = vtanh.f32 %v3023_v19  ;;  %v4889_v49 = vpop.f32.mrb[54].mxu1  ;;  %4980 = vmatmul.mubr.msk.f32.gmra.mrb[110].mxu1 %vm2503_vm8, %v5336_v13 }
 0x42d   : > { %5347 = vtanh.f32 %v3028_v30  ;;  %v3038_v52 = vadd.f32 %v4889_v49, %v6367_v61  ;;  %v3032_v25 = vpop.f32.mrb[55].mxu1 }
 0x42e   : > { %v5338_v53 = vpop.eup %5337  ;;  %v3033_v55 = vadd.f32 %v6367_v61, %v3032_v25 }
 0x42f   : > { %v5340_v18 = vpop.eup %5339  ;;  %4982 = vmatprep.mubr.msk.f32.mxu1 %vm2503_vm8, %v5338_v53 }
 0x430   : > { %5349 = vtanh.f32 %v3033_v55  ;;  %v4892_v56 = vpop.f32.mrb[56].mxu1  ;;  %4983 = vmatmul.mubr.msk.f32.gmra.mrb[112].mxu1 %vm2503_vm8, %v5340_v18 }
 0x431   : > { %5351 = vtanh.f32 %v3038_v52  ;;  %v3048_v26 = vadd.f32 %v4892_v56, %v6367_v61  ;;  %v3042_v34 = vpop.f32.mrb[57].mxu1 }
 0x432   : > { %v5342_v8 = vpop.eup %5341  ;;  %v3043_v27 = vadd.f32 %v6367_v61, %v3042_v34 }
 0x433   : > { %v5344_v24 = vpop.eup %5343  ;;  %4985 = vmatprep.mubr.msk.f32.mxu1 %vm2503_vm8, %v5342_v8 }
 0x434   : > { %5353 = vtanh.f32 %v3043_v27  ;;  %v4895_v57 = vpop.f32.mrb[58].mxu1  ;;  %4986 = vmatmul.mubr.msk.f32.gmra.mrb[114].mxu1 %vm2503_vm8, %v5344_v24 }
 0x435   : > { %5355 = vtanh.f32 %v3048_v26  ;;  %v3058_v37 = vadd.f32 %v4895_v57, %v6367_v61  ;;  %v3052_v40 = vpop.f32.mrb[59].mxu1 }
 0x436   : > { %v5346_v36 = vpop.eup %5345  ;;  %v3053_v63 = vadd.f32 %v6367_v61, %v3052_v40 }
 0x437   : > { %v5348_v35 = vpop.eup %5347  ;;  %4988 = vmatprep.mubr.msk.f32.mxu1 %vm2503_vm8, %v5346_v36 }
 0x438   : > { %5357 = vtanh.f32 %v3053_v63  ;;  %v4898_v51 = vpop.f32.mrb[60].mxu1  ;;  %4989 = vmatmul.mubr.msk.f32.gmra.mrb[116].mxu1 %vm2503_vm8, %v5348_v35 }
 0x439   : > { %5359 = vtanh.f32 %v3058_v37  ;;  %v3068_v1 = vadd.f32 %v4898_v51, %v6367_v61  ;;  %v3062_v47 = vpop.f32.mrb[61].mxu1 }
 0x43a   : > { %v5350_v45 = vpop.eup %5349  ;;  %v3063_v62 = vadd.f32 %v6367_v61, %v3062_v47 }
 0x43b   : > { %v5352_v42 = vpop.eup %5351  ;;  %4991 = vmatprep.mubr.msk.f32.mxu1 %vm2503_vm8, %v5350_v45 }
 0x43c   : > { %5361 = vtanh.f32 %v3063_v62  ;;  %v4901_v44 = vpop.f32.mrb[62].mxu1  ;;  %4992 = vmatmul.mubr.msk.f32.gmra.mrb[118].mxu1 %vm2503_vm8, %v5352_v42 }
 0x43d   : > { %5363 = vtanh.f32 %v3068_v1  ;;  %v3078_v43 = vadd.f32 %v4901_v44, %v6367_v61  ;;  %v3072_v54 = vpop.f32.mrb[63].mxu1 }
 0x43e   : > { %v5354_v0 = vpop.eup %5353  ;;  %v3073_v5 = vadd.f32 %v6367_v61, %v3072_v54 }
 0x43f   : > { %v5356_v50 = vpop.eup %5355  ;;  %4994 = vmatprep.mubr.msk.f32.mxu1 %vm2503_vm8, %v5354_v0 }
 0x440   : > { %5365 = vtanh.f32 %v3073_v5  ;;  %4995 = vmatmul.mubr.msk.f32.gmra.mrb[120].mxu1 %vm2503_vm8, %v5356_v50 }
 0x441   : > { %5367 = vtanh.f32 %v3078_v43 }
 0x442   : > { %v5358_v6 = vpop.eup %5357 }
 0x443   : > { %v5360_v7 = vpop.eup %5359  ;;  %4997 = vmatprep.mubr.msk.f32.mxu1 %vm2503_vm8, %v5358_v6 }
 0x444   : > { %4998 = vmatmul.mubr.msk.f32.gmra.mrb[122].mxu1 %vm2503_vm8, %v5360_v7 }
 0x446   : > { %v5362_v60 = vpop.eup %5361 }
 0x447   : > { %v5364_v10 = vpop.eup %5363  ;;  %5000 = vmatprep.mubr.msk.f32.mxu1 %vm2503_vm8, %v5362_v60 }
 0x448   : > { %5001 = vmatmul.mubr.msk.f32.gmra.mrb[124].mxu1 %vm2503_vm8, %v5364_v10 }
 0x44a   : > { %v5366_v61 = vpop.eup %5365 }
 0x44b   : > { %v5368_v11 = vpop.eup %5367  ;;  %5003 = vmatprep.mubr.msk.f32.mxu1 %vm2503_vm8, %v5366_v61 }
 0x44c   : > { %5004 = vmatmul.mubr.msk.f32.gmra.mrb[126].mxu1 %vm2503_vm8, %v5368_v11 }
 0x4a3   : > { %v4912_v12 = vpop.f32.mrb[64].mxu1 }
 0x4a4   : > { %v6548_v31 = vadd.f32 %v4912_v12, %v6545_v58  ;;  %v3414_v4 = vpop.f32.mrb[65].mxu1 }
 0x4a5   : > { %v6551_v3 = vadd.f32 %v6545_v58, %v3414_v4 }
 0x4a7   : > { %v3733_v16 = vpack.c.bf16 %v6548_v31, %v6551_v3  ;;  %v4915_v2 = vpop.f32.mrb[66].mxu1 }
 0x4a8   : > { %v6556_v59 = vadd.f32 %v4915_v2, %v6545_v58  ;;  %v3424_v17 = vpop.f32.mrb[67].mxu1 }
 0x4a9   : > { %v6559_v22 = vadd.f32 %v6545_v58, %v3424_v17 }
 0x4ab   : > { %v3734_v23 = vpack.c.bf16 %v6556_v59, %v6559_v22  ;;  %v4918_v32 = vpop.f32.mrb[68].mxu1 }
 0x4ac   : > { %v6564_v28 = vadd.f32 %v4918_v32, %v6545_v58  ;;  %v3434_v9 = vpop.f32.mrb[69].mxu1 }
 0x4ad   : > { %v6567_v29 = vadd.f32 %v6545_v58, %v3434_v9 }
 0x4af   : > { %v3735_v33 = vpack.c.bf16 %v6564_v28, %v6567_v29  ;;  %v4921_v38 = vpop.f32.mrb[70].mxu1 }
 0x4b0   : > { %v6572_v39 = vadd.f32 %v4921_v38, %v6545_v58  ;;  %v3444_v41 = vpop.f32.mrb[71].mxu1 }
 0x4b1   : > { %v6575_v46 = vadd.f32 %v6545_v58, %v3444_v41 }
 0x4b3   : > { %v3736_v14 = vpack.c.bf16 %v6572_v39, %v6575_v46  ;;  %v4924_v15 = vpop.f32.mrb[72].mxu1 }
 0x4b4   : > { %v6580_v48 = vadd.f32 %v4924_v15, %v6545_v58  ;;  %v3454_v30 = vpop.f32.mrb[73].mxu1 }
 0x4b5   : > { %v6583_v20 = vadd.f32 %v6545_v58, %v3454_v30 }
 0x4b7   : > { %v3737_v21 = vpack.c.bf16 %v6580_v48, %v6583_v20  ;;  %v4927_v19 = vpop.f32.mrb[74].mxu1 }
 0x4b8   : > { %v6588_v13 = vadd.f32 %v4927_v19, %v6545_v58  ;;  %v3464_v49 = vpop.f32.mrb[75].mxu1 }
 0x4b9   : > { %v6591_v52 = vadd.f32 %v6545_v58, %v3464_v49 }
 0x4bb   : > { %v3738_v25 = vpack.c.bf16 %v6588_v13, %v6591_v52  ;;  %v4930_v53 = vpop.f32.mrb[76].mxu1 }
 0x4bc   : > { %v6596_v55 = vadd.f32 %v4930_v53, %v6545_v58  ;;  %v3474_v18 = vpop.f32.mrb[77].mxu1 }
 0x4bd   : > { %v6599_v56 = vadd.f32 %v6545_v58, %v3474_v18 }
 0x4bf   : > { %v3739_v26 = vpack.c.bf16 %v6596_v55, %v6599_v56  ;;  %v4933_v34 = vpop.f32.mrb[78].mxu1 }
 0x4c0   : > { %v6604_v8 = vadd.f32 %v4933_v34, %v6545_v58  ;;  %v3484_v27 = vpop.f32.mrb[79].mxu1 }
 0x4c1   : > { %v6607_v24 = vadd.f32 %v6545_v58, %v3484_v27 }
 0x4c3   : > { %v3740_v57 = vpack.c.bf16 %v6604_v8, %v6607_v24  ;;  %v4936_v37 = vpop.f32.mrb[80].mxu1 }
 0x4c4   : > { %v3500_v40 = vadd.f32 %v4936_v37, %v6545_v58  ;;  %v3494_v36 = vpop.f32.mrb[81].mxu1 }
 0x4c5   : > { %v3495_v63 = vadd.f32 %v6545_v58, %v3494_v36 }
 0x4c7   : > { %v3741_v35 = vpack.c.bf16 %v3500_v40, %v3495_v63  ;;  %v4939_v51 = vpop.f32.mrb[82].mxu1 }
 0x4c8   : > { %v3510_v1 = vadd.f32 %v4939_v51, %v6545_v58  ;;  %v3504_v47 = vpop.f32.mrb[83].mxu1 }
 0x4c9   : > { %v3505_v45 = vadd.f32 %v6545_v58, %v3504_v47  ;;  %3781 = vxpose.xlu0.c.b16.start [1/8] (narrow) %v3741_v35, 16 }
 0x4cb   : > { %v3742_v62 = vpack.c.bf16 %v3510_v1, %v3505_v45  ;;  %v4942_v42 = vpop.f32.mrb[84].mxu1 }
 0x4cc   : > { %v3520_v44 = vadd.f32 %v4942_v42, %v6545_v58  ;;  %v3514_v43 = vpop.f32.mrb[85].mxu1 }
 0x4cd   : > { %v3515_v54 = vadd.f32 %v6545_v58, %v3514_v43  ;;  %3782 = vxpose.xlu0.c.b16.cont [2/8] (narrow) %v3742_v62, 16 }
 0x4cf   : > { %v3743_v0 = vpack.c.bf16 %v3520_v44, %v3515_v54  ;;  %v4945_v5 = vpop.f32.mrb[86].mxu1 }
 0x4d0   : > { %v3530_v50 = vadd.f32 %v4945_v5, %v6545_v58  ;;  %v3524_v6 = vpop.f32.mrb[87].mxu1 }
 0x4d1   : > { %v3525_v7 = vadd.f32 %v6545_v58, %v3524_v6  ;;  %3783 = vxpose.xlu0.c.b16.cont [3/8] (narrow) %v3743_v0, 16 }
 0x4d3   : > { %v3744_v60 = vpack.c.bf16 %v3530_v50, %v3525_v7  ;;  %v4948_v10 = vpop.f32.mrb[88].mxu1 }
 0x4d4   : > { %v3540_v61 = vadd.f32 %v4948_v10, %v6545_v58  ;;  %v3534_v11 = vpop.f32.mrb[89].mxu1 }
 0x4d5   : > { %v3535_v12 = vadd.f32 %v6545_v58, %v3534_v11  ;;  %3784 = vxpose.xlu0.c.b16.cont [4/8] (narrow) %v3744_v60, 16 }
 0x4d7   : > { %v3745_v4 = vpack.c.bf16 %v3540_v61, %v3535_v12  ;;  %v4951_v2 = vpop.f32.mrb[90].mxu1 }
 0x4d8   : > { %v3550_v17 = vadd.f32 %v4951_v2, %v6545_v58  ;;  %v3544_v32 = vpop.f32.mrb[91].mxu1 }
 0x4d9   : > { %v3545_v9 = vadd.f32 %v6545_v58, %v3544_v32  ;;  %3785 = vxpose.xlu0.c.b16.cont [5/8] (narrow) %v3745_v4, 16 }
 0x4db   : > { %v3746_v38 = vpack.c.bf16 %v3550_v17, %v3545_v9  ;;  %v4954_v41 = vpop.f32.mrb[92].mxu1 }
 0x4dc   : > { %v3560_v15 = vadd.f32 %v4954_v41, %v6545_v58  ;;  %v3554_v30 = vpop.f32.mrb[93].mxu1 }
 0x4dd   : > { %v3555_v19 = vadd.f32 %v6545_v58, %v3554_v30  ;;  %3786 = vxpose.xlu0.c.b16.cont [6/8] (narrow) %v3746_v38, 16 }
 0x4df   : > { %v3747_v49 = vpack.c.bf16 %v3560_v15, %v3555_v19  ;;  %v4957_v53 = vpop.f32.mrb[94].mxu1 }
 0x4e0   : > { %v3570_v18 = vadd.f32 %v4957_v53, %v6545_v58  ;;  %v3564_v34 = vpop.f32.mrb[95].mxu1 }
 0x4e1   : > { %v3565_v27 = vadd.f32 %v6545_v58, %v3564_v34  ;;  %3787 = vxpose.xlu0.c.b16.cont [7/8] (narrow) %v3747_v49, 16 }
 0x4e3   : > { %v3748_v37 = vpack.c.bf16 %v3570_v18, %v3565_v27  ;;  %v4960_v40 = vpop.f32.mrb[96].mxu1 }
 0x4e4   : > { %v6628_v36 = vadd.f32 %v4960_v40, %v6545_v58  ;;  %v3574_v63 = vpop.f32.mrb[97].mxu1 }
 0x4e5   : > { %v6631_v35 = vadd.f32 %v6545_v58, %v3574_v63  ;;  %3788 = vxpose.xlu0.c.b16.end [8/8] (narrow) %v3748_v37, 16 }
 0x4e7   : > { %v3749_v51 = vpack.c.bf16 %v6628_v36, %v6631_v35  ;;  %v4963_v1 = vpop.f32.mrb[98].mxu1 }
 0x4e8   : > { %v6636_v47 = vadd.f32 %v4963_v1, %v6545_v58  ;;  %v3584_v45 = vpop.f32.mrb[99].mxu1 }
 0x4e9   : > { %v6639_v62 = vadd.f32 %v6545_v58, %v3584_v45  ;;  %3765 = vxpose.xlu0.c.b16.start [1/8] (narrow) %v3733_v16, 16 }
 0x4eb   : > { %v3750_v42 = vpack.c.bf16 %v6636_v47, %v6639_v62  ;;  %v4966_v44 = vpop.f32.mrb[100].mxu1 }
 0x4ec   : > { %v6647_v43 = vadd.f32 %v4966_v44, %v6545_v58  ;;  %v3594_v54 = vpop.f32.mrb[101].mxu1 }
 0x4ed   : > { %v6650_v0 = vadd.f32 %v6545_v58, %v3594_v54  ;;  %3766 = vxpose.xlu0.c.b16.cont [2/8] (narrow) %v3734_v23, 16 }
 0x4ef   : > { %v3751_v5 = vpack.c.bf16 %v6647_v43, %v6650_v0  ;;  %v4969_v31 = vpop.f32.mrb[102].mxu1 }
 0x4f0   : > { %v6658_v3 = vadd.f32 %v4969_v31, %v6545_v58  ;;  %v3604_v16 = vpop.f32.mrb[103].mxu1 }
 0x4f1   : > { %v6661_v50 = vadd.f32 %v6545_v58, %v3604_v16  ;;  %3767 = vxpose.xlu0.c.b16.cont [3/8] (narrow) %v3735_v33, 16 }
 0x4f3   : > { %v3752_v6 = vpack.c.bf16 %v6658_v3, %v6661_v50  ;;  %v4972_v59 = vpop.f32.mrb[104].mxu1 }
 0x4f4   : > { %v6669_v22 = vadd.f32 %v4972_v59, %v6545_v58  ;;  %v3614_v23 = vpop.f32.mrb[105].mxu1 }
 0x4f5   : > { %v6672_v7 = vadd.f32 %v6545_v58, %v3614_v23  ;;  %3768 = vxpose.xlu0.c.b16.cont [4/8] (narrow) %v3736_v14, 16 }
 0x4f7   : > { %v3753_v60 = vpack.c.bf16 %v6669_v22, %v6672_v7  ;;  %v4975_v28 = vpop.f32.mrb[106].mxu1 }
 0x4f8   : > { %v6680_v29 = vadd.f32 %v4975_v28, %v6545_v58  ;;  %v3624_v33 = vpop.f32.mrb[107].mxu1 }
 0x4f9   : > { %v6683_v10 = vadd.f32 %v6545_v58, %v3624_v33  ;;  %3769 = vxpose.xlu0.c.b16.cont [5/8] (narrow) %v3737_v21, 16 }
 0x4fb   : > { %v3754_v61 = vpack.c.bf16 %v6680_v29, %v6683_v10  ;;  %v4978_v39 = vpop.f32.mrb[108].mxu1 }
 0x4fc   : > { %v6691_v46 = vadd.f32 %v4978_v39, %v6545_v58  ;;  %v3634_v14 = vpop.f32.mrb[109].mxu1 }
 0x4fd   : > { %v6694_v11 = vadd.f32 %v6545_v58, %v3634_v14  ;;  %3770 = vxpose.xlu0.c.b16.cont [6/8] (narrow) %v3738_v25, 16 }
 0x4ff   : > { %v3755_v12 = vpack.c.bf16 %v6691_v46, %v6694_v11  ;;  %v4981_v48 = vpop.f32.mrb[110].mxu1 }
 0x500   : > { %v6702_v20 = vadd.f32 %v4981_v48, %v6545_v58  ;;  %v3644_v21 = vpop.f32.mrb[111].mxu1 }
 0x501   : > { %v3645_v4 = vadd.f32 %v6545_v58, %v3644_v21  ;;  %3771 = vxpose.xlu0.c.b16.cont [7/8] (narrow) %v3739_v26, 16 }
 0x503   : > { %v3756_v2 = vpack.c.bf16 %v6702_v20, %v3645_v4  ;;  %v4984_v17 = vpop.f32.mrb[112].mxu1 }
 0x504   : > { %v3660_v13 = vadd.f32 %v4984_v17, %v6545_v58  ;;  %v3654_v52 = vpop.f32.mrb[113].mxu1 }
 0x505   : > { %v3655_v25 = vadd.f32 %v6545_v58, %v3654_v52  ;;  %3772 = vxpose.xlu0.c.b16.end [8/8] (narrow) %v3740_v57, 16 }
 0x507   : > { %v3757_v32 = vpack.c.bf16 %v3660_v13, %v3655_v25  ;;  %v4987_v9 = vpop.f32.mrb[114].mxu1 }
 0x508   : > { %v3670_v38 = vadd.f32 %v4987_v9, %v6545_v58  ;;  %v3664_v41 = vpop.f32.mrb[115].mxu1 }
 0x509   : > { %v3665_v55 = vadd.f32 %v6545_v58, %v3664_v41  ;;  %3813 = vxpose.xlu1.c.b16.start [1/8] (narrow) %v3757_v32, 16 }
 0x50b   : > { %v3758_v56 = vpack.c.bf16 %v3670_v38, %v3665_v55  ;;  %v4990_v26 = vpop.f32.mrb[116].mxu1 }
 0x50c   : > { %v3680_v15 = vadd.f32 %v4990_v26, %v6545_v58  ;;  %v3674_v30 = vpop.f32.mrb[117].mxu1 }
 0x50d   : > { %v3675_v19 = vadd.f32 %v6545_v58, %v3674_v30  ;;  %3814 = vxpose.xlu1.c.b16.cont [2/8] (narrow) %v3758_v56, 16 }
 0x50f   : > { %v3759_v49 = vpack.c.bf16 %v3680_v15, %v3675_v19  ;;  %v4993_v53 = vpop.f32.mrb[118].mxu1 }
 0x510   : > { %v3690_v8 = vadd.f32 %v4993_v53, %v6545_v58  ;;  %v3684_v24 = vpop.f32.mrb[119].mxu1 }
 0x511   : > { %v3685_v57 = vadd.f32 %v6545_v58, %v3684_v24  ;;  %3815 = vxpose.xlu1.c.b16.cont [3/8] (narrow) %v3759_v49, 16 }
 0x513   : > { %v3760_v18 = vpack.c.bf16 %v3690_v8, %v3685_v57  ;;  %v4996_v34 = vpop.f32.mrb[120].mxu1 }
 0x514   : > { %v3700_v27 = vadd.f32 %v4996_v34, %v6545_v58  ;;  %v3694_v37 = vpop.f32.mrb[121].mxu1 }
 0x515   : > { %v3695_v40 = vadd.f32 %v6545_v58, %v3694_v37  ;;  %3816 = vxpose.xlu1.c.b16.cont [4/8] (narrow) %v3760_v18, 16 }
 0x517   : > { %v3761_v63 = vpack.c.bf16 %v3700_v27, %v3695_v40  ;;  %v4999_v1 = vpop.f32.mrb[122].mxu1 }
 0x518   : > { %v3710_v45 = vadd.f32 %v4999_v1, %v6545_v58  ;;  %v3704_v44 = vpop.f32.mrb[123].mxu1 }
 0x519   : > { %v3705_v54 = vadd.f32 %v6545_v58, %v3704_v44  ;;  %3817 = vxpose.xlu1.c.b16.cont [5/8] (narrow) %v3761_v63, 16 }
 0x51b   : > { %v3762_v31 = vpack.c.bf16 %v3710_v45, %v3705_v54  ;;  %v5002_v16 = vpop.f32.mrb[124].mxu1 }
 0x51c   : > { %v3720_v59 = vadd.f32 %v5002_v16, %v6545_v58  ;;  %v3714_v23 = vpop.f32.mrb[125].mxu1 }
 0x51d   : > { %v3715_v28 = vadd.f32 %v6545_v58, %v3714_v23  ;;  %3818 = vxpose.xlu1.c.b16.cont [6/8] (narrow) %v3762_v31, 16 }
 0x51f   : > { %v3763_v33 = vpack.c.bf16 %v3720_v59, %v3715_v28  ;;  %v5005_v39 = vpop.f32.mrb[126].mxu1 }
 0x520   : > { %v3730_v14 = vadd.f32 %v5005_v39, %v6545_v58  ;;  %v3724_v48 = vpop.f32.mrb[127].mxu1 }
 0x521   : > { %v3725_v20 = vadd.f32 %v6545_v58, %v3724_v48  ;;  %3819 = vxpose.xlu1.c.b16.cont [7/8] (narrow) %v3763_v33, 16 }
 0x523   : > { %v3764_v21 = vpack.c.bf16 %v3730_v14, %v3725_v20 }
 0x525   : > { %3820 = vxpose.xlu1.c.b16.end [8/8] (narrow) %v3764_v21, 16 }
 0x529   : > { %3797 = vxpose.xlu1.c.b16.start [1/8] (narrow) %v3749_v51, 16 }
 0x52d   : > { %3798 = vxpose.xlu1.c.b16.cont [2/8] (narrow) %v3750_v42, 16 }
 0x52f   : > { %v3789_v4 = vpop.trf.xlu0 }
 0x530   : > { %3861 = vmatprep.mubr.bf16.mxu1 %v3789_v4 }
 0x531   : > { %3799 = vxpose.xlu1.c.b16.cont [3/8] (narrow) %v3751_v5, 16 }
 0x535   : > { %3800 = vxpose.xlu1.c.b16.cont [4/8] (narrow) %v3752_v6, 16  ;;  %v3909_v6 = vld [vmem:[%s6768_s10] sm:$0x3] }
 0x539   : > { %3801 = vxpose.xlu1.c.b16.cont [5/8] (narrow) %v3753_v60, 16 }
 0x53d   : > { %3802 = vxpose.xlu1.c.b16.cont [6/8] (narrow) %v3754_v61, 16 }
 0x541   : > { %3803 = vxpose.xlu1.c.b16.cont [7/8] (narrow) %v3755_v12, 16 }
 0x545   : > { %3804 = vxpose.xlu1.c.b16.end [8/8] (narrow) %v3756_v2, 16 }
 0x54f   : > { %v3773_v58 = vpop.trf.xlu0 }
 0x550   : > { %3862 = vmatmul.mubr.bf16.vlgmr.msra.gmra.mrb[128].mxu1 %v3773_v58 }
 0x56f   : > { %v3821_v36 = vpop.trf.xlu1 }
 0x570   : > { %3901 = vmatprep.mubr.bf16.mxu0 %v3821_v36 }
 0x58f   : > { %v3805_v35 = vpop.trf.xlu1 }
 0x590   : > { %3902 = vmatmul.mubr.bf16.vlgmr.msra.gmra.mrb[64].mxu0 %v3805_v35 }
 0x623   : > { %v4604_v51 = vpop.f32.mrb[128].mxu1 }
 0x624   : > { %v4605_v47 = vpop.f32.mrb[129].mxu1 }
 0x625   : > { %v4606_v62 = vadd.f32 %v4605_v47, %v4604_v51  ;;  %v4607_v42 = vpop.f32.mrb[130].mxu1 }
 0x626   : > { %v4608_v43 = vpop.f32.mrb[131].mxu1 }
 0x663   : > { %v4626_v0 = vpop.f32.mrb[64].mxu0 }
 0x664   : > { %v4627_v5 = vpop.f32.mrb[65].mxu0 }
 0x665   : > { %v4628_v3 = vadd.f32 %v4627_v5, %v4626_v0  ;;  %v4629_v50 = vpop.f32.mrb[66].mxu0 }
 0x666   : > { %v4630_v22 = vpop.f32.mrb[67].mxu0 }
 0x667   : > { %v3904_v7 = vadd.f32 %v4628_v3, %v4606_v62 }
 0x669   : > { %v3910_v60 = vadd.f32 %v3909_v6, %v3904_v7 }
 0x66b   : > { %3912 = vst.msk [vmem:[%s6768_s10] sm:$0x3] %vm3911_vm1, %v3910_v60 }
 0x66c PF: > { %s20_s13 = sadd.s32 1, %s5375_s13  }
 0x66d   : > { %p17_p5 = scmp.ge.s32.totalorder %s20_s13, 4  }
 0x66f   :  { %19 = sbr.rel (!%p17_p5) target bundleno = 1 (0x1), region = 97 }

</bundles_post_ra>
